<compile_context>
chip_gen: v7x
topology: tpu7x:2x2x1
jax: 0.10.0
libtpu: 0.0.40
codegen_flags: <defaults>
</compile_context>

<pallas_src>
import functools

import jax
import jax.numpy as jnp
from jax import lax
from jax.experimental import pallas as pl
from jax.experimental.pallas import tpu as pltpu


class config:
    kernel_size = 5
    padding = 2
    stride = 2
    fc_input = 4
    decoder_channels = [64, 32, 16, 3]
    output_pad_dec = [True, True, True]


_VMEM_LIMIT = 32 * 1024 * 1024


def _pick_tile(n, prefs=(512, 256, 128, 64, 32, 16, 8)):
    for t in prefs:
        if n % t == 0:
            return t
    return n


# ---------------------------------------------------------------------------
# Kernel 1: fused DecoderBlock hot path (single grid step, everything resident)
#   y = patches @ W_phase            (bf16 MXU, f32 accumulate)
#   per-channel BN batch stats pooled over the 4 sub-pixel phase column groups
#   via a precomputed 0/1 pooling/broadcast matrix (tiny f32 MXU dot),
#   affine + ReLU, bf16 output for the next layer's patches.
def _block_kernel(a_ref, w_ref, pb_ref, g_ref, b_ref, o_ref, *, inv_cnt, eps):
    y = jnp.dot(a_ref[...], w_ref[...], preferred_element_type=jnp.float32)
    s1 = jnp.sum(y, axis=0, keepdims=True)                  # (1, Nc)
    s2 = jnp.sum(y * y, axis=0, keepdims=True)              # (1, Nc)
    # pool over phases and broadcast back to every column (pure MXU, no lane ops)
    mean = jnp.dot(s1, pb_ref[...], preferred_element_type=jnp.float32) * inv_cnt
    ex2 = jnp.dot(s2, pb_ref[...], preferred_element_type=jnp.float32) * inv_cnt
    var = jnp.maximum(ex2 - mean * mean, 0.0)                # guard fp cancellation
    scale = g_ref[...] * lax.rsqrt(var + eps)
    shift = b_ref[...] - mean * scale
    o_ref[...] = jnp.maximum(y * scale + shift, 0.0).astype(o_ref.dtype)


def block_gemm_bn_relu(patches, w2, pb, gamma_t, beta_t, count, eps=1e-5):
    """(M,K)bf16 @ (K,Nc)bf16 -> BN(train, biased var) -> ReLU -> (M,Nc)bf16."""
    M, K = patches.shape
    _, Nc = w2.shape
    kernel = functools.partial(_block_kernel, inv_cnt=float(1.0 / count), eps=eps)
    cost = pl.CostEstimate(
        flops=int(2 * M * K * Nc + 4 * Nc * Nc + 8 * M * Nc),
        transcendentals=int(Nc),
        bytes_accessed=int(M * K * 2 + K * Nc * 2 + Nc * Nc * 4 + 8 * Nc
                           + M * Nc * 2))
    return pl.pallas_call(
        kernel,
        out_shape=jax.ShapeDtypeStruct((M, Nc), jnp.bfloat16),
        grid_spec=pltpu.PrefetchScalarGridSpec(
            num_scalar_prefetch=0,
            grid=(1,),
            in_specs=[pl.BlockSpec((M, K), lambda i: (0, 0)),
                      pl.BlockSpec((K, Nc), lambda i: (0, 0)),
                      pl.BlockSpec((Nc, Nc), lambda i: (0, 0)),
                      pl.BlockSpec((1, Nc), lambda i: (0, 0)),
                      pl.BlockSpec((1, Nc), lambda i: (0, 0))],
            out_specs=pl.BlockSpec((M, Nc), lambda i: (0, 0))),
        compiler_params=pltpu.CompilerParams(
            dimension_semantics=("arbitrary",),
            vmem_limit_bytes=_VMEM_LIMIT),
        cost_estimate=cost,
    )(patches, w2, pb, gamma_t, beta_t)


# ---------------------------------------------------------------------------
# Kernel 2: final Conv2d as GEMM with fused bias + tanh (stats-free).
# Row-tiled with "parallel" semantics so v7x megacore splits the largest GEMM.
def _conv_tanh_kernel(a_ref, w_ref, b_ref, o_ref):
    y = jnp.dot(a_ref[...], w_ref[...], preferred_element_type=jnp.float32)
    o_ref[...] = jnp.tanh(y + b_ref[...]).astype(o_ref.dtype)


def conv_bias_tanh(patches, w2, bias_row):
    M, K = patches.shape
    _, Nc = w2.shape
    tm = _pick_tile(M)
    cost = pl.CostEstimate(
        flops=int(2 * M * K * Nc + M * Nc),
        transcendentals=int(M * Nc),
        bytes_accessed=int(M * K * 2 + K * Nc * 2 + Nc * 4 + M * Nc * 4))
    return pl.pallas_call(
        _conv_tanh_kernel,
        out_shape=jax.ShapeDtypeStruct((M, Nc), jnp.float32),
        grid_spec=pltpu.PrefetchScalarGridSpec(
            num_scalar_prefetch=0,
            grid=(M // tm,),
            in_specs=[pl.BlockSpec((tm, K), lambda i: (i, 0)),
                      pl.BlockSpec((K, Nc), lambda i: (0, 0)),
                      pl.BlockSpec((1, Nc), lambda i: (0, 0))],
            out_specs=pl.BlockSpec((tm, Nc), lambda i: (i, 0))),
        compiler_params=pltpu.CompilerParams(
            dimension_semantics=("parallel",),
            vmem_limit_bytes=_VMEM_LIMIT),
        cost_estimate=cost,
    )(patches, w2, bias_row)


# ---------------------------------------------------------------------------
# Layout glue (XLA): stride-1 im2col and ConvTranspose sub-pixel weight packing.
def _patches(x, win, pad):
    """Stride-1 im2col: (N,H,W,C) -> (N*H*W, win*win*C), column order (a,b,c)."""
    N, H, W, C = x.shape
    xp = jnp.pad(x, ((0, 0), (pad, pad), (pad, pad), (0, 0)))
    cols = [xp[:, a:a + H, b:b + W, :] for a in range(win) for b in range(win)]
    return jnp.concatenate(cols, axis=-1).reshape(N * H * W, win * win * C)


def convT_phase_weight(w_pt):
    """Pack ConvTranspose2d(k5,s2,p2) weight (Cin,Cout,5,5) into (9*Cin, 4*Cout).

    For output phase (pr,pc) in {even,odd}^2 the transposed conv reduces to a
    stride-1 3x3 conv on the 1-padded, un-dilated input:
      even taps (4,2,0) at window offsets (0,1,2); odd taps (3,1) at (1,2).
    The four phase sub-kernels are stacked along the output (column) axis so a
    single GEMM produces all four sub-pixel phases."""
    Cin, Cout = w_pt.shape[0], w_pt.shape[1]
    w = jnp.transpose(w_pt, (2, 3, 0, 1))               # (kh, kw, Cin, Cout)
    zero = jnp.zeros((Cin, Cout), w.dtype)
    even = [4, 2, 0]
    odd = [None, 3, 1]
    phases = []
    for ridx in (even, odd):
        for cidx in (even, odd):
            taps = [zero if (ridx[a] is None or cidx[b] is None)
                    else w[ridx[a], cidx[b]]
                    for a in range(3) for b in range(3)]
            phases.append(jnp.stack(taps, 0).reshape(9 * Cin, Cout))
    return jnp.concatenate(phases, axis=1)               # (9*Cin, 4*Cout)


def pack_params(params):
    """Hoisted (one-time) weight packing: phase weights, bf16 casts, tiled
    gamma/beta rows, phase-pooling matrices, final-conv GEMM weight."""
    packed = {
        "fc_w": params["fc_w"],
        "fc_gamma": params["fc_gamma"],
        "fc_beta": params["fc_beta"],
    }
    for b in range(3):
        cout = params[f"ct{b}_w"].shape[1]
        packed[f"ct{b}_w2"] = convT_phase_weight(
            params[f"ct{b}_w"]).astype(jnp.bfloat16)      # (9*Cin, 4*Cout)
        packed[f"ct{b}_pb"] = jnp.tile(
            jnp.eye(cout, dtype=jnp.float32), (4, 4))     # (4*Cout, 4*Cout)
        packed[f"ct{b}_gamma2"] = jnp.tile(
            params[f"ct{b}_gamma"].astype(jnp.float32), 4).reshape(1, 4 * cout)
        packed[f"ct{b}_beta2"] = jnp.tile(
            params[f"ct{b}_beta"].astype(jnp.float32), 4).reshape(1, 4 * cout)
    cout = params["out_w"].shape[0]
    packed["out_w2"] = jnp.transpose(
        params["out_w"], (2, 3, 1, 0)).reshape(-1, cout).astype(jnp.bfloat16)
    packed["out_b2"] = params["out_b"].astype(jnp.float32).reshape(1, cout)
    return packed


def decoder_block(x, w2, pb, gamma_t, beta_t, output_padding):
    """ConvTranspose2d(k5,s2,p2,op,bias=False) + BatchNorm2d + ReLU (NHWC)."""
    N, H, W, Cin = x.shape
    Nc = w2.shape[1]
    cout = Nc // 4
    patches = _patches(x, 3, 1)                                   # bf16
    ya = block_gemm_bn_relu(patches, w2, pb, gamma_t, beta_t,
                            count=4 * N * H * W)                  # fused kernel
    # interleave the 4 sub-pixel phases -> (N, 2H, 2W, Cout)
    ya = ya.reshape(N, H, W, 2, 2, cout)
    out = jnp.transpose(ya, (0, 1, 3, 2, 4, 5)).reshape(N, 2 * H, 2 * W, cout)
    if not output_padding:                                        # op == 0
        out = out[:, :2 * H - 1, :2 * W - 1, :]
    return out


# ---------------------------------------------------------------------------
def init_decoder_params(key, z_size, size):
    k = config.kernel_size
    fc_out = config.fc_input * config.fc_input * size
    keys = jax.random.split(key, 6)
    params = {
        "fc_w": jax.random.normal(keys[0], (z_size, fc_out), jnp.float32) * 0.05,
        "fc_gamma": jnp.ones((fc_out,), jnp.float32),
        "fc_beta": jnp.zeros((fc_out,), jnp.float32),
    }
    chans = [size, size, config.decoder_channels[1], config.decoder_channels[2]]
    for b in range(3):
        cin, cout = chans[b], chans[b + 1]
        params[f"ct{b}_w"] = jax.random.normal(
            keys[1 + b], (cin, cout, k, k), jnp.float32) * 0.05
        params[f"ct{b}_gamma"] = jnp.ones((cout,), jnp.float32)
        params[f"ct{b}_beta"] = jnp.zeros((cout,), jnp.float32)
    cin, cout = config.decoder_channels[2], config.decoder_channels[3]
    params["out_w"] = jax.random.normal(keys[4], (cout, cin, k, k), jnp.float32) * 0.05
    params["out_b"] = jax.random.normal(keys[5], (cout,), jnp.float32) * 0.05
    return params


def decoder_forward(packed, z, size):
    N = z.shape[0]
    eps = 1e-5

    # fc: Linear(bias=False) + BatchNorm1d(batch stats) + ReLU.  Tiny (2x32 @
    # 32x1024): plain XLA f32 is cheaper than a pallas_call and keeps the
    # cancellation-prone batch-of-2 variance in f32.
    y = z @ packed["fc_w"]
    mean = jnp.mean(y, axis=0)
    var = jnp.maximum(jnp.mean(y * y, axis=0) - mean * mean, 0.0)
    y = (y - mean) * (packed["fc_gamma"] / jnp.sqrt(var + eps)) + packed["fc_beta"]
    y = jnp.maximum(y, 0.0)
    x = jnp.transpose(y.reshape(N, size, config.fc_input, config.fc_input),
                      (0, 2, 3, 1)).astype(jnp.bfloat16)          # NHWC bf16

    # three DecoderBlocks, each a single fused Pallas kernel.
    for b in range(3):
        x = decoder_block(x, packed[f"ct{b}_w2"], packed[f"ct{b}_pb"],
                          packed[f"ct{b}_gamma2"], packed[f"ct{b}_beta2"],
                          config.output_pad_dec[b])

    # final Conv2d(k5, s1, p2) + bias + Tanh, fused GEMM epilogue.
    Nn, H, W, _ = x.shape
    cout = packed["out_w2"].shape[1]
    patches = _patches(x, 5, 2)                                   # bf16
    yo = conv_bias_tanh(patches, packed["out_w2"], packed["out_b2"])
    out = yo.reshape(Nn, H, W, cout)
    return jnp.transpose(out, (0, 3, 1, 2))                       # NCHW


# ---------------------------------------------------------------------------
def decoder_reference(params, z, size):
    """Pure-XLA f32 reference with identical semantics (validation only)."""
    eps = 1e-5
    N = z.shape[0]
    y = z @ params["fc_w"]
    mean = jnp.mean(y, 0)
    var = jnp.mean(y * y, 0) - mean * mean
    y = (y - mean) / jnp.sqrt(var + eps) * params["fc_gamma"] + params["fc_beta"]
    y = jnp.maximum(y, 0.0)
    x = jnp.transpose(y.reshape(N, size, config.fc_input, config.fc_input),
                      (0, 2, 3, 1))
    k, s, p = config.kernel_size, config.stride, config.padding
    for b in range(3):
        op = 1 if config.output_pad_dec[b] else 0
        w = params[f"ct{b}_w"]
        rhs = jnp.transpose(w[:, :, ::-1, ::-1], (2, 3, 0, 1))    # HWIO
        x = lax.conv_general_dilated(
            x, rhs, window_strides=(1, 1),
            padding=[(k - 1 - p, k - 1 - p + op)] * 2,
            lhs_dilation=(s, s),
            dimension_numbers=("NHWC", "HWIO", "NHWC"))
        mean = jnp.mean(x, (0, 1, 2))
        var = jnp.mean(x * x, (0, 1, 2)) - mean * mean
        x = ((x - mean) / jnp.sqrt(var + eps) * params[f"ct{b}_gamma"]
             + params[f"ct{b}_beta"])
        x = jnp.maximum(x, 0.0)
    rhs = jnp.transpose(params["out_w"], (2, 3, 1, 0))
    x = lax.conv_general_dilated(x, rhs, (1, 1), [(p, p), (p, p)],
                                 dimension_numbers=("NHWC", "HWIO", "NHWC"))
    x = jnp.tanh(x + params["out_b"])
    return jnp.transpose(x, (0, 3, 1, 2))


if __name__ == "__main__":
    z_size, size, batch = 32, 64, 2
    key = jax.random.PRNGKey(0)
    kp, kz = jax.random.split(key)
    params = init_decoder_params(kp, z_size, size)
    packed = pack_params(params)          # one-time weight packing (hoisted)
    # DCGan samples z ~ N(0, I) and returns decoder(z) (generation path).
    z = jax.random.normal(kz, (batch, z_size), jnp.float32)

    fwd = jax.jit(decoder_forward, static_argnums=2)
    out = jax.block_until_ready(fwd(packed, z, size))

    # fc_input=4 doubles 3x -> 32x32; final conv preserves spatial size.
    assert out.shape == (batch, config.decoder_channels[3], 32, 32), out.shape
    assert bool(jnp.all(jnp.isfinite(out)))

    ref = jax.block_until_ready(
        jax.jit(decoder_reference, static_argnums=2)(params, z, size))
    err = float(jnp.max(jnp.abs(out - ref)))
    assert err < 0.15, f"max abs err vs reference: {err}"
    print("KERNEL_OK")
</pallas_src>

<mosaic_0001>
module attributes {stable_mosaic.version = 11 : i64} {
  func.func @_block_kernel(%arg0: i32, %arg1: memref<32x576xbf16, #tpu.memory_space<vmem>>, %arg2: memref<576x256xbf16, #tpu.memory_space<vmem>>, %arg3: memref<256x256xf32, #tpu.memory_space<vmem>>, %arg4: memref<1x256xf32, #tpu.memory_space<vmem>>, %arg5: memref<1x256xf32, #tpu.memory_space<vmem>>, %arg6: memref<32x256xbf16, #tpu.memory_space<vmem>>) attributes {dimension_semantics = [#tpu.dimension_semantics<arbitrary>], iteration_bounds = array<i64: 1>, scalar_prefetch = 0 : i64, scratch_operands = 0 : i64, tpu.core_type = #tpu.core_type<tc>, window_params = [{pipeline_mode = #tpu.pipeline_mode<synchronous>, transform_indices = @transform_0, window_bounds = array<i64: 32, 576>}, {pipeline_mode = #tpu.pipeline_mode<synchronous>, transform_indices = @transform_1, window_bounds = array<i64: 576, 256>}, {pipeline_mode = #tpu.pipeline_mode<synchronous>, transform_indices = @transform_2, window_bounds = array<i64: 256, 256>}, {pipeline_mode = #tpu.pipeline_mode<synchronous>, transform_indices = @transform_3, window_bounds = array<i64: 1, 256>}, {pipeline_mode = #tpu.pipeline_mode<synchronous>, transform_indices = @transform_4, window_bounds = array<i64: 1, 256>}, {pipeline_mode = #tpu.pipeline_mode<synchronous>, transform_indices = @transform_5, window_bounds = array<i64: 32, 256>}]} {
    %c0 = arith.constant 0 : index
    %c0_0 = arith.constant 0 : index
    %0 = vector.load %arg1[%c0, %c0_0] : memref<32x576xbf16, #tpu.memory_space<vmem>>, vector<32x576xbf16>
    %c0_1 = arith.constant 0 : index
    %c0_2 = arith.constant 0 : index
    %1 = vector.load %arg2[%c0_1, %c0_2] : memref<576x256xbf16, #tpu.memory_space<vmem>>, vector<576x256xbf16>
    %cst = arith.constant dense<0.000000e+00> : vector<32x256xf32>
    %2 = tpu.matmul %0, %1, %cst {dimension_numbers = #tpu.dot_dimension_numbers<[1], [0], [0], [1], [0, 0, 1, 1], [], []>} : vector<32x576xbf16>, vector<576x256xbf16>, vector<32x256xf32> -> vector<32x256xf32>
    %cst_3 = arith.constant dense<0.000000e+00> : vector<256xf32>
    %3 = vector.multi_reduction <add>, %2, %cst_3 [0] : vector<32x256xf32> to vector<256xf32>
    %4 = vector.shape_cast %3 : vector<256xf32> to vector<1x256xf32>
    %5 = arith.mulf %2, %2 : vector<32x256xf32>
    %cst_4 = arith.constant dense<0.000000e+00> : vector<256xf32>
    %6 = vector.multi_reduction <add>, %5, %cst_4 [0] : vector<32x256xf32> to vector<256xf32>
    %7 = vector.shape_cast %6 : vector<256xf32> to vector<1x256xf32>
    %c0_5 = arith.constant 0 : index
    %c0_6 = arith.constant 0 : index
    %8 = vector.load %arg3[%c0_5, %c0_6] : memref<256x256xf32, #tpu.memory_space<vmem>>, vector<256x256xf32>
    %cst_7 = arith.constant dense<0.000000e+00> : vector<1x256xf32>
    %9 = tpu.matmul %4, %8, %cst_7 {dimension_numbers = #tpu.dot_dimension_numbers<[1], [0], [0], [1], [0, 0, 1, 1], [], []>} : vector<1x256xf32>, vector<256x256xf32>, vector<1x256xf32> -> vector<1x256xf32>
    %cst_8 = arith.constant 7.812500e-03 : f32
    %10 = vector.broadcast %cst_8 : f32 to vector<1x256xf32>
    %11 = arith.mulf %9, %10 : vector<1x256xf32>
    %c0_9 = arith.constant 0 : index
    %c0_10 = arith.constant 0 : index
    %12 = vector.load %arg3[%c0_9, %c0_10] : memref<256x256xf32, #tpu.memory_space<vmem>>, vector<256x256xf32>
    %cst_11 = arith.constant dense<0.000000e+00> : vector<1x256xf32>
    %13 = tpu.matmul %7, %12, %cst_11 {dimension_numbers = #tpu.dot_dimension_numbers<[1], [0], [0], [1], [0, 0, 1, 1], [], []>} : vector<1x256xf32>, vector<256x256xf32>, vector<1x256xf32> -> vector<1x256xf32>
    %cst_12 = arith.constant 7.812500e-03 : f32
    %14 = vector.broadcast %cst_12 : f32 to vector<1x256xf32>
    %15 = arith.mulf %13, %14 : vector<1x256xf32>
    %16 = arith.mulf %11, %11 : vector<1x256xf32>
    %17 = arith.subf %15, %16 : vector<1x256xf32>
    %cst_13 = arith.constant 0.000000e+00 : f32
    %18 = vector.broadcast %cst_13 : f32 to vector<1x256xf32>
    %19 = arith.maximumf %17, %18 : vector<1x256xf32>
    %c0_14 = arith.constant 0 : index
    %c0_15 = arith.constant 0 : index
    %20 = vector.load %arg4[%c0_14, %c0_15] : memref<1x256xf32, #tpu.memory_space<vmem>>, vector<1x256xf32>
    %cst_16 = arith.constant 9.99999974E-6 : f32
    %21 = vector.broadcast %cst_16 : f32 to vector<1x256xf32>
    %22 = arith.addf %19, %21 : vector<1x256xf32>
    %23 = math.rsqrt %22 : vector<1x256xf32>
    %24 = arith.mulf %20, %23 : vector<1x256xf32>
    %c0_17 = arith.constant 0 : index
    %c0_18 = arith.constant 0 : index
    %25 = vector.load %arg5[%c0_17, %c0_18] : memref<1x256xf32, #tpu.memory_space<vmem>>, vector<1x256xf32>
    %26 = arith.mulf %11, %24 : vector<1x256xf32>
    %27 = arith.subf %25, %26 : vector<1x256xf32>
    %28 = vector.broadcast %24 : vector<1x256xf32> to vector<32x256xf32>
    %29 = arith.mulf %2, %28 : vector<32x256xf32>
    %30 = vector.broadcast %27 : vector<1x256xf32> to vector<32x256xf32>
    %31 = arith.addf %29, %30 : vector<32x256xf32>
    %cst_19 = arith.constant 0.000000e+00 : f32
    %32 = vector.broadcast %cst_19 : f32 to vector<32x256xf32>
    %33 = arith.maximumf %31, %32 : vector<32x256xf32>
    %34 = arith.truncf %33 : vector<32x256xf32> to vector<32x256xbf16>
    %c0_20 = arith.constant 0 : index
    %c0_21 = arith.constant 0 : index
    %35 = vector.load %arg6[%c0_20, %c0_21] : memref<32x256xbf16, #tpu.memory_space<vmem>>, vector<32x256xbf16>
    tpu.vector_store %arg6[%c0_20, %c0_21], %34 {strides = array<i32>} : memref<32x256xbf16, #tpu.memory_space<vmem>>, vector<32x256xbf16>,
    return
  }
  func.func @transform_0(%arg0: i32) -> (i32, i32) {
    %c0_i32 = arith.constant 0 : i32
    %c0_i32_0 = arith.constant 0 : i32
    %c0_i32_1 = arith.constant 0 : i32
    return %c0_i32, %c0_i32_0 : i32, i32
  }
  func.func @transform_1(%arg0: i32) -> (i32, i32) {
    %c0_i32 = arith.constant 0 : i32
    %c0_i32_0 = arith.constant 0 : i32
    %c0_i32_1 = arith.constant 0 : i32
    return %c0_i32, %c0_i32_0 : i32, i32
  }
  func.func @transform_2(%arg0: i32) -> (i32, i32) {
    %c0_i32 = arith.constant 0 : i32
    %c0_i32_0 = arith.constant 0 : i32
    %c0_i32_1 = arith.constant 0 : i32
    return %c0_i32, %c0_i32_0 : i32, i32
  }
  func.func @transform_3(%arg0: i32) -> (i32, i32) {
    %c0_i32 = arith.constant 0 : i32
    %c0_i32_0 = arith.constant 0 : i32
    %c0_i32_1 = arith.constant 0 : i32
    return %c0_i32, %c0_i32_0 : i32, i32
  }
  func.func @transform_4(%arg0: i32) -> (i32, i32) {
    %c0_i32 = arith.constant 0 : i32
    %c0_i32_0 = arith.constant 0 : i32
    %c0_i32_1 = arith.constant 0 : i32
    return %c0_i32, %c0_i32_0 : i32, i32
  }
  func.func @transform_5(%arg0: i32) -> (i32, i32) {
    %c0_i32 = arith.constant 0 : i32
    %c0_i32_0 = arith.constant 0 : i32
    %c0_i32_1 = arith.constant 0 : i32
    return %c0_i32, %c0_i32_0 : i32, i32
  }
}

module attributes {stable_mosaic.version = 11 : i64} {
  func.func @_block_kernel(%arg0: i32, %arg1: memref<128x576xbf16, #tpu.memory_space<vmem>>, %arg2: memref<576x128xbf16, #tpu.memory_space<vmem>>, %arg3: memref<128x128xf32, #tpu.memory_space<vmem>>, %arg4: memref<1x128xf32, #tpu.memory_space<vmem>>, %arg5: memref<1x128xf32, #tpu.memory_space<vmem>>, %arg6: memref<128x128xbf16, #tpu.memory_space<vmem>>) attributes {dimension_semantics = [#tpu.dimension_semantics<arbitrary>], iteration_bounds = array<i64: 1>, scalar_prefetch = 0 : i64, scratch_operands = 0 : i64, tpu.core_type = #tpu.core_type<tc>, window_params = [{pipeline_mode = #tpu.pipeline_mode<synchronous>, transform_indices = @transform_0, window_bounds = array<i64: 128, 576>}, {pipeline_mode = #tpu.pipeline_mode<synchronous>, transform_indices = @transform_1, window_bounds = array<i64: 576, 128>}, {pipeline_mode = #tpu.pipeline_mode<synchronous>, transform_indices = @transform_2, window_bounds = array<i64: 128, 128>}, {pipeline_mode = #tpu.pipeline_mode<synchronous>, transform_indices = @transform_3, window_bounds = array<i64: 1, 128>}, {pipeline_mode = #tpu.pipeline_mode<synchronous>, transform_indices = @transform_4, window_bounds = array<i64: 1, 128>}, {pipeline_mode = #tpu.pipeline_mode<synchronous>, transform_indices = @transform_5, window_bounds = array<i64: 128, 128>}]} {
    %c0 = arith.constant 0 : index
    %c0_0 = arith.constant 0 : index
    %0 = vector.load %arg1[%c0, %c0_0] : memref<128x576xbf16, #tpu.memory_space<vmem>>, vector<128x576xbf16>
    %c0_1 = arith.constant 0 : index
    %c0_2 = arith.constant 0 : index
    %1 = vector.load %arg2[%c0_1, %c0_2] : memref<576x128xbf16, #tpu.memory_space<vmem>>, vector<576x128xbf16>
    %cst = arith.constant dense<0.000000e+00> : vector<128x128xf32>
    %2 = tpu.matmul %0, %1, %cst {dimension_numbers = #tpu.dot_dimension_numbers<[1], [0], [0], [1], [0, 0, 1, 1], [], []>} : vector<128x576xbf16>, vector<576x128xbf16>, vector<128x128xf32> -> vector<128x128xf32>
    %cst_3 = arith.constant dense<0.000000e+00> : vector<128xf32>
    %3 = vector.multi_reduction <add>, %2, %cst_3 [0] : vector<128x128xf32> to vector<128xf32>
    %4 = vector.shape_cast %3 : vector<128xf32> to vector<1x128xf32>
    %5 = arith.mulf %2, %2 : vector<128x128xf32>
    %cst_4 = arith.constant dense<0.000000e+00> : vector<128xf32>
    %6 = vector.multi_reduction <add>, %5, %cst_4 [0] : vector<128x128xf32> to vector<128xf32>
    %7 = vector.shape_cast %6 : vector<128xf32> to vector<1x128xf32>
    %c0_5 = arith.constant 0 : index
    %c0_6 = arith.constant 0 : index
    %8 = vector.load %arg3[%c0_5, %c0_6] : memref<128x128xf32, #tpu.memory_space<vmem>>, vector<128x128xf32>
    %cst_7 = arith.constant dense<0.000000e+00> : vector<1x128xf32>
    %9 = tpu.matmul %4, %8, %cst_7 {dimension_numbers = #tpu.dot_dimension_numbers<[1], [0], [0], [1], [0, 0, 1, 1], [], []>} : vector<1x128xf32>, vector<128x128xf32>, vector<1x128xf32> -> vector<1x128xf32>
    %cst_8 = arith.constant 0.001953125 : f32
    %10 = vector.broadcast %cst_8 : f32 to vector<1x128xf32>
    %11 = arith.mulf %9, %10 : vector<1x128xf32>
    %c0_9 = arith.constant 0 : index
    %c0_10 = arith.constant 0 : index
    %12 = vector.load %arg3[%c0_9, %c0_10] : memref<128x128xf32, #tpu.memory_space<vmem>>, vector<128x128xf32>
    %cst_11 = arith.constant dense<0.000000e+00> : vector<1x128xf32>
    %13 = tpu.matmul %7, %12, %cst_11 {dimension_numbers = #tpu.dot_dimension_numbers<[1], [0], [0], [1], [0, 0, 1, 1], [], []>} : vector<1x128xf32>, vector<128x128xf32>, vector<1x128xf32> -> vector<1x128xf32>
    %cst_12 = arith.constant 0.001953125 : f32
    %14 = vector.broadcast %cst_12 : f32 to vector<1x128xf32>
    %15 = arith.mulf %13, %14 : vector<1x128xf32>
    %16 = arith.mulf %11, %11 : vector<1x128xf32>
    %17 = arith.subf %15, %16 : vector<1x128xf32>
    %cst_13 = arith.constant 0.000000e+00 : f32
    %18 = vector.broadcast %cst_13 : f32 to vector<1x128xf32>
    %19 = arith.maximumf %17, %18 : vector<1x128xf32>
    %c0_14 = arith.constant 0 : index
    %c0_15 = arith.constant 0 : index
    %20 = vector.load %arg4[%c0_14, %c0_15] : memref<1x128xf32, #tpu.memory_space<vmem>>, vector<1x128xf32>
    %cst_16 = arith.constant 9.99999974E-6 : f32
    %21 = vector.broadcast %cst_16 : f32 to vector<1x128xf32>
    %22 = arith.addf %19, %21 : vector<1x128xf32>
    %23 = math.rsqrt %22 : vector<1x128xf32>
    %24 = arith.mulf %20, %23 : vector<1x128xf32>
    %c0_17 = arith.constant 0 : index
    %c0_18 = arith.constant 0 : index
    %25 = vector.load %arg5[%c0_17, %c0_18] : memref<1x128xf32, #tpu.memory_space<vmem>>, vector<1x128xf32>
    %26 = arith.mulf %11, %24 : vector<1x128xf32>
    %27 = arith.subf %25, %26 : vector<1x128xf32>
    %28 = vector.broadcast %24 : vector<1x128xf32> to vector<128x128xf32>
    %29 = arith.mulf %2, %28 : vector<128x128xf32>
    %30 = vector.broadcast %27 : vector<1x128xf32> to vector<128x128xf32>
    %31 = arith.addf %29, %30 : vector<128x128xf32>
    %cst_19 = arith.constant 0.000000e+00 : f32
    %32 = vector.broadcast %cst_19 : f32 to vector<128x128xf32>
    %33 = arith.maximumf %31, %32 : vector<128x128xf32>
    %34 = arith.truncf %33 : vector<128x128xf32> to vector<128x128xbf16>
    %c0_20 = arith.constant 0 : index
    %c0_21 = arith.constant 0 : index
    %35 = vector.load %arg6[%c0_20, %c0_21] : memref<128x128xbf16, #tpu.memory_space<vmem>>, vector<128x128xbf16>
    tpu.vector_store %arg6[%c0_20, %c0_21], %34 {strides = array<i32>} : memref<128x128xbf16, #tpu.memory_space<vmem>>, vector<128x128xbf16>,
    return
  }
  func.func @transform_0(%arg0: i32) -> (i32, i32) {
    %c0_i32 = arith.constant 0 : i32
    %c0_i32_0 = arith.constant 0 : i32
    %c0_i32_1 = arith.constant 0 : i32
    return %c0_i32, %c0_i32_0 : i32, i32
  }
  func.func @transform_1(%arg0: i32) -> (i32, i32) {
    %c0_i32 = arith.constant 0 : i32
    %c0_i32_0 = arith.constant 0 : i32
    %c0_i32_1 = arith.constant 0 : i32
    return %c0_i32, %c0_i32_0 : i32, i32
  }
  func.func @transform_2(%arg0: i32) -> (i32, i32) {
    %c0_i32 = arith.constant 0 : i32
    %c0_i32_0 = arith.constant 0 : i32
    %c0_i32_1 = arith.constant 0 : i32
    return %c0_i32, %c0_i32_0 : i32, i32
  }
  func.func @transform_3(%arg0: i32) -> (i32, i32) {
    %c0_i32 = arith.constant 0 : i32
    %c0_i32_0 = arith.constant 0 : i32
    %c0_i32_1 = arith.constant 0 : i32
    return %c0_i32, %c0_i32_0 : i32, i32
  }
  func.func @transform_4(%arg0: i32) -> (i32, i32) {
    %c0_i32 = arith.constant 0 : i32
    %c0_i32_0 = arith.constant 0 : i32
    %c0_i32_1 = arith.constant 0 : i32
    return %c0_i32, %c0_i32_0 : i32, i32
  }
  func.func @transform_5(%arg0: i32) -> (i32, i32) {
    %c0_i32 = arith.constant 0 : i32
    %c0_i32_0 = arith.constant 0 : i32
    %c0_i32_1 = arith.constant 0 : i32
    return %c0_i32, %c0_i32_0 : i32, i32
  }
}

module attributes {stable_mosaic.version = 11 : i64} {
  func.func @_block_kernel(%arg0: i32, %arg1: memref<512x288xbf16, #tpu.memory_space<vmem>>, %arg2: memref<288x64xbf16, #tpu.memory_space<vmem>>, %arg3: memref<64x64xf32, #tpu.memory_space<vmem>>, %arg4: memref<1x64xf32, #tpu.memory_space<vmem>>, %arg5: memref<1x64xf32, #tpu.memory_space<vmem>>, %arg6: memref<512x64xbf16, #tpu.memory_space<vmem>>) attributes {dimension_semantics = [#tpu.dimension_semantics<arbitrary>], iteration_bounds = array<i64: 1>, scalar_prefetch = 0 : i64, scratch_operands = 0 : i64, tpu.core_type = #tpu.core_type<tc>, window_params = [{pipeline_mode = #tpu.pipeline_mode<synchronous>, transform_indices = @transform_0, window_bounds = array<i64: 512, 288>}, {pipeline_mode = #tpu.pipeline_mode<synchronous>, transform_indices = @transform_1, window_bounds = array<i64: 288, 64>}, {pipeline_mode = #tpu.pipeline_mode<synchronous>, transform_indices = @transform_2, window_bounds = array<i64: 64, 64>}, {pipeline_mode = #tpu.pipeline_mode<synchronous>, transform_indices = @transform_3, window_bounds = array<i64: 1, 64>}, {pipeline_mode = #tpu.pipeline_mode<synchronous>, transform_indices = @transform_4, window_bounds = array<i64: 1, 64>}, {pipeline_mode = #tpu.pipeline_mode<synchronous>, transform_indices = @transform_5, window_bounds = array<i64: 512, 64>}]} {
    %c0 = arith.constant 0 : index
    %c0_0 = arith.constant 0 : index
    %0 = vector.load %arg1[%c0, %c0_0] : memref<512x288xbf16, #tpu.memory_space<vmem>>, vector<512x288xbf16>
    %c0_1 = arith.constant 0 : index
    %c0_2 = arith.constant 0 : index
    %1 = vector.load %arg2[%c0_1, %c0_2] : memref<288x64xbf16, #tpu.memory_space<vmem>>, vector<288x64xbf16>
    %cst = arith.constant dense<0.000000e+00> : vector<512x64xf32>
    %2 = tpu.matmul %0, %1, %cst {dimension_numbers = #tpu.dot_dimension_numbers<[1], [0], [0], [1], [0, 0, 1, 1], [], []>} : vector<512x288xbf16>, vector<288x64xbf16>, vector<512x64xf32> -> vector<512x64xf32>
    %cst_3 = arith.constant dense<0.000000e+00> : vector<64xf32>
    %3 = vector.multi_reduction <add>, %2, %cst_3 [0] : vector<512x64xf32> to vector<64xf32>
    %4 = vector.shape_cast %3 : vector<64xf32> to vector<1x64xf32>
    %5 = arith.mulf %2, %2 : vector<512x64xf32>
    %cst_4 = arith.constant dense<0.000000e+00> : vector<64xf32>
    %6 = vector.multi_reduction <add>, %5, %cst_4 [0] : vector<512x64xf32> to vector<64xf32>
    %7 = vector.shape_cast %6 : vector<64xf32> to vector<1x64xf32>
    %c0_5 = arith.constant 0 : index
    %c0_6 = arith.constant 0 : index
    %8 = vector.load %arg3[%c0_5, %c0_6] : memref<64x64xf32, #tpu.memory_space<vmem>>, vector<64x64xf32>
    %cst_7 = arith.constant dense<0.000000e+00> : vector<1x64xf32>
    %9 = tpu.matmul %4, %8, %cst_7 {dimension_numbers = #tpu.dot_dimension_numbers<[1], [0], [0], [1], [0, 0, 1, 1], [], []>} : vector<1x64xf32>, vector<64x64xf32>, vector<1x64xf32> -> vector<1x64xf32>
    %cst_8 = arith.constant 4.8828125E-4 : f32
    %10 = vector.broadcast %cst_8 : f32 to vector<1x64xf32>
    %11 = arith.mulf %9, %10 : vector<1x64xf32>
    %c0_9 = arith.constant 0 : index
    %c0_10 = arith.constant 0 : index
    %12 = vector.load %arg3[%c0_9, %c0_10] : memref<64x64xf32, #tpu.memory_space<vmem>>, vector<64x64xf32>
    %cst_11 = arith.constant dense<0.000000e+00> : vector<1x64xf32>
    %13 = tpu.matmul %7, %12, %cst_11 {dimension_numbers = #tpu.dot_dimension_numbers<[1], [0], [0], [1], [0, 0, 1, 1], [], []>} : vector<1x64xf32>, vector<64x64xf32>, vector<1x64xf32> -> vector<1x64xf32>
    %cst_12 = arith.constant 4.8828125E-4 : f32
    %14 = vector.broadcast %cst_12 : f32 to vector<1x64xf32>
    %15 = arith.mulf %13, %14 : vector<1x64xf32>
    %16 = arith.mulf %11, %11 : vector<1x64xf32>
    %17 = arith.subf %15, %16 : vector<1x64xf32>
    %cst_13 = arith.constant 0.000000e+00 : f32
    %18 = vector.broadcast %cst_13 : f32 to vector<1x64xf32>
    %19 = arith.maximumf %17, %18 : vector<1x64xf32>
    %c0_14 = arith.constant 0 : index
    %c0_15 = arith.constant 0 : index
    %20 = vector.load %arg4[%c0_14, %c0_15] : memref<1x64xf32, #tpu.memory_space<vmem>>, vector<1x64xf32>
    %cst_16 = arith.constant 9.99999974E-6 : f32
    %21 = vector.broadcast %cst_16 : f32 to vector<1x64xf32>
    %22 = arith.addf %19, %21 : vector<1x64xf32>
    %23 = math.rsqrt %22 : vector<1x64xf32>
    %24 = arith.mulf %20, %23 : vector<1x64xf32>
    %c0_17 = arith.constant 0 : index
    %c0_18 = arith.constant 0 : index
    %25 = vector.load %arg5[%c0_17, %c0_18] : memref<1x64xf32, #tpu.memory_space<vmem>>, vector<1x64xf32>
    %26 = arith.mulf %11, %24 : vector<1x64xf32>
    %27 = arith.subf %25, %26 : vector<1x64xf32>
    %28 = vector.broadcast %24 : vector<1x64xf32> to vector<512x64xf32>
    %29 = arith.mulf %2, %28 : vector<512x64xf32>
    %30 = vector.broadcast %27 : vector<1x64xf32> to vector<512x64xf32>
    %31 = arith.addf %29, %30 : vector<512x64xf32>
    %cst_19 = arith.constant 0.000000e+00 : f32
    %32 = vector.broadcast %cst_19 : f32 to vector<512x64xf32>
    %33 = arith.maximumf %31, %32 : vector<512x64xf32>
    %34 = arith.truncf %33 : vector<512x64xf32> to vector<512x64xbf16>
    %c0_20 = arith.constant 0 : index
    %c0_21 = arith.constant 0 : index
    %35 = vector.load %arg6[%c0_20, %c0_21] : memref<512x64xbf16, #tpu.memory_space<vmem>>, vector<512x64xbf16>
    tpu.vector_store %arg6[%c0_20, %c0_21], %34 {strides = array<i32>} : memref<512x64xbf16, #tpu.memory_space<vmem>>, vector<512x64xbf16>,
    return
  }
  func.func @transform_0(%arg0: i32) -> (i32, i32) {
    %c0_i32 = arith.constant 0 : i32
    %c0_i32_0 = arith.constant 0 : i32
    %c0_i32_1 = arith.constant 0 : i32
    return %c0_i32, %c0_i32_0 : i32, i32
  }
  func.func @transform_1(%arg0: i32) -> (i32, i32) {
    %c0_i32 = arith.constant 0 : i32
    %c0_i32_0 = arith.constant 0 : i32
    %c0_i32_1 = arith.constant 0 : i32
    return %c0_i32, %c0_i32_0 : i32, i32
  }
  func.func @transform_2(%arg0: i32) -> (i32, i32) {
    %c0_i32 = arith.constant 0 : i32
    %c0_i32_0 = arith.constant 0 : i32
    %c0_i32_1 = arith.constant 0 : i32
    return %c0_i32, %c0_i32_0 : i32, i32
  }
  func.func @transform_3(%arg0: i32) -> (i32, i32) {
    %c0_i32 = arith.constant 0 : i32
    %c0_i32_0 = arith.constant 0 : i32
    %c0_i32_1 = arith.constant 0 : i32
    return %c0_i32, %c0_i32_0 : i32, i32
  }
  func.func @transform_4(%arg0: i32) -> (i32, i32) {
    %c0_i32 = arith.constant 0 : i32
    %c0_i32_0 = arith.constant 0 : i32
    %c0_i32_1 = arith.constant 0 : i32
    return %c0_i32, %c0_i32_0 : i32, i32
  }
  func.func @transform_5(%arg0: i32) -> (i32, i32) {
    %c0_i32 = arith.constant 0 : i32
    %c0_i32_0 = arith.constant 0 : i32
    %c0_i32_1 = arith.constant 0 : i32
    return %c0_i32, %c0_i32_0 : i32, i32
  }
}

module attributes {stable_mosaic.version = 11 : i64} {
  func.func @_conv_tanh_kernel(%arg0: i32, %arg1: memref<512x400xbf16, #tpu.memory_space<vmem>>, %arg2: memref<400x3xbf16, #tpu.memory_space<vmem>>, %arg3: memref<1x3xf32, #tpu.memory_space<vmem>>, %arg4: memref<512x3xf32, #tpu.memory_space<vmem>>) attributes {dimension_semantics = [#tpu.dimension_semantics<parallel>], iteration_bounds = array<i64: 4>, scalar_prefetch = 0 : i64, scratch_operands = 0 : i64, tpu.core_type = #tpu.core_type<tc>, window_params = [{transform_indices = @transform_0, window_bounds = array<i64: 512, 400>}, {pipeline_mode = #tpu.pipeline_mode<synchronous>, transform_indices = @transform_1, window_bounds = array<i64: 400, 3>}, {pipeline_mode = #tpu.pipeline_mode<synchronous>, transform_indices = @transform_2, window_bounds = array<i64: 1, 3>}, {transform_indices = @transform_3, window_bounds = array<i64: 512, 3>}]} {
    %c0 = arith.constant 0 : index
    %c0_0 = arith.constant 0 : index
    %0 = vector.load %arg1[%c0, %c0_0] : memref<512x400xbf16, #tpu.memory_space<vmem>>, vector<512x400xbf16>
    %c0_1 = arith.constant 0 : index
    %c0_2 = arith.constant 0 : index
    %1 = vector.load %arg2[%c0_1, %c0_2] : memref<400x3xbf16, #tpu.memory_space<vmem>>, vector<400x3xbf16>
    %cst = arith.constant dense<0.000000e+00> : vector<512x3xf32>
    %2 = tpu.matmul %0, %1, %cst {dimension_numbers = #tpu.dot_dimension_numbers<[1], [0], [0], [1], [0, 0, 1, 1], [], []>} : vector<512x400xbf16>, vector<400x3xbf16>, vector<512x3xf32> -> vector<512x3xf32>
    %c0_3 = arith.constant 0 : index
    %c0_4 = arith.constant 0 : index
    %3 = vector.load %arg3[%c0_3, %c0_4] : memref<1x3xf32, #tpu.memory_space<vmem>>, vector<1x3xf32>
    %4 = vector.broadcast %3 : vector<1x3xf32> to vector<512x3xf32>
    %5 = arith.addf %2, %4 : vector<512x3xf32>
    %6 = math.tanh %5 : vector<512x3xf32>
    %c0_5 = arith.constant 0 : index
    %c0_6 = arith.constant 0 : index
    %7 = vector.load %arg4[%c0_5, %c0_6] : memref<512x3xf32, #tpu.memory_space<vmem>>, vector<512x3xf32>
    tpu.vector_store %arg4[%c0_5, %c0_6], %6 {strides = array<i32>} : memref<512x3xf32, #tpu.memory_space<vmem>>, vector<512x3xf32>,
    return
  }
  func.func @transform_0(%arg0: i32) -> (i32, i32) {
    %c0_i32 = arith.constant 0 : i32
    %c0_i32_0 = arith.constant 0 : i32
    return %arg0, %c0_i32 : i32, i32
  }
  func.func @transform_1(%arg0: i32) -> (i32, i32) {
    %c0_i32 = arith.constant 0 : i32
    %c0_i32_0 = arith.constant 0 : i32
    %c0_i32_1 = arith.constant 0 : i32
    return %c0_i32, %c0_i32_0 : i32, i32
  }
  func.func @transform_2(%arg0: i32) -> (i32, i32) {
    %c0_i32 = arith.constant 0 : i32
    %c0_i32_0 = arith.constant 0 : i32
    %c0_i32_1 = arith.constant 0 : i32
    return %c0_i32, %c0_i32_0 : i32, i32
  }
  func.func @transform_3(%arg0: i32) -> (i32, i32) {
    %c0_i32 = arith.constant 0 : i32
    %c0_i32_0 = arith.constant 0 : i32
    return %arg0, %c0_i32 : i32, i32
  }
}

</mosaic_0001>

<bundles_post_ra>
// kernel: decoder_forward.4
= control target key start
LH: loop header
LB: loop body
LE: loop exit
PB: predicated region body
PF: predicated region fallthrough
CT: control target
= control target key end

     0   :  { %v1429_v1 = vmov 0   ;;  %vm515_vm0 = vcmask 523264   ;;  %s2097_s1 = inlined_call_operand.vmem [shape: bf16[576,256], index: 1, kind: input, shape index: {}]   ;;  %s2098_s0 = inlined_call_operand.vmem [shape: bf16[32,576], index: 0, kind: input, shape index: {}]   ;;  %s2099_s2 = inlined_call_operand.vmem [shape: f32[256,256], index: 2, kind: input, shape index: {}]   ;;  %s2100_s3 = inlined_call_operand.vmem [shape: f32[1,256], index: 3, kind: input, shape index: {}]   ;;  %s2101_s4 = inlined_call_operand.vmem [shape: f32[1,256], index: 4, kind: input, shape index: {}]   ;;  %s2102_s5 = inlined_call_operand.vmem [shape: bf16[32,256], index: 5, kind: output, shape index: {}]  }
   0x1   :  { %v1303_v0 = vld [vmem:[%s2097_s1 + $0x4] ss:$8 sps:$4 sm:$0xff]   ;;  %660 = vmatprep.mubr.bf16.mxu1 %v1429_v1  ;;  %v1305_v2 = vld [vmem:[%s2097_s1] ss:$8 sps:$4 sm:$0xff]   ;;  %v1306_v3 = vld [vmem:[%s2097_s1 + $0x14] ss:$8 sps:$4 sm:$0xff]  }
   0x2   :  { %522 = vmatprep.subr.bf16.mxu0 %v1303_v0  ;;  %v1308_v4 = vld [vmem:[%s2097_s1 + $0x10] ss:$8 sps:$4 sm:$0xff]   ;;  %v1309_v5 = vld [vmem:[%s2097_s1 + $0x24] ss:$8 sps:$4 sm:$0xff]   ;;  %v1311_v6 = vld [vmem:[%s2097_s1 + $0x20] ss:$8 sps:$4 sm:$0xff]  }
   0x3   :  { %523 = vmatpush1.bf16.msra.mxu0 %v1305_v2  ;;  %v1312_v7 = vld [vmem:[%s2097_s1 + $0x34] ss:$8 sps:$4 sm:$0xff]   ;;  %v1314_v8 = vld [vmem:[%s2097_s1 + $0x30] ss:$8 sps:$4 sm:$0xff]   ;;  %v1315_v9 = vld [vmem:[%s2097_s1 + $0x44] ss:$8 sps:$4 sm:$0xff]  }
   0x4   :  { %524 = vmatprep.subr.bf16.mxu0 %v1306_v3  ;;  %v1317_v10 = vld [vmem:[%s2097_s1 + $0x40] ss:$8 sps:$4 sm:$0xff]   ;;  %v1318_v11 = vld [vmem:[%s2097_s1 + $0x54] ss:$8 sps:$4 sm:$0xff]   ;;  %v1320_v12 = vld [vmem:[%s2097_s1 + $0x50] ss:$8 sps:$4 sm:$0xff]  }
   0x5   :  { %v1321_v13 = vld [vmem:[%s2097_s1 + $0x64] ss:$8 sps:$4 sm:$0xff]   ;;  %v1323_v15 = vld [vmem:[%s2097_s1 + $0x60] ss:$8 sps:$4 sm:$0xff]   ;;  %v1324_v16 = vld [vmem:[%s2097_s1 + $0x74] ss:$8 sps:$4 sm:$0xff]  }
   0x6   :  { %v1353_v14 = vld [vmem:[%s2098_s0 + $0x4] ss:$20 sps:$4 sm:$0xff]   ;;  %v1329_v19 = vld [vmem:[%s2097_s1 + $0x80] ss:$8 sps:$4 sm:$0xff]   ;;  %v1330_v20 = vld [vmem:[%s2097_s1 + $0x94] ss:$8 sps:$4 sm:$0xff]  }
   0x7   :  { %525 = vmatpush1.bf16.msra.mxu0 %v1308_v4  ;;  %554 = vmatprep.mubr.bf16.mxu0 %v1353_v14  ;;  %v1326_v17 = vld [vmem:[%s2097_s1 + $0x70] ss:$8 sps:$4 sm:$0xff]   ;;  %v1327_v18 = vld [vmem:[%s2097_s1 + $0x84] ss:$8 sps:$4 sm:$0xff]   ;;  %v1335_v23 = vld [vmem:[%s2097_s1 + $0xa0] ss:$8 sps:$4 sm:$0xff]  }
   0x8   :  { %526 = vmatprep.subr.bf16.mxu0 %v1309_v5  ;;  %v1332_v21 = vld [vmem:[%s2097_s1 + $0x90] ss:$8 sps:$4 sm:$0xff]   ;;  %v1333_v22 = vld [vmem:[%s2097_s1 + $0xa4] ss:$8 sps:$4 sm:$0xff]   ;;  %v1392_v25 = vld [vmem:[%s2097_s1 + $0x200] ss:$8 sps:$4 sm:$0xff]  }
   0x9   :  { %v1390_v24 = vld [vmem:[%s2097_s1 + $0x204] ss:$8 sps:$4 sm:$0xff]   ;;  %v1336_v26 = vld [vmem:[%s2097_s1 + $0xb4] ss:$8 sps:$4 sm:$0xff]   ;;  %v1398_v28 = vld [vmem:[%s2097_s1 + $0x210] ss:$8 sps:$4 sm:$0xff]  }
   0xa   :  { %628 = vmatprep.subr.bf16.mxu1 %v1390_v24  ;;  %v1396_v27 = vld [vmem:[%s2097_s1 + $0x214] ss:$8 sps:$4 sm:$0xff]   ;;  %v1338_v29 = vld [vmem:[%s2097_s1 + $0xb0] ss:$8 sps:$4 sm:$0xff]   ;;  %v1339_v30 = vld [vmem:[%s2097_s1 + $0xc4] ss:$8 sps:$4 sm:$0xff]  }
   0xb   :  { %527 = vmatpush1.bf16.msra.mxu0 %v1311_v6  ;;  %629 = vmatpush1.bf16.msra.mxu1 %v1392_v25  ;;  %v1402_v31 = vld [vmem:[%s2097_s1 + $0x224] ss:$8 sps:$4 sm:$0xff]   ;;  %v1404_v32 = vld [vmem:[%s2097_s1 + $0x220] ss:$8 sps:$4 sm:$0xff]   ;;  %v1342_v34 = vld [vmem:[%s2097_s1 + $0xd4] ss:$8 sps:$4 sm:$0xff]  }
   0xc   :  { %528 = vmatprep.subr.bf16.mxu0 %v1312_v7  ;;  %630 = vmatprep.subr.bf16.mxu1 %v1396_v27  ;;  %v1341_v33 = vld [vmem:[%s2097_s1 + $0xc0] ss:$8 sps:$4 sm:$0xff]   ;;  %v1411_v35 = vld [vmem:[%s2097_s1 + $0x234] ss:$8 sps:$4 sm:$0xff]   ;;  %v1413_v36 = vld [vmem:[%s2097_s1 + $0x230] ss:$8 sps:$4 sm:$0xff]  }
   0xd   :  { %v1344_v37 = vld [vmem:[%s2097_s1 + $0xd0] ss:$8 sps:$4 sm:$0xff]   ;;  %v1345_v38 = vld [vmem:[%s2097_s1 + $0xe4] ss:$8 sps:$4 sm:$0xff]   ;;  %v1347_v40 = vld [vmem:[%s2097_s1 + $0xe0] ss:$8 sps:$4 sm:$0xff]  }
   0xe   :  { %v1417_v39 = vld [vmem:[%s2098_s0 + $0x10] ss:$20 sps:$4 sm:$0xff]   ;;  %v1348_v41 = vld [vmem:[%s2097_s1 + $0xf4] ss:$8 sps:$4 sm:$0xff]   ;;  %v726_v42 = vld [vmem:[%s2099_s2 + $0x8] sm:$0xff] }
   0xf   :  { %529 = vmatpush1.bf16.msra.mxu0 %v1314_v8  ;;  %631 = vmatpush1.bf16.msra.mxu1 %v1398_v28  ;;  %v728_v43 = vld [vmem:[%s2099_s2 + $0x18] sm:$0xff]  ;;  %v725_v45 = vld [vmem:[%s2099_s2] sm:$0xff]  ;;  %v727_v46 = vld [vmem:[%s2099_s2 + $0x10] sm:$0xff] }
  0x10   :  { %530 = vmatprep.subr.bf16.mxu0 %v1315_v9  ;;  %632 = vmatprep.subr.bf16.mxu1 %v1402_v31  ;;  %v1591_v44 = vpack.c.bf16 %v728_v43, %v726_v42  ;;  %v730_v47 = vld [vmem:[%s2099_s2 + $0x28] sm:$0xff]  ;;  %v1603_v48 = vpack.c.bf16 %v727_v46, %v725_v45  ;;  %v732_v49 = vld [vmem:[%s2099_s2 + $0x38] sm:$0xff]  ;;  %v729_v50 = vld [vmem:[%s2099_s2 + $0x20] sm:$0xff] }
  0x11   :  { %v731_v51 = vld [vmem:[%s2099_s2 + $0x30] sm:$0xff]  ;;  %v1616_v52 = vpack.c.bf16 %v732_v49, %v730_v47  ;;  %v734_v53 = vld [vmem:[%s2099_s2 + $0x48] sm:$0xff]  ;;  %v736_v54 = vld [vmem:[%s2099_s2 + $0x58] sm:$0xff] }
  0x12   :  { %v1350_v55 = vld [vmem:[%s2097_s1 + $0xf0] ss:$8 sps:$4 sm:$0xff]   ;;  %v1628_v56 = vpack.c.bf16 %v731_v51, %v729_v50  ;;  %v1356_v57 = vld [vmem:[%s2097_s1 + $0x104] ss:$8 sps:$4 sm:$0xff]   ;;  %v1634_v58 = vpack.c.bf16 %v736_v54, %v734_v53  ;;  %v1351_v62 = vld [vmem:[%s2098_s0] ss:$20 sps:$4 sm:$0xff]  }
  0x13   :  { %531 = vmatpush1.bf16.msra.mxu0 %v1317_v10  ;;  %633 = vmatpush1.bf16.msra.mxu1 %v1404_v32  ;;  %v1421_v59 = vld [vmem:[%s2098_s0 + $0x38] ss:$20 sps:$4 sm:$0xff]   ;;  %v733_v60 = vld [vmem:[%s2099_s2 + $0x40] sm:$0xff]  ;;  %v735_v61 = vld [vmem:[%s2099_s2 + $0x50] sm:$0xff] }
  0x14   :  { %532 = vmatprep.subr.bf16.mxu0 %v1318_v11  ;;  %634 = vmatprep.subr.bf16.mxu1 %v1411_v35  ;;  %v738_v63 = vld [vmem:[%s2099_s2 + $0x68] sm:$0xff]  ;;  %v740_v0 = vld [vmem:[%s2099_s2 + $0x78] sm:$0xff]  ;;  %v1665_v4 = vpack.c.bf16 %v735_v61, %v733_v60  ;;  %v737_v6 = vld [vmem:[%s2099_s2 + $0x60] sm:$0xff] }
  0x15   :  { %v1405_v2 = vld [vmem:[%s2098_s0 + $0x2c] ss:$20 sps:$4 sm:$0xff]   ;;  %v1359_v3 = vld [vmem:[%s2097_s1 + $0x114] ss:$8 sps:$4 sm:$0xff]   ;;  %v1668_v5 = vpack.c.bf16 %v740_v0, %v738_v63  ;;  %v1357_v10 = vld [vmem:[%s2097_s1 + $0x110] ss:$8 sps:$4 sm:$0xff]  }
  0x16   :  { %v739_v7 = vld [vmem:[%s2099_s2 + $0x70] sm:$0xff]  ;;  %v742_v8 = vld [vmem:[%s2099_s2 + $0x88] sm:$0xff]  ;;  %v744_v9 = vld [vmem:[%s2099_s2 + $0x98] sm:$0xff] }
  0x17   :  { %533 = vmatpush1.bf16.msra.mxu0 %v1320_v12  ;;  %635 = vmatpush1.bf16.msra.mxu1 %v1413_v36  ;;  %v1362_v11 = vld [vmem:[%s2097_s1 + $0x124] ss:$8 sps:$4 sm:$0xff]   ;;  %v1689_v12 = vpack.c.bf16 %v739_v7, %v737_v6  ;;  %v747_v25 = vld [vmem:[%s2099_s2 + $0xb0] sm:$0xff]  ;;  %v752_v27 = vld [vmem:[%s2099_s2 + $0xd8] sm:$0xff] }
  0x18   :  { %534 = vmatprep.subr.bf16.mxu0 %v1321_v13  ;;  %1158 = vmatprep.subr.bf16.mxu1 %v1591_v44  ;;  %v1692_v13 = vpack.c.bf16 %v744_v9, %v742_v8  ;;  %v741_v14 = vld [vmem:[%s2099_s2 + $0x80] sm:$0xff]  ;;  %v1363_v28 = vld [vmem:[%s2097_s1 + $0x130] ss:$8 sps:$4 sm:$0xff]   ;;  %v758_v42 = vld [vmem:[%s2099_s2 + $0x108] sm:$0xff] }
  0x19   :  { %v745_v24 = vld [vmem:[%s2099_s2 + $0xa0] sm:$0xff]  ;;  %v756_v35 = vld [vmem:[%s2099_s2 + $0xf8] sm:$0xff] }
  0x1a   :  { %1147 = vmatmul.mubr.msk.bf16.vlgmr.msra.gmra.mrb[0].mxu1 %vm515_vm0, %v1417_v39  ;;  %v749_v32 = vld [vmem:[%s2099_s2 + $0xc0] sm:$0xff]  ;;  %v760_v43 = vld [vmem:[%s2099_s2 + $0x118] sm:$0xff] }
  0x1b   :  { %535 = vmatpush1.bf16.msra.mxu0 %v1323_v15  ;;  %670 = vmatprep.mubr.bf16.mxu1 %v1429_v1  ;;  %v1354_v1 = vld [vmem:[%s2097_s1 + $0x100] ss:$8 sps:$4 sm:$0xff]   ;;  %v743_v15 = vld [vmem:[%s2099_s2 + $0x90] sm:$0xff]  ;;  %v1374_v46 = vld [vmem:[%s2097_s1 + $0x164] ss:$8 sps:$4 sm:$0xff]   ;;  %v1794_v49 = vpack.c.bf16 %v760_v43, %v758_v42 }
  0x1c   :  { %536 = vmatprep.subr.bf16.mxu0 %v1324_v16  ;;  %1160 = vmatpush1.bf16.msra.mxu1 %v1603_v48  ;;  %v1407_v16 = vld [vmem:[%s2098_s0 + $0x28] ss:$20 sps:$4 sm:$0xff]   ;;  %v1369_v45 = vld [vmem:[%s2097_s1 + $0x150] ss:$8 sps:$4 sm:$0xff]   ;;  %v1380_v54 = vld [vmem:[%s2097_s1 + $0x184] ss:$8 sps:$4 sm:$0xff]  }
  0x1d   :  { %1162 = vmatprep.subr.bf16.mxu1 %v1616_v52  ;;  %v1366_v36 = vld [vmem:[%s2097_s1 + $0x140] ss:$8 sps:$4 sm:$0xff]   ;;  %v1377_v51 = vld [vmem:[%s2097_s1 + $0x174] ss:$8 sps:$4 sm:$0xff]   ;;  %v1375_v53 = vld [vmem:[%s2097_s1 + $0x170] ss:$8 sps:$4 sm:$0xff]  }
  0x1e   :  { %v1372_v50 = vld [vmem:[%s2097_s1 + $0x160] ss:$8 sps:$4 sm:$0xff]   ;;  %v1386_v60 = vld [vmem:[%s2097_s1 + $0x1a4] ss:$8 sps:$4 sm:$0xff]   ;;  %v1387_v63 = vld [vmem:[%s2097_s1 + $0x1b0] ss:$8 sps:$4 sm:$0xff]  }
  0x1f   :  { %537 = vmatpush1.bf16.msra.mxu0 %v1326_v17  ;;  %v746_v17 = vld [vmem:[%s2099_s2 + $0xa8] sm:$0xff]  ;;  %v1416_v8 = vld [vmem:[%s2097_s1 + $0x1f4] ss:$8 sps:$4 sm:$0xff]   ;;  %v1414_v9 = vld [vmem:[%s2097_s1 + $0x1f0] ss:$8 sps:$4 sm:$0xff]  }
  0x20   :  { %538 = vmatprep.subr.bf16.mxu0 %v1327_v18  ;;  %1164 = vmatpush1.bf16.msra.mxu1 %v1628_v56  ;;  %v748_v18 = vld [vmem:[%s2099_s2 + $0xb8] sm:$0xff]  ;;  %v1384_v61 = vld [vmem:[%s2097_s1 + $0x1a0] ss:$8 sps:$4 sm:$0xff]   ;;  %v1395_v0 = vld [vmem:[%s2097_s1 + $0x1c4] ss:$8 sps:$4 sm:$0xff]  }
  0x21   :  { %1166 = vmatprep.subr.bf16.mxu1 %v1634_v58  ;;  %v1410_v6 = vld [vmem:[%s2097_s1 + $0x1e4] ss:$8 sps:$4 sm:$0xff]   ;;  %v1408_v7 = vld [vmem:[%s2097_s1 + $0x1e0] ss:$8 sps:$4 sm:$0xff]   ;;  %v776_v43 = vld [vmem:[%s2099_s2 + $0x198] sm:$0xff] }
  0x22   :  { %1148 = vmatmul.mubr.msk.bf16.gmra.mrb[4].mxu1 %vm515_vm0, %v1421_v59  ;;  %v1381_v59 = vld [vmem:[%s2097_s1 + $0x190] ss:$8 sps:$4 sm:$0xff]   ;;  %v774_v42 = vld [vmem:[%s2099_s2 + $0x188] sm:$0xff] }
  0x23   :  { %539 = vmatpush1.bf16.msra.mxu0 %v1329_v19  ;;  %v1360_v19 = vld [vmem:[%s2097_s1 + $0x120] ss:$8 sps:$4 sm:$0xff]  }
  0x24   :  { %540 = vmatprep.subr.bf16.mxu0 %v1330_v20  ;;  %1168 = vmatpush1.bf16.msra.mxu1 %v1665_v4  ;;  %v1420_v20 = vld [vmem:[%s2098_s0 + $0xc] ss:$20 sps:$4 sm:$0xff]  }
  0x25   :  { %1170 = vmatprep.subr.bf16.mxu1 %v1668_v5 }
  0x27   :  { %541 = vmatpush1.bf16.msra.mxu0 %v1332_v21  ;;  %v1365_v21 = vld [vmem:[%s2097_s1 + $0x134] ss:$8 sps:$4 sm:$0xff]  }
  0x28   :  { %542 = vmatprep.subr.bf16.mxu0 %v1333_v22  ;;  %1172 = vmatpush1.bf16.msra.mxu1 %v1689_v12  ;;  %v1719_v22 = vpack.c.bf16 %v743_v15, %v741_v14  ;;  %v1424_v14 = vld [vmem:[%s2098_s0 + $0x30] ss:$20 sps:$4 sm:$0xff]  }
  0x29   :  { %1174 = vmatprep.subr.bf16.mxu1 %v1692_v13  ;;  %v757_v15 = vld [vmem:[%s2099_s2 + $0x100] sm:$0xff] }
  0x2b   :  { %543 = vmatpush1.bf16.msra.mxu0 %v1335_v23  ;;  %v1722_v23 = vpack.c.bf16 %v748_v18, %v746_v17  ;;  %v762_v18 = vld [vmem:[%s2099_s2 + $0x128] sm:$0xff] }
  0x2c   :  { %544 = vmatprep.subr.bf16.mxu0 %v1336_v26  ;;  %v750_v26 = vld [vmem:[%s2099_s2 + $0xc8] sm:$0xff]  ;;  %1176 = vmatpush1.bf16.msra.mxu1 %v1719_v22 }
  0x2d   :  { %1178 = vmatprep.subr.bf16.mxu1 %v1722_v23  ;;  %v1746_v31 = vpack.c.bf16 %v752_v27, %v750_v26  ;;  %v766_v26 = vld [vmem:[%s2099_s2 + $0x148] sm:$0xff]  ;;  %v768_v27 = vld [vmem:[%s2099_s2 + $0x158] sm:$0xff] }
  0x2f   :  { %545 = vmatpush1.bf16.msra.mxu0 %v1338_v29  ;;  %v1368_v29 = vld [vmem:[%s2097_s1 + $0x144] ss:$8 sps:$4 sm:$0xff]  }
  0x30   :  { %546 = vmatprep.subr.bf16.mxu0 %v1339_v30  ;;  %v1743_v30 = vpack.c.bf16 %v747_v25, %v745_v24  ;;  %v763_v24 = vld [vmem:[%s2099_s2 + $0x130] sm:$0xff] }
  0x32   :  { %1180 = vmatpush1.bf16.msra.mxu1 %v1743_v30 }
  0x33   :  { %547 = vmatpush1.bf16.msra.mxu0 %v1341_v33  ;;  %v751_v33 = vld [vmem:[%s2099_s2 + $0xd0] sm:$0xff]  ;;  %1182 = vmatprep.subr.bf16.mxu1 %v1746_v31 }
  0x34   :  { %548 = vmatprep.subr.bf16.mxu0 %v1342_v34  ;;  %v754_v34 = vld [vmem:[%s2099_s2 + $0xe8] sm:$0xff] }
  0x35   :  { %v1770_v39 = vpack.c.bf16 %v756_v35, %v754_v34  ;;  %v770_v34 = vld [vmem:[%s2099_s2 + $0x168] sm:$0xff]  ;;  %v772_v35 = vld [vmem:[%s2099_s2 + $0x178] sm:$0xff] }
  0x37   :  { %549 = vmatpush1.bf16.msra.mxu0 %v1344_v37  ;;  %v1371_v37 = vld [vmem:[%s2097_s1 + $0x154] ss:$8 sps:$4 sm:$0xff]  }
  0x38   :  { %550 = vmatprep.subr.bf16.mxu0 %v1345_v38  ;;  %v1767_v38 = vpack.c.bf16 %v751_v33, %v749_v32  ;;  %v767_v32 = vld [vmem:[%s2099_s2 + $0x150] sm:$0xff] }
  0x3a   :  { %1184 = vmatpush1.bf16.msra.mxu1 %v1767_v38 }
  0x3b   :  { %551 = vmatpush1.bf16.msra.mxu0 %v1347_v40  ;;  %v753_v40 = vld [vmem:[%s2099_s2 + $0xe0] sm:$0xff]  ;;  %1186 = vmatprep.subr.bf16.mxu1 %v1770_v39 }
  0x3c   :  { %552 = vmatprep.subr.bf16.mxu0 %v1348_v41  ;;  %v755_v41 = vld [vmem:[%s2099_s2 + $0xf0] sm:$0xff] }
  0x3d   :  { %v1791_v47 = vpack.c.bf16 %v755_v41, %v753_v40  ;;  %v771_v40 = vld [vmem:[%s2099_s2 + $0x170] sm:$0xff] }
  0x3f   :  { %553 = vmatpush1.bf16.msra.mxu0 %v1350_v55  ;;  %1188 = vmatpush1.bf16.msra.mxu1 %v1791_v47  ;;  %v1378_v55 = vld [vmem:[%s2097_s1 + $0x180] ss:$8 sps:$4 sm:$0xff]  }
  0x40   :  { %575 = vmatprep.subr.bf16.mxu0 %v1356_v57  ;;  %1190 = vmatprep.subr.bf16.mxu1 %v1794_v49  ;;  %v1383_v57 = vld [vmem:[%s2097_s1 + $0x194] ss:$8 sps:$4 sm:$0xff]  }
  0x42   :  { %555 = vmatmul.mubr.bf16.vlgmr.msra.gmra.mrb[0].mxu0 %v1351_v62  ;;  %v1389_v62 = vld [vmem:[%s2097_s1 + $0x1b4] ss:$8 sps:$4 sm:$0xff]  }
  0x43   :  { %576 = vmatpush1.bf16.msra.mxu0 %v1354_v1  ;;  %564 = vmatprep.mubr.bf16.mxu0 %v1405_v2  ;;  %v1393_v1 = vld [vmem:[%s2097_s1 + $0x1c0] ss:$8 sps:$4 sm:$0xff]   ;;  %v1401_v2 = vld [vmem:[%s2097_s1 + $0x1d4] ss:$8 sps:$4 sm:$0xff]  }
  0x44   :  { %577 = vmatprep.subr.bf16.mxu0 %v1359_v3  ;;  %v1399_v3 = vld [vmem:[%s2097_s1 + $0x1d0] ss:$8 sps:$4 sm:$0xff]  }
  0x47   :  { %578 = vmatpush1.bf16.msra.mxu0 %v1357_v10  ;;  %v1418_v10 = vld [vmem:[%s2098_s0 + $0x8] ss:$20 sps:$4 sm:$0xff]  }
  0x48   :  { %579 = vmatprep.subr.bf16.mxu0 %v1362_v11  ;;  %v1422_v11 = vld [vmem:[%s2098_s0 + $0x34] ss:$20 sps:$4 sm:$0xff]  }
  0x4a   :  { %565 = vmatmul.mubr.bf16.gmra.mrb[4].mxu0 %v1407_v16  ;;  %v759_v16 = vld [vmem:[%s2099_s2 + $0x110] sm:$0xff] }
  0x4b   :  { %580 = vmatpush1.bf16.msra.mxu0 %v1360_v19  ;;  %607 = vmatprep.mubr.bf16.mxu0 %v1420_v20  ;;  %v1870_v17 = vpack.c.bf16 %v759_v16, %v757_v15  ;;  %v764_v19 = vld [vmem:[%s2099_s2 + $0x138] sm:$0xff] }
  0x4c   :  { %581 = vmatprep.subr.bf16.mxu0 %v1365_v21  ;;  %v1879_v20 = vpack.c.bf16 %v764_v19, %v762_v18  ;;  %v761_v21 = vld [vmem:[%s2099_s2 + $0x120] sm:$0xff] }
  0x4d   :  { %1192 = vmatpush1.bf16.msra.mxu1 %v1870_v17  ;;  %v1887_v25 = vpack.c.bf16 %v763_v24, %v761_v21 }
  0x4e   :  { %1194 = vmatprep.subr.bf16.mxu1 %v1879_v20 }
  0x4f   :  { %582 = vmatpush1.bf16.msra.mxu0 %v1363_v28  ;;  %v1897_v28 = vpack.c.bf16 %v768_v27, %v766_v26 }
  0x50   :  { %583 = vmatprep.subr.bf16.mxu0 %v1368_v29  ;;  %v765_v29 = vld [vmem:[%s2099_s2 + $0x140] sm:$0xff] }
  0x51   :  { %1196 = vmatpush1.bf16.msra.mxu1 %v1887_v25  ;;  %v1905_v33 = vpack.c.bf16 %v767_v32, %v765_v29 }
  0x52   :  { %1198 = vmatprep.subr.bf16.mxu1 %v1897_v28 }
  0x53   :  { %584 = vmatpush1.bf16.msra.mxu0 %v1366_v36  ;;  %v1915_v36 = vpack.c.bf16 %v772_v35, %v770_v34 }
  0x54   :  { %585 = vmatprep.subr.bf16.mxu0 %v1371_v37  ;;  %v769_v37 = vld [vmem:[%s2099_s2 + $0x160] sm:$0xff] }
  0x55   :  { %1200 = vmatpush1.bf16.msra.mxu1 %v1905_v33  ;;  %v1923_v41 = vpack.c.bf16 %v771_v40, %v769_v37 }
  0x56   :  { %1202 = vmatprep.subr.bf16.mxu1 %v1915_v36 }
  0x57   :  { %586 = vmatpush1.bf16.msra.mxu0 %v1369_v45  ;;  %v1933_v45 = vpack.c.bf16 %v776_v43, %v774_v42 }
  0x58   :  { %587 = vmatprep.subr.bf16.mxu0 %v1374_v46  ;;  %v773_v46 = vld [vmem:[%s2099_s2 + $0x180] sm:$0xff] }
  0x59   :  { %1204 = vmatpush1.bf16.msra.mxu1 %v1923_v41 }
  0x5a   :  { %1206 = vmatprep.subr.bf16.mxu1 %v1933_v45 }
  0x5b   :  { %588 = vmatpush1.bf16.msra.mxu0 %v1372_v50  ;;  %v775_v50 = vld [vmem:[%s2099_s2 + $0x190] sm:$0xff] }
  0x5c   :  { %589 = vmatprep.subr.bf16.mxu0 %v1377_v51  ;;  %v1941_v51 = vpack.c.bf16 %v775_v50, %v773_v46 }
  0x5e   :  { %1208 = vmatpush1.bf16.msra.mxu1 %v1941_v51 }
  0x5f   :  { %590 = vmatpush1.bf16.msra.mxu0 %v1375_v53  ;;  %v778_v53 = vld [vmem:[%s2099_s2 + $0x1a8] sm:$0xff] }
  0x60   :  { %591 = vmatprep.subr.bf16.mxu0 %v1380_v54  ;;  %v780_v54 = vld [vmem:[%s2099_s2 + $0x1b8] sm:$0xff] }
  0x63   :  { %592 = vmatpush1.bf16.msra.mxu0 %v1378_v55  ;;  %v1951_v55 = vpack.c.bf16 %v780_v54, %v778_v53 }
  0x64   :  { %593 = vmatprep.subr.bf16.mxu0 %v1383_v57  ;;  %v777_v57 = vld [vmem:[%s2099_s2 + $0x1a0] sm:$0xff] }
  0x65   :  { %1210 = vmatprep.subr.bf16.mxu1 %v1951_v55 }
  0x67   :  { %594 = vmatpush1.bf16.msra.mxu0 %v1381_v59  ;;  %v779_v59 = vld [vmem:[%s2099_s2 + $0x1b0] sm:$0xff] }
  0x68   :  { %595 = vmatprep.subr.bf16.mxu0 %v1386_v60  ;;  %v1959_v60 = vpack.c.bf16 %v779_v59, %v777_v57 }
  0x6a   :  { %1212 = vmatpush1.bf16.msra.mxu1 %v1959_v60 }
  0x6b   :  { %596 = vmatpush1.bf16.msra.mxu0 %v1384_v61  ;;  %v782_v61 = vld [vmem:[%s2099_s2 + $0x1c8] sm:$0xff] }
  0x6c   :  { %597 = vmatprep.subr.bf16.mxu0 %v1389_v62  ;;  %v784_v62 = vld [vmem:[%s2099_s2 + $0x1d8] sm:$0xff] }
  0x6f   :  { %598 = vmatpush1.bf16.msra.mxu0 %v1387_v63  ;;  %v1969_v63 = vpack.c.bf16 %v784_v62, %v782_v61 }
  0x70   :  { %599 = vmatprep.subr.bf16.mxu0 %v1395_v0  ;;  %v781_v0 = vld [vmem:[%s2099_s2 + $0x1c0] sm:$0xff] }
  0x71   :  { %1214 = vmatprep.subr.bf16.mxu1 %v1969_v63 }
  0x73   :  { %600 = vmatpush1.bf16.msra.mxu0 %v1393_v1  ;;  %v783_v1 = vld [vmem:[%s2099_s2 + $0x1d0] sm:$0xff] }
  0x74   :  { %601 = vmatprep.subr.bf16.mxu0 %v1401_v2  ;;  %v1977_v2 = vpack.c.bf16 %v783_v1, %v781_v0 }
  0x76   :  { %1216 = vmatpush1.bf16.msra.mxu1 %v1977_v2 }
  0x77   :  { %602 = vmatpush1.bf16.msra.mxu0 %v1399_v3  ;;  %v786_v3 = vld [vmem:[%s2099_s2 + $0x1e8] sm:$0xff] }
  0x78   :  { %603 = vmatprep.subr.bf16.mxu0 %v1410_v6  ;;  %v788_v6 = vld [vmem:[%s2099_s2 + $0x1f8] sm:$0xff] }
  0x7b   :  { %604 = vmatpush1.bf16.msra.mxu0 %v1408_v7  ;;  %v1987_v7 = vpack.c.bf16 %v788_v6, %v786_v3 }
  0x7c   :  { %605 = vmatprep.subr.bf16.mxu0 %v1416_v8  ;;  %v785_v8 = vld [vmem:[%s2099_s2 + $0x1e0] sm:$0xff] }
  0x7d   :  { %1218 = vmatprep.subr.bf16.mxu1 %v1987_v7 }
  0x7f   :  { %606 = vmatpush1.bf16.msra.mxu0 %v1414_v9  ;;  %v787_v9 = vld [vmem:[%s2099_s2 + $0x1f0] sm:$0xff] }
  0x82   :  { %608 = vmatmul.mubr.bf16.vlgmr.msra.gmra.mrb[0].mxu0 %v1418_v10  ;;  %v1995_v10 = vpack.c.bf16 %v787_v9, %v785_v8 }
  0x83   :  { %617 = vmatprep.mubr.bf16.mxu0 %v1422_v11 }
  0x84   :  { %1220 = vmatpush1.bf16.msra.mxu1 %v1995_v10 }
  0x85   :  { %1222 = vmatprep.subr.bf16.mxu1 %v1591_v44 }
  0x8a   :  { %618 = vmatmul.mubr.bf16.gmra.mrb[4].mxu0 %v1424_v14 }
  0xed   :  { %v662_v11 = vpop.f32.mrb[0].mxu1 }
  0xee   :  { %v664_v14 = vpop.f32.mrb[1].mxu1 }
  0xef   :  { %v666_v15 = vpop.f32.mrb[2].mxu1 }
  0xf0   :  { %v668_v16 = vpop.f32.mrb[3].mxu1 }
  0xf5   :  { %v672_v18 = vpop.f32.mrb[4].mxu1 }
  0xf6   :  { %v674_v19 = vpop.f32.mrb[5].mxu1 }
  0xf7   :  { %v676_v21 = vpop.f32.mrb[6].mxu1 }
  0xf8   :  { %v678_v24 = vpop.f32.mrb[7].mxu1 }
 0x155   :  { %v609_v26 = vpop.f32.mrb[0].mxu0 }
 0x156   :  { %v2000_v27 = vadd.f32 %v662_v11, %v609_v26  ;;  %v611_v29 = vpop.f32.mrb[1].mxu0 }
 0x157   :  { %v2002_v32 = vadd.f32 %v664_v14, %v611_v29  ;;  %v613_v34 = vpop.f32.mrb[2].mxu0 }
 0x158   :  { %v2004_v35 = vadd.f32 %v666_v15, %v613_v34  ;;  %v615_v37 = vpop.f32.mrb[3].mxu0 }
 0x159   :  { %v2006_v40 = vadd.f32 %v668_v16, %v615_v37  ;;  %v700_v53 = vmul.f32 %v2002_v32, %v2002_v32 }
 0x15a   :  { %v681_v43 = vadd.f32 %v2004_v35, %v2000_v27 }
 0x15b   :  { %v702_v44 = vmul.f32 %v2006_v40, %v2006_v40  ;;  %v690_v54 = vadd.f32 %v2006_v40, %v2002_v32 }
 0x15d   :  { %v619_v42 = vpop.f32.mrb[4].mxu0  ;;  %v716_v1 = vadd.f32 %v702_v44, %v700_v53 }
 0x15e   :  { %v2012_v46 = vadd.f32 %v672_v18, %v619_v42  ;;  %v621_v50 = vpop.f32.mrb[5].mxu0 }
 0x15f   :  { %v2018_v57 = vadd.f32 %v674_v19, %v621_v50  ;;  %v623_v59 = vpop.f32.mrb[6].mxu0 }
 0x160   :  { %v682_v61 = vadd.f32 %v2012_v46, %v681_v43  ;;  %v2021_v62 = vadd.f32 %v676_v21, %v623_v59  ;;  %v625_v0 = vpop.f32.mrb[7].mxu0 }
 0x161   :  { %v691_v3 = vadd.f32 %v2018_v57, %v690_v54  ;;  %v704_v6 = vmul.f32 %v2018_v57, %v2018_v57  ;;  %v2026_v8 = vadd.f32 %v678_v24, %v625_v0 }
 0x162   :  { %v683_v9 = vadd.f32 %v2021_v62, %v682_v61 }
 0x163   :  { %v717_v11 = vadd.f32 %v716_v1, %v704_v6  ;;  %v692_v14 = vadd.f32 %v2026_v8, %v691_v3  ;;  %v706_v15 = vmul.f32 %v2026_v8, %v2026_v8  ;;  %v952_v3 = vlaneseq }
 0x164   :  { %v684_v16 = vrot.slane %v683_v9, 4 }
 0x165   :  { %v693_v18 = vrot.slane %v692_v14, 4  ;;  %v718_v19 = vadd.f32 %v717_v11, %v706_v15 }
 0x166   :  { %v685_v21 = vadd.f32 %v684_v16, %v683_v9  ;;  %v953_v9 = vshrl.u32 %v952_v3, 7 }
 0x167   :  { %v694_v26 = vadd.f32 %v693_v18, %v692_v14  ;;  %v719_v29 = vrot.slane %v718_v19, 4 }
 0x168   :  { %v686_v34 = vrot.slane %v685_v21, 2 }
 0x169   :  { %v695_v37 = vrot.slane %v694_v26, 2  ;;  %v720_v44 = vadd.f32 %v719_v29, %v718_v19  ;;  %v941_v19 = vld [vmem:[%s2100_s3] sm:$0x3]  ;;  %v973_v29 = vsub.s32 1, %v953_v9 }
 0x16a   :  { %v687_v42 = vadd.f32 %v686_v34, %v685_v21 }
 0x16b   :  { %v696_v24 = vadd.f32 %v695_v37, %v694_v26  ;;  %v721_v43 = vrot.slane %v720_v44, 2  ;;  %v969_v26 = vsub.s32 0, %v953_v9 }
 0x16c   :  { %v688_v50 = vrot.slane %v687_v42, 1 }
 0x16d   :  { %v697_v53 = vrot.slane %v696_v24, 1  ;;  %v722_v54 = vadd.f32 %v721_v43, %v720_v44 }
 0x16e   :  { %v689_v0 = vadd.f32 %v688_v50, %v687_v42 }
 0x16f   :  { %v698_v59 = vadd.f32 %v697_v53, %v696_v24  ;;  %v723_v61 = vrot.slane %v722_v54, 1  ;;  %v965_v53 = vld [vmem:[%s2101_s4] sm:$0x3] }
 0x171   :  { %853 = vmatprep.mubr.f32.mxu1 %v698_v59  ;;  %v724_v1 = vadd.f32 %v723_v61, %v722_v54 }
 0x172   :  { %854 = vmatmul.mubr.f32.vlgmr.msra.gmra.mrb[8].mxu1 %v689_v0 }
 0x173   :  { %1224 = vmatpush1.bf16.msra.mxu1 %v1603_v48  ;;  %926 = vmatprep.mubr.f32.mxu1 %v724_v1  ;;  %v701_v48 = vmul.f32 %v2004_v35, %v2004_v35 }
 0x174   :  { %1226 = vmatprep.subr.bf16.mxu1 %v1616_v52  ;;  %v699_v52 = vmul.f32 %v2000_v27, %v2000_v27 }
 0x177   :  { %1228 = vmatpush1.bf16.msra.mxu1 %v1628_v56  ;;  %v703_v56 = vmul.f32 %v2012_v46, %v2012_v46 }
 0x178   :  { %1230 = vmatprep.subr.bf16.mxu1 %v1634_v58  ;;  %v707_v58 = vadd.f32 %v701_v48, %v699_v52 }
 0x17b   :  { %1232 = vmatpush1.bf16.msra.mxu1 %v1665_v4  ;;  %v708_v4 = vadd.f32 %v707_v58, %v703_v56 }
 0x17c   :  { %1234 = vmatprep.subr.bf16.mxu1 %v1668_v5  ;;  %v705_v5 = vmul.f32 %v2021_v62, %v2021_v62 }
 0x17f   :  { %1236 = vmatpush1.bf16.msra.mxu1 %v1689_v12  ;;  %v709_v12 = vadd.f32 %v708_v4, %v705_v5 }
 0x180   :  { %1238 = vmatprep.subr.bf16.mxu1 %v1692_v13 }
 0x181   :  { %v710_v13 = vrot.slane %v709_v12, 4 }
 0x183   :  { %1240 = vmatpush1.bf16.msra.mxu1 %v1719_v22  ;;  %v711_v22 = vadd.f32 %v710_v13, %v709_v12 }
 0x184   :  { %1242 = vmatprep.subr.bf16.mxu1 %v1722_v23 }
 0x185   :  { %v712_v23 = vrot.slane %v711_v22, 2 }
 0x187   :  { %1244 = vmatpush1.bf16.msra.mxu1 %v1743_v30  ;;  %v713_v30 = vadd.f32 %v712_v23, %v711_v22 }
 0x188   :  { %1246 = vmatprep.subr.bf16.mxu1 %v1746_v31 }
 0x189   :  { %v714_v31 = vrot.slane %v713_v30, 1 }
 0x18b   :  { %1248 = vmatpush1.bf16.msra.mxu1 %v1767_v38  ;;  %v715_v38 = vadd.f32 %v714_v31, %v713_v30 }
 0x18c   :  { %1250 = vmatprep.subr.bf16.mxu1 %v1770_v39 }
 0x18f   :  { %1252 = vmatpush1.bf16.msra.mxu1 %v1791_v47 }
 0x190   :  { %1254 = vmatprep.subr.bf16.mxu1 %v1794_v49 }
 0x193   :  { %1256 = vmatpush1.bf16.msra.mxu1 %v1870_v17 }
 0x194   :  { %1258 = vmatprep.subr.bf16.mxu1 %v1879_v20 }
 0x197   :  { %1260 = vmatpush1.bf16.msra.mxu1 %v1887_v25 }
 0x198   :  { %1262 = vmatprep.subr.bf16.mxu1 %v1897_v28 }
 0x19b   :  { %1264 = vmatpush1.bf16.msra.mxu1 %v1905_v33 }
 0x19c   :  { %1266 = vmatprep.subr.bf16.mxu1 %v1915_v36 }
 0x19f   :  { %1268 = vmatpush1.bf16.msra.mxu1 %v1923_v41 }
 0x1a0   :  { %1270 = vmatprep.subr.bf16.mxu1 %v1933_v45 }
 0x1a3   :  { %1272 = vmatpush1.bf16.msra.mxu1 %v1941_v51 }
 0x1a4   :  { %1274 = vmatprep.subr.bf16.mxu1 %v1951_v55 }
 0x1a7   :  { %1276 = vmatpush1.bf16.msra.mxu1 %v1959_v60 }
 0x1a8   :  { %1278 = vmatprep.subr.bf16.mxu1 %v1969_v63 }
 0x1ab   :  { %1280 = vmatpush1.bf16.msra.mxu1 %v1977_v2 }
 0x1ac   :  { %1282 = vmatprep.subr.bf16.mxu1 %v1987_v7  ;;  %v1430_v7 = vmov 1966171168  }
 0x1af   :  { %1284 = vmatpush1.bf16.msra.mxu1 %v1995_v10  ;;  %v950_v10 = vunpack.c.l.s4 %v1430_v7 }
 0x1b1   :  { %v951_v6 = vunpack.c.0.s8 %v950_v10 }
 0x1b2   :  { %927 = vmatmul.mubr.f32.vlgmr.msra.gmra.mrb[10].mxu1 %v715_v38 }
 0x1b3   :  { %v954_v14 = vsub.s32 %v951_v6, %v953_v9 }
 0x245   :  { %v855_v39 = vpop.f32.mrb[8].mxu1 }
 0x246   :  { %v857_v47 = vpop.f32.mrb[9].mxu1  ;;  %v860_v49 = vmul.f32 0.0078125, %v855_v39 }
 0x247   :  { %v861_v17 = vmul.f32 0.0078125, %v857_v47 }
 0x248   :  { %v935_v25 = vmul.f32 %v860_v49, %v860_v49 }
 0x249   :  { %v936_v36 = vmul.f32 %v861_v17, %v861_v17 }
 0x285   :  { %v928_v20 = vpop.f32.mrb[10].mxu1 }
 0x286   :  { %v933_v28 = vmul.f32 0.0078125, %v928_v20  ;;  %v930_v33 = vpop.f32.mrb[11].mxu1 }
 0x287   :  { %v934_v41 = vmul.f32 0.0078125, %v930_v33 }
 0x288   :  { %v937_v45 = vsub.f32 %v933_v28, %v935_v25 }
 0x289   :  { %v938_v51 = vsub.f32 %v934_v41, %v936_v36 }
 0x28a   :  { %v939_v55 = vmax.f32 %v937_v45, 0.0 }
 0x28b   :  { %v940_v60 = vmax.f32 %v938_v51, 0.0 }
 0x28c   :  { %v942_v63 = vadd.f32 1e-05, %v939_v55 }
 0x28d   :  { %v943_v2 = vadd.f32 1e-05, %v940_v60 }
 0x28e   :  { %1425 = vrsqrt.f32 %v942_v63 }
 0x28f   :  { %1427 = vrsqrt.f32 %v943_v2 }
 0x298   :  { %v1426_v11 = vpop.eup %1425 }
 0x299   :  { %v1428_v15 = vpop.eup %1427 }
 0x29a   :  { %v948_v16 = vcombine.low %v1426_v11, %v1428_v15 }
 0x29c   :  { %v955_v18 = vrot.slane %v948_v16, %v954_v14 }
 0x29e   :  { %v962_v21 = vrot.slane %v955_v18, %v954_v14 }
 0x2a0   :  { %v964_v34 = vmul.f32 %v962_v21, %v941_v19 }
 0x2a2   :  { %v970_v37 = vrot.slane %v964_v34, %v969_v26  ;;  %v974_v44 = vrot.slane %v964_v34, %v973_v29 }
 0x2a4   :  { %v977_v42 = vmul.f32 %v970_v37, %v860_v49  ;;  %v978_v24 = vmul.f32 %v974_v44, %v861_v17  ;;  %v998_v61 = vmul.f32 %v2000_v27, %v970_v37  ;;  %v999_v0 = vmul.f32 %v2002_v32, %v974_v44 }
 0x2a5   :  { %v1000_v1 = vmul.f32 %v2004_v35, %v970_v37  ;;  %v1001_v48 = vmul.f32 %v2006_v40, %v974_v44  ;;  %v1002_v58 = vmul.f32 %v2012_v46, %v970_v37  ;;  %v1003_v4 = vmul.f32 %v2018_v57, %v974_v44 }
 0x2a6   :  { %v981_v43 = vcombine.low %v977_v42, %v978_v24  ;;  %v1004_v5 = vmul.f32 %v2021_v62, %v970_v37  ;;  %v1005_v12 = vmul.f32 %v2026_v8, %v974_v44 }
 0x2a8   :  { %v988_v50 = vrot.slane %v981_v43, %v954_v14 }
 0x2aa   :  { %v995_v54 = vrot.slane %v988_v50, %v954_v14 }
 0x2ac   :  { %v997_v59 = vsub.f32 %v965_v53, %v995_v54 }
 0x2ae   :  { %v1010_v52 = vrot.slane %v997_v59, %v969_v26  ;;  %v1014_v56 = vrot.slane %v997_v59, %v973_v29 }
 0x2b0   :  { %v1017_v13 = vadd.f32 %v1010_v52, %v998_v61  ;;  %v1018_v22 = vadd.f32 %v1014_v56, %v999_v0  ;;  %v1019_v23 = vadd.f32 %v1010_v52, %v1000_v1  ;;  %v1020_v27 = vadd.f32 %v1014_v56, %v1001_v48 }
 0x2b1   :  { %v1021_v30 = vadd.f32 %v1010_v52, %v1002_v58  ;;  %v1022_v32 = vadd.f32 %v1014_v56, %v1003_v4  ;;  %v1023_v31 = vadd.f32 %v1010_v52, %v1004_v5  ;;  %v1024_v35 = vadd.f32 %v1014_v56, %v1005_v12 }
 0x2b2   :  { %v1025_v38 = vmax.f32 %v1017_v13, 0.0  ;;  %v1026_v40 = vmax.f32 %v1018_v22, 0.0  ;;  %v1027_v39 = vmax.f32 %v1019_v23, 0.0  ;;  %v1028_v47 = vmax.f32 %v1020_v27, 0.0 }
 0x2b3   :  { %v1029_v49 = vmax.f32 %v1021_v30, 0.0  ;;  %v1030_v46 = vmax.f32 %v1022_v32, 0.0  ;;  %v1031_v17 = vmax.f32 %v1023_v31, 0.0  ;;  %v1032_v57 = vmax.f32 %v1024_v35, 0.0 }
 0x2b4   :  { %v1153_v20 = vpack.c.bf16 %v1026_v40, %v1025_v38  ;;  %v1154_v62 = vpack.c.bf16 %v1028_v47, %v1027_v39 }
 0x2b5   :  { %v1155_v25 = vpack.c.bf16 %v1030_v46, %v1029_v49  ;;  %v1156_v8 = vpack.c.bf16 %v1032_v57, %v1031_v17 }
 0x2b6   :  { %1057 = vst [vmem:[%s2102_s5] sm:$0xff] %v1153_v20  ;;  %1058 = vst [vmem:[%s2102_s5 + $0x8] sm:$0xff] %v1154_v62 }
 0x2b7   :  { %1059 = vst [vmem:[%s2102_s5 + $0x10] sm:$0xff] %v1155_v25  ;;  %1060 = vst [vmem:[%s2102_s5 + $0x18] sm:$0xff] %v1156_v8 }

// kernel: decoder_forward.5
= control target key start
LH: loop header
LB: loop body
LE: loop exit
PB: predicated region body
PF: predicated region fallthrough
CT: control target
= control target key end

     0   :  { %vm557_vm0 = vcmask 523264   ;;  %vm1820_vm1 = vmmov 0   ;;  %s2301_s1 = inlined_call_operand.vmem [shape: bf16[576,128], index: 1, kind: input, shape index: {}]   ;;  %s2302_s0 = inlined_call_operand.vmem [shape: bf16[128,576], index: 0, kind: input, shape index: {}]   ;;  %s2303_s2 = inlined_call_operand.vmem [shape: f32[128,128], index: 2, kind: input, shape index: {}]   ;;  %s2304_s3 = inlined_call_operand.vmem [shape: f32[1,128], index: 3, kind: input, shape index: {}]   ;;  %s2305_s4 = inlined_call_operand.vmem [shape: f32[1,128], index: 4, kind: input, shape index: {}]   ;;  %s2306_s5 = inlined_call_operand.vmem [shape: bf16[128,128], index: 5, kind: output, shape index: {}]  }
   0x1   :  { %v1725_v0 = vld [vmem:[%s2301_s1 + $0x40] sm:$0xff]   ;;  %v1729_v4 = vld [vmem:[%s2301_s1 + $0x48] sm:$0xff]   ;;  %v1733_v8 = vld [vmem:[%s2301_s1 + $0x50] sm:$0xff]  }
   0x2   :  { %v1726_v1 = vld [vmem:[%s2301_s1 + $0xc0] sm:$0xff]   ;;  %1406 = vmatprep.subr.bf16.mxu0 %v1725_v0  ;;  %v1730_v5 = vld [vmem:[%s2301_s1 + $0xc8] sm:$0xff]   ;;  %v1734_v9 = vld [vmem:[%s2301_s1 + $0xd0] sm:$0xff]  }
   0x3   :  { %v1727_v2 = vld [vmem:[%s2301_s1] sm:$0xff]   ;;  %1470 = vmatprep.subr.bf16.mxu1 %v1726_v1  ;;  %v1731_v6 = vld [vmem:[%s2301_s1 + $0x8] sm:$0xff]   ;;  %v1735_v10 = vld [vmem:[%s2301_s1 + $0x10] sm:$0xff]  }
   0x4   :  { %v1728_v3 = vld [vmem:[%s2301_s1 + $0x80] sm:$0xff]   ;;  %1407 = vmatpush3.bf16.msra.mxu0 %v1727_v2  ;;  %v1732_v7 = vld [vmem:[%s2301_s1 + $0x88] sm:$0xff]   ;;  %v1736_v11 = vld [vmem:[%s2301_s1 + $0x90] sm:$0xff]  }
   0x5   :  { %1471 = vmatpush3.bf16.msra.mxu1 %v1728_v3  ;;  %1408 = vmatprep.subr.bf16.mxu0 %v1729_v4  ;;  %v1737_v12 = vld [vmem:[%s2301_s1 + $0x58] sm:$0xff]   ;;  %v1741_v16 = vld [vmem:[%s2301_s1 + $0x60] sm:$0xff]   ;;  %v1745_v20 = vld [vmem:[%s2301_s1 + $0x68] sm:$0xff]  }
   0x6   :  { %1472 = vmatprep.subr.bf16.mxu1 %v1730_v5  ;;  %v1738_v13 = vld [vmem:[%s2301_s1 + $0xd8] sm:$0xff]   ;;  %v1742_v17 = vld [vmem:[%s2301_s1 + $0xe0] sm:$0xff]   ;;  %v1746_v21 = vld [vmem:[%s2301_s1 + $0xe8] sm:$0xff]  }
   0x7   :  { %v1739_v14 = vld [vmem:[%s2301_s1 + $0x18] sm:$0xff]   ;;  %v1743_v18 = vld [vmem:[%s2301_s1 + $0x20] sm:$0xff]   ;;  %v1747_v22 = vld [vmem:[%s2301_s1 + $0x28] sm:$0xff]  }
   0x8   :  { %1409 = vmatpush3.bf16.msra.mxu0 %v1731_v6  ;;  %v1740_v15 = vld [vmem:[%s2301_s1 + $0x98] sm:$0xff]   ;;  %v1744_v19 = vld [vmem:[%s2301_s1 + $0xa0] sm:$0xff]   ;;  %v1748_v23 = vld [vmem:[%s2301_s1 + $0xa8] sm:$0xff]  }
   0x9   :  { %1473 = vmatpush3.bf16.msra.mxu1 %v1732_v7  ;;  %1410 = vmatprep.subr.bf16.mxu0 %v1733_v8  ;;  %v1749_v24 = vld [vmem:[%s2301_s1 + $0x70] sm:$0xff]   ;;  %v1753_v28 = vld [vmem:[%s2301_s1 + $0x78] sm:$0xff]   ;;  %v1762_v35 = vld [vmem:[%s2302_s0 + $0xc] ss:$20 sps:$4 sm:$0xff]  }
   0xa   :  { %1474 = vmatprep.subr.bf16.mxu1 %v1734_v9  ;;  %v1750_v25 = vld [vmem:[%s2301_s1 + $0xf0] sm:$0xff]   ;;  %v1754_v29 = vld [vmem:[%s2301_s1 + $0xf8] sm:$0xff]   ;;  %v1763_v36 = vld [vmem:[%s2301_s1 + $0x100] sm:$0xff]   ;;  %711 = vmatprep.mubr.bf16.mxu1 %v1762_v35 }
   0xb   :  { %v1751_v26 = vld [vmem:[%s2301_s1 + $0x30] sm:$0xff]   ;;  %v1755_v30 = vld [vmem:[%s2301_s1 + $0x38] sm:$0xff]   ;;  %v1764_v37 = vld [vmem:[%s2302_s0 + $0x2c] ss:$20 sps:$4 sm:$0xff]  }
   0xc   :  { %1411 = vmatpush3.bf16.msra.mxu0 %v1735_v10  ;;  %v1752_v27 = vld [vmem:[%s2301_s1 + $0xb0] sm:$0xff]   ;;  %v1756_v31 = vld [vmem:[%s2301_s1 + $0xb8] sm:$0xff]   ;;  %v1776_v42 = vld [vmem:[%s2301_s1 + $0x108] sm:$0xff]  }
   0xd   :  { %1475 = vmatpush3.bf16.msra.mxu1 %v1736_v11  ;;  %1412 = vmatprep.subr.bf16.mxu0 %v1737_v12  ;;  %v1757_v32 = vld [vmem:[%s2302_s0] ss:$20 sps:$4 sm:$0xff]   ;;  %v1759_v33 = vld [vmem:[%s2302_s0 + $0x4] ss:$20 sps:$4 sm:$0xff]   ;;  %v1760_v34 = vld [vmem:[%s2302_s0 + $0x8] ss:$20 sps:$4 sm:$0xff]  }
   0xe   :  { %1476 = vmatprep.subr.bf16.mxu1 %v1738_v13  ;;  %614 = vmatprep.mubr.bf16.mxu0 %v1759_v33  ;;  %v1766_v38 = vld [vmem:[%s2302_s0 + $0x34] ss:$20 sps:$4 sm:$0xff]   ;;  %v1769_v40 = vld [vmem:[%s2302_s0 + $0x30] ss:$20 sps:$4 sm:$0xff]   ;;  %v1775_v45 = vld [vmem:[%s2302_s0 + $0x58] ss:$20 sps:$4 sm:$0xff]  }
   0xf   :  { %v1768_v39 = vld [vmem:[%s2302_s0 + $0x28] ss:$20 sps:$4 sm:$0xff]   ;;  %v1774_v44 = vld [vmem:[%s2302_s0 + $0x50] ss:$20 sps:$4 sm:$0xff]   ;;  %v1781_v50 = vld [vmem:[%s2302_s0 + $0x78] ss:$20 sps:$4 sm:$0xff]  }
  0x10   :  { %1413 = vmatpush3.bf16.msra.mxu0 %v1739_v14  ;;  %v1770_v41 = vld [vmem:[%s2302_s0 + $0x54] ss:$20 sps:$4 sm:$0xff]   ;;  %v1772_v43 = vld [vmem:[%s2302_s0 + $0x5c] ss:$20 sps:$4 sm:$0xff]   ;;  %v1779_v48 = vld [vmem:[%s2302_s0 + $0x84] ss:$20 sps:$4 sm:$0xff]  }
  0x11   :  { %1477 = vmatpush3.bf16.msra.mxu1 %v1740_v15  ;;  %1414 = vmatprep.subr.bf16.mxu0 %v1741_v16  ;;  %v1789_v46 = vld [vmem:[%s2301_s1 + $0x110] sm:$0xff]   ;;  %v1802_v49 = vld [vmem:[%s2301_s1 + $0x118] sm:$0xff]   ;;  %v1785_v53 = vld [vmem:[%s2302_s0 + $0xac] ss:$20 sps:$4 sm:$0xff]   ;;  %v1819_v12 = vmov 0.0|0.0  }
  0x12   :  { %1478 = vmatprep.subr.bf16.mxu1 %v1742_v17  ;;  %v1777_v47 = vld [vmem:[%s2302_s0 + $0x7c] ss:$20 sps:$4 sm:$0xff]   ;;  %v1782_v51 = vld [vmem:[%s2302_s0 + $0x80] ss:$20 sps:$4 sm:$0xff]   ;;  %v1783_v52 = vld [vmem:[%s2302_s0 + $0xa4] ss:$20 sps:$4 sm:$0xff]  }
  0x13   :  { %v1787_v54 = vld [vmem:[%s2302_s0 + $0xa0] ss:$20 sps:$4 sm:$0xff]   ;;  %v1788_v55 = vld [vmem:[%s2302_s0 + $0xa8] ss:$20 sps:$4 sm:$0xff]   ;;  %v1795_v59 = vld [vmem:[%s2302_s0 + $0xd0] ss:$20 sps:$4 sm:$0xff]  }
  0x14   :  { %1415 = vmatpush3.bf16.msra.mxu0 %v1743_v18  ;;  %v1790_v56 = vld [vmem:[%s2302_s0 + $0xcc] ss:$20 sps:$4 sm:$0xff]   ;;  %v1792_v57 = vld [vmem:[%s2302_s0 + $0xd4] ss:$20 sps:$4 sm:$0xff]   ;;  %v1798_v61 = vld [vmem:[%s2302_s0 + $0xfc] ss:$20 sps:$4 sm:$0xff]  }
  0x15   :  { %1479 = vmatpush3.bf16.msra.mxu1 %v1744_v19  ;;  %1416 = vmatprep.subr.bf16.mxu0 %v1745_v20  ;;  %v1794_v58 = vld [vmem:[%s2302_s0 + $0xc8] ss:$20 sps:$4 sm:$0xff]   ;;  %v1800_v62 = vld [vmem:[%s2302_s0 + $0xf0] ss:$20 sps:$4 sm:$0xff]   ;;  %v1801_v63 = vld [vmem:[%s2302_s0 + $0xf8] ss:$20 sps:$4 sm:$0xff]  }
  0x16   :  { %1480 = vmatprep.subr.bf16.mxu1 %v1746_v21  ;;  %v1796_v60 = vld [vmem:[%s2302_s0 + $0xf4] ss:$20 sps:$4 sm:$0xff]   ;;  %v1803_v0 = vld [vmem:[%s2302_s0 + $0x11c] ss:$20 sps:$4 sm:$0xff]   ;;  %v1805_v1 = vld [vmem:[%s2302_s0 + $0x124] ss:$20 sps:$4 sm:$0xff]  }
  0x17   :  { %v1807_v2 = vld [vmem:[%s2302_s0 + $0x118] ss:$20 sps:$4 sm:$0xff]   ;;  %v1808_v3 = vld [vmem:[%s2302_s0 + $0x120] ss:$20 sps:$4 sm:$0xff]   ;;  %v1809_v4 = vld [vmem:[%s2302_s0 + $0x10] ss:$20 sps:$4 sm:$0xff]  }
  0x18   :  { %1417 = vmatpush3.bf16.msra.mxu0 %v1747_v22  ;;  %v1810_v5 = vld [vmem:[%s2302_s0 + $0x38] ss:$20 sps:$4 sm:$0xff]   ;;  %v1811_v6 = vld [vmem:[%s2302_s0 + $0x60] ss:$20 sps:$4 sm:$0xff]   ;;  %v1812_v7 = vld [vmem:[%s2302_s0 + $0x88] ss:$20 sps:$4 sm:$0xff]  }
  0x19   :  { %1481 = vmatpush3.bf16.msra.mxu1 %v1748_v23  ;;  %1418 = vmatprep.subr.bf16.mxu0 %v1749_v24  ;;  %v1813_v8 = vld [vmem:[%s2302_s0 + $0xb0] ss:$20 sps:$4 sm:$0xff]   ;;  %v1814_v9 = vld [vmem:[%s2302_s0 + $0xd8] ss:$20 sps:$4 sm:$0xff]   ;;  %v1815_v10 = vld [vmem:[%s2302_s0 + $0x100] ss:$20 sps:$4 sm:$0xff]  }
  0x1a   :  { %1482 = vmatprep.subr.bf16.mxu1 %v1750_v25  ;;  %v1816_v11 = vld [vmem:[%s2302_s0 + $0x128] ss:$20 sps:$4 sm:$0xff]   ;;  %v931_v13 = vld [vmem:[%s2303_s2] sm:$0xff]  ;;  %v933_v16 = vld [vmem:[%s2303_s2 + $0x10] sm:$0xff] }
  0x1b   :  { %v932_v14 = vld [vmem:[%s2303_s2 + $0x8] sm:$0xff]  ;;  %v934_v17 = vld [vmem:[%s2303_s2 + $0x18] sm:$0xff]  ;;  %v935_v19 = vld [vmem:[%s2303_s2 + $0x20] sm:$0xff] }
  0x1c   :  { %1419 = vmatpush3.bf16.msra.mxu0 %v1751_v26  ;;  %v1675_v15 = vpack.c.bf16 %v932_v14, %v931_v13  ;;  %v1678_v18 = vpack.c.bf16 %v934_v17, %v933_v16  ;;  %v936_v20 = vld [vmem:[%s2303_s2 + $0x28] sm:$0xff]  ;;  %v937_v22 = vld [vmem:[%s2303_s2 + $0x30] sm:$0xff]  ;;  %v938_v23 = vld [vmem:[%s2303_s2 + $0x38] sm:$0xff] }
  0x1d   :  { %1483 = vmatpush3.bf16.msra.mxu1 %v1752_v27  ;;  %1420 = vmatprep.subr.bf16.mxu0 %v1753_v28  ;;  %v1681_v21 = vpack.c.bf16 %v936_v20, %v935_v19  ;;  %v1684_v24 = vpack.c.bf16 %v938_v23, %v937_v22  ;;  %v939_v25 = vld [vmem:[%s2303_s2 + $0x40] sm:$0xff]  ;;  %v940_v26 = vld [vmem:[%s2303_s2 + $0x48] sm:$0xff]  ;;  %v941_v28 = vld [vmem:[%s2303_s2 + $0x50] sm:$0xff] }
  0x1e   :  { %1484 = vmatprep.subr.bf16.mxu1 %v1754_v29  ;;  %v1687_v27 = vpack.c.bf16 %v940_v26, %v939_v25  ;;  %v942_v29 = vld [vmem:[%s2303_s2 + $0x58] sm:$0xff] }
  0x1f   :  { %v946_v35 = vld [vmem:[%s2303_s2 + $0x78] sm:$0xff] }
  0x20   :  { %1421 = vmatpush3.bf16.msra.mxu0 %v1755_v30  ;;  %v1690_v30 = vpack.c.bf16 %v942_v29, %v941_v28 }
  0x21   :  { %1485 = vmatpush3.bf16.msra.mxu1 %v1756_v31  ;;  %1580 = vmatprep.subr.bf16.mxu0 %v1763_v36  ;;  %v943_v31 = vld [vmem:[%s2303_s2 + $0x60] sm:$0xff] }
  0x22   :  { %1674 = vmatprep.subr.bf16.mxu1 %v1819_v12 }
  0x23   :  { %615 = vmatmul.mubr.bf16.vlgmr.msra.gmra.mrb[0].mxu0 %v1757_v32  ;;  %v944_v32 = vld [vmem:[%s2303_s2 + $0x68] sm:$0xff] }
  0x24   :  { %712 = vmatmul.mubr.bf16.vlgmr.msra.gmra.mrb[0].mxu1 %v1760_v34  ;;  %1581 = vmatpush3.bf16.msra.mxu0 %v1763_v36  ;;  %v1693_v33 = vpack.c.bf16 %v944_v32, %v943_v31  ;;  %v945_v34 = vld [vmem:[%s2303_s2 + $0x70] sm:$0xff] }
  0x25   :  { %622 = vmatprep.mubr.bf16.mxu0 %v1764_v37  ;;  %719 = vmatprep.mubr.bf16.mxu1 %v1766_v38  ;;  %v1696_v36 = vpack.c.bf16 %v946_v35, %v945_v34  ;;  %v1821_v37 = vmov 0.0  }
  0x26   :  { %1582 = vmatprep.subr.bf16.mxu0 %v1776_v42  ;;  %1676 = vmatpush3.bf16.msra.mxu1 %v1675_v15 }
  0x27   :  { %1677 = vmatprep.subr.bf16.mxu1 %v1819_v12 }
  0x28   :  { %1583 = vmatpush3.bf16.msra.mxu0 %v1776_v42 }
  0x29   :  { %1584 = vmatprep.subr.bf16.mxu0 %v1789_v46 }
  0x2a   :  { %1679 = vmatpush3.bf16.msra.mxu1 %v1678_v18 }
  0x2b   :  { %623 = vmatmul.mubr.bf16.gmra.mrb[4].mxu0 %v1768_v39  ;;  %1680 = vmatprep.subr.bf16.mxu1 %v1819_v12 }
  0x2c   :  { %720 = vmatmul.mubr.bf16.gmra.mrb[4].mxu1 %v1769_v40  ;;  %630 = vmatprep.mubr.bf16.mxu0 %v1770_v41 }
  0x2d   :  { %727 = vmatprep.mubr.bf16.mxu1 %v1772_v43  ;;  %1585 = vmatpush3.bf16.msra.mxu0 %v1789_v46 }
  0x2e   :  { %1586 = vmatprep.subr.bf16.mxu0 %v1802_v49  ;;  %1682 = vmatpush3.bf16.msra.mxu1 %v1681_v21 }
  0x2f   :  { %1683 = vmatprep.subr.bf16.mxu1 %v1819_v12 }
  0x31   :  { %1587 = vmatpush3.bf16.msra.mxu0 %v1802_v49 }
  0x32   :  { %1698 = vmatprep.subr.bf16.mxu0 %v1819_v12  ;;  %1685 = vmatpush3.bf16.msra.mxu1 %v1684_v24 }
  0x33   :  { %631 = vmatmul.mubr.bf16.gmra.mrb[8].mxu0 %v1774_v44  ;;  %1686 = vmatprep.subr.bf16.mxu1 %v1819_v12 }
  0x34   :  { %728 = vmatmul.mubr.bf16.gmra.mrb[8].mxu1 %v1775_v45  ;;  %638 = vmatprep.mubr.bf16.mxu0 %v1777_v47 }
  0x35   :  { %735 = vmatprep.mubr.bf16.mxu1 %v1779_v48 }
  0x36   :  { %1688 = vmatpush3.bf16.msra.mxu1 %v1687_v27 }
  0x37   :  { %1689 = vmatprep.subr.bf16.mxu1 %v1819_v12 }
  0x3a   :  { %1691 = vmatpush3.bf16.msra.mxu1 %v1690_v30 }
  0x3b   :  { %639 = vmatmul.mubr.bf16.gmra.mrb[12].mxu0 %v1781_v50  ;;  %1692 = vmatprep.subr.bf16.mxu1 %v1819_v12 }
  0x3c   :  { %736 = vmatmul.mubr.bf16.gmra.mrb[12].mxu1 %v1782_v51  ;;  %646 = vmatprep.mubr.bf16.mxu0 %v1783_v52 }
  0x3d   :  { %743 = vmatprep.mubr.bf16.mxu1 %v1785_v53 }
  0x3e   :  { %1694 = vmatpush3.bf16.msra.mxu1 %v1693_v33 }
  0x3f   :  { %1695 = vmatprep.subr.bf16.mxu1 %v1819_v12 }
  0x42   :  { %1697 = vmatpush3.bf16.msra.mxu1 %v1696_v36 }
  0x43   :  { %647 = vmatmul.mubr.bf16.gmra.mrb[16].mxu0 %v1787_v54 }
  0x44   :  { %744 = vmatmul.mubr.bf16.gmra.mrb[16].mxu1 %v1788_v55  ;;  %654 = vmatprep.mubr.bf16.mxu0 %v1790_v56 }
  0x45   :  { %751 = vmatprep.mubr.bf16.mxu1 %v1792_v57 }
  0x4b   :  { %655 = vmatmul.mubr.bf16.gmra.mrb[20].mxu0 %v1794_v58 }
  0x4c   :  { %752 = vmatmul.mubr.bf16.gmra.mrb[20].mxu1 %v1795_v59  ;;  %662 = vmatprep.mubr.bf16.mxu0 %v1796_v60 }
  0x4d   :  { %759 = vmatprep.mubr.bf16.mxu1 %v1798_v61 }
  0x53   :  { %663 = vmatmul.mubr.bf16.gmra.mrb[24].mxu0 %v1800_v62 }
  0x54   :  { %760 = vmatmul.mubr.bf16.gmra.mrb[24].mxu1 %v1801_v63  ;;  %670 = vmatprep.mubr.bf16.mxu0 %v1803_v0 }
  0x55   :  { %767 = vmatprep.mubr.bf16.mxu1 %v1805_v1 }
  0x5b   :  { %671 = vmatmul.mubr.bf16.gmra.mrb[28].mxu0 %v1807_v2 }
  0x5c   :  { %768 = vmatmul.mubr.bf16.gmra.mrb[28].mxu1 %v1808_v3  ;;  %1588 = vmatprep.mubr.msk.bf16.mxu0 %vm557_vm0, %v1809_v4 }
  0x5d   :  { %1636 = vmatprep.mubr.msk.f32.mxu1 %vm1820_vm1, %v1821_v37 }
  0x63   :  { %1589 = vmatmul.mubr.msk.bf16.vlgmr.msra.gmra.mrb[32].mxu0 %vm557_vm0, %v1810_v5 }
  0x64   :  { %1592 = vmatprep.mubr.msk.bf16.mxu0 %vm557_vm0, %v1811_v6  ;;  %1700 = vmatpush3.bf16.msra.mxu0 %v1675_v15 }
  0x65   :  { %1701 = vmatprep.subr.bf16.mxu0 %v1819_v12 }
  0x68   :  { %1703 = vmatpush3.bf16.msra.mxu0 %v1678_v18 }
  0x69   :  { %1704 = vmatprep.subr.bf16.mxu0 %v1819_v12 }
  0x6b   :  { %1593 = vmatmul.mubr.msk.bf16.gmra.mrb[36].mxu0 %vm557_vm0, %v1812_v7 }
  0x6c   :  { %1596 = vmatprep.mubr.msk.bf16.mxu0 %vm557_vm0, %v1813_v8  ;;  %1706 = vmatpush3.bf16.msra.mxu0 %v1681_v21 }
  0x6d   :  { %1707 = vmatprep.subr.bf16.mxu0 %v1819_v12 }
  0x70   :  { %1709 = vmatpush3.bf16.msra.mxu0 %v1684_v24 }
  0x71   :  { %1710 = vmatprep.subr.bf16.mxu0 %v1819_v12 }
  0x73   :  { %1597 = vmatmul.mubr.msk.bf16.gmra.mrb[40].mxu0 %vm557_vm0, %v1814_v9 }
  0x74   :  { %1600 = vmatprep.mubr.msk.bf16.mxu0 %vm557_vm0, %v1815_v10  ;;  %1712 = vmatpush3.bf16.msra.mxu0 %v1687_v27 }
  0x75   :  { %1713 = vmatprep.subr.bf16.mxu0 %v1819_v12 }
  0x78   :  { %1715 = vmatpush3.bf16.msra.mxu0 %v1690_v30 }
  0x79   :  { %1716 = vmatprep.subr.bf16.mxu0 %v1819_v12 }
  0x7b   :  { %1601 = vmatmul.mubr.msk.bf16.gmra.mrb[44].mxu0 %vm557_vm0, %v1816_v11 }
  0x7c   :  { %1718 = vmatpush3.bf16.msra.mxu0 %v1693_v33  ;;  %1671 = vmatprep.mubr.msk.f32.mxu0 %vm1820_vm1, %v1821_v37 }
  0x7d   :  { %1719 = vmatprep.subr.bf16.mxu0 %v1819_v12 }
  0x80   :  { %1721 = vmatpush3.bf16.msra.mxu0 %v1696_v36 }
  0xf6   :  { %v1422_v38 = vpop.f32.mrb[0].mxu0 }
  0xf7   :  { %v1486_v39 = vpop.f32.mrb[0].mxu1  ;;  %v1423_v40 = vpop.f32.mrb[1].mxu0 }
  0xf8   :  { %v1424_v41 = vadd.f32 %v1423_v40, %v1422_v38  ;;  %v1487_v42 = vpop.f32.mrb[1].mxu1  ;;  %v1425_v43 = vpop.f32.mrb[2].mxu0 }
  0xf9   :  { %v1488_v44 = vadd.f32 %v1487_v42, %v1486_v39  ;;  %v1489_v45 = vpop.f32.mrb[2].mxu1  ;;  %v1426_v46 = vpop.f32.mrb[3].mxu0 }
  0xfa   :  { %v1427_v47 = vadd.f32 %v1426_v46, %v1425_v43  ;;  %v1490_v48 = vpop.f32.mrb[3].mxu1 }
  0xfb   :  { %v1491_v49 = vadd.f32 %v1490_v48, %v1489_v45  ;;  %v2136_v50 = vadd.f32 %v1488_v44, %v1424_v41 }
  0xfd   :  { %v2138_v51 = vadd.f32 %v1491_v49, %v1427_v47 }
  0xfe   :  { %v1428_v52 = vpop.f32.mrb[4].mxu0 }
  0xff   :  { %v1492_v53 = vpop.f32.mrb[4].mxu1  ;;  %v1429_v54 = vpop.f32.mrb[5].mxu0 }
 0x100   :  { %v1430_v55 = vadd.f32 %v1429_v54, %v1428_v52  ;;  %v1493_v56 = vpop.f32.mrb[5].mxu1  ;;  %v1431_v57 = vpop.f32.mrb[6].mxu0 }
 0x101   :  { %v1494_v58 = vadd.f32 %v1493_v56, %v1492_v53  ;;  %v1495_v59 = vpop.f32.mrb[6].mxu1  ;;  %v1432_v60 = vpop.f32.mrb[7].mxu0 }
 0x102   :  { %v1433_v61 = vadd.f32 %v1432_v60, %v1431_v57  ;;  %v1496_v62 = vpop.f32.mrb[7].mxu1 }
 0x103   :  { %v1497_v63 = vadd.f32 %v1496_v62, %v1495_v59  ;;  %v2140_v0 = vadd.f32 %v1494_v58, %v1430_v55 }
 0x105   :  { %v2142_v1 = vadd.f32 %v1497_v63, %v1433_v61 }
 0x106   :  { %v1434_v2 = vpop.f32.mrb[8].mxu0 }
 0x107   :  { %v1498_v3 = vpop.f32.mrb[8].mxu1  ;;  %v1435_v4 = vpop.f32.mrb[9].mxu0 }
 0x108   :  { %v1436_v5 = vadd.f32 %v1435_v4, %v1434_v2  ;;  %v1499_v6 = vpop.f32.mrb[9].mxu1  ;;  %v1437_v7 = vpop.f32.mrb[10].mxu0 }
 0x109   :  { %v1500_v8 = vadd.f32 %v1499_v6, %v1498_v3  ;;  %v1501_v9 = vpop.f32.mrb[10].mxu1  ;;  %v1438_v10 = vpop.f32.mrb[11].mxu0 }
 0x10a   :  { %v1439_v11 = vadd.f32 %v1438_v10, %v1437_v7  ;;  %v1502_v12 = vpop.f32.mrb[11].mxu1 }
 0x10b   :  { %v1503_v13 = vadd.f32 %v1502_v12, %v1501_v9  ;;  %v2144_v14 = vadd.f32 %v1500_v8, %v1436_v5 }
 0x10d   :  { %v2146_v15 = vadd.f32 %v1503_v13, %v1439_v11 }
 0x10e   :  { %v1440_v16 = vpop.f32.mrb[12].mxu0 }
 0x10f   :  { %v1504_v17 = vpop.f32.mrb[12].mxu1  ;;  %v1441_v18 = vpop.f32.mrb[13].mxu0 }
 0x110   :  { %v1442_v19 = vadd.f32 %v1441_v18, %v1440_v16  ;;  %v1505_v20 = vpop.f32.mrb[13].mxu1  ;;  %v1443_v21 = vpop.f32.mrb[14].mxu0 }
 0x111   :  { %v1506_v22 = vadd.f32 %v1505_v20, %v1504_v17  ;;  %v1507_v23 = vpop.f32.mrb[14].mxu1  ;;  %v1444_v24 = vpop.f32.mrb[15].mxu0 }
 0x112   :  { %v1445_v25 = vadd.f32 %v1444_v24, %v1443_v21  ;;  %v1508_v26 = vpop.f32.mrb[15].mxu1 }
 0x113   :  { %v1509_v27 = vadd.f32 %v1508_v26, %v1507_v23  ;;  %v2148_v28 = vadd.f32 %v1506_v22, %v1442_v19 }
 0x115   :  { %v2150_v29 = vadd.f32 %v1509_v27, %v1445_v25 }
 0x116   :  { %v1446_v30 = vpop.f32.mrb[16].mxu0 }
 0x117   :  { %v1510_v31 = vpop.f32.mrb[16].mxu1  ;;  %v1447_v32 = vpop.f32.mrb[17].mxu0 }
 0x118   :  { %v1448_v33 = vadd.f32 %v1447_v32, %v1446_v30  ;;  %v1511_v34 = vpop.f32.mrb[17].mxu1  ;;  %v1449_v35 = vpop.f32.mrb[18].mxu0 }
 0x119   :  { %v1512_v36 = vadd.f32 %v1511_v34, %v1510_v31  ;;  %v1513_v37 = vpop.f32.mrb[18].mxu1  ;;  %v1450_v38 = vpop.f32.mrb[19].mxu0 }
 0x11a   :  { %v1451_v39 = vadd.f32 %v1450_v38, %v1449_v35  ;;  %v1514_v40 = vpop.f32.mrb[19].mxu1 }
 0x11b   :  { %v1515_v41 = vadd.f32 %v1514_v40, %v1513_v37  ;;  %v2152_v42 = vadd.f32 %v1512_v36, %v1448_v33 }
 0x11d   :  { %v2154_v43 = vadd.f32 %v1515_v41, %v1451_v39 }
 0x11e   :  { %v1452_v44 = vpop.f32.mrb[20].mxu0 }
 0x11f   :  { %v1516_v45 = vpop.f32.mrb[20].mxu1  ;;  %v1453_v46 = vpop.f32.mrb[21].mxu0 }
 0x120   :  { %v1454_v47 = vadd.f32 %v1453_v46, %v1452_v44  ;;  %v1517_v48 = vpop.f32.mrb[21].mxu1  ;;  %v1455_v49 = vpop.f32.mrb[22].mxu0 }
 0x121   :  { %v1518_v52 = vadd.f32 %v1517_v48, %v1516_v45  ;;  %v1519_v53 = vpop.f32.mrb[22].mxu1  ;;  %v1456_v54 = vpop.f32.mrb[23].mxu0 }
 0x122   :  { %v1457_v55 = vadd.f32 %v1456_v54, %v1455_v49  ;;  %v1520_v56 = vpop.f32.mrb[23].mxu1 }
 0x123   :  { %v1521_v57 = vadd.f32 %v1520_v56, %v1519_v53  ;;  %v2156_v58 = vadd.f32 %v1518_v52, %v1454_v47 }
 0x125   :  { %v2158_v59 = vadd.f32 %v1521_v57, %v1457_v55 }
 0x126   :  { %v1458_v60 = vpop.f32.mrb[24].mxu0 }
 0x127   :  { %v1522_v61 = vpop.f32.mrb[24].mxu1  ;;  %v1459_v62 = vpop.f32.mrb[25].mxu0 }
 0x128   :  { %v1460_v63 = vadd.f32 %v1459_v62, %v1458_v60  ;;  %v1523_v2 = vpop.f32.mrb[25].mxu1  ;;  %v1461_v3 = vpop.f32.mrb[26].mxu0 }
 0x129   :  { %v1524_v4 = vadd.f32 %v1523_v2, %v1522_v61  ;;  %v1525_v5 = vpop.f32.mrb[26].mxu1  ;;  %v1462_v6 = vpop.f32.mrb[27].mxu0 }
 0x12a   :  { %v1463_v7 = vadd.f32 %v1462_v6, %v1461_v3  ;;  %v1526_v8 = vpop.f32.mrb[27].mxu1 }
 0x12b   :  { %v1527_v9 = vadd.f32 %v1526_v8, %v1525_v5  ;;  %v2160_v10 = vadd.f32 %v1524_v4, %v1460_v63 }
 0x12d   :  { %v2162_v11 = vadd.f32 %v1527_v9, %v1463_v7 }
 0x12e   :  { %v1464_v12 = vpop.f32.mrb[28].mxu0 }
 0x12f   :  { %v1528_v13 = vpop.f32.mrb[28].mxu1  ;;  %v1465_v16 = vpop.f32.mrb[29].mxu0 }
 0x130   :  { %v1466_v17 = vadd.f32 %v1465_v16, %v1464_v12  ;;  %v1529_v18 = vpop.f32.mrb[29].mxu1  ;;  %v1467_v19 = vpop.f32.mrb[30].mxu0 }
 0x131   :  { %v1530_v20 = vadd.f32 %v1529_v18, %v1528_v13  ;;  %v1531_v21 = vpop.f32.mrb[30].mxu1  ;;  %v1468_v22 = vpop.f32.mrb[31].mxu0 }
 0x132   :  { %v1469_v23 = vadd.f32 %v1468_v22, %v1467_v19  ;;  %v1532_v24 = vpop.f32.mrb[31].mxu1 }
 0x133   :  { %v1533_v25 = vadd.f32 %v1532_v24, %v1531_v21  ;;  %v770_v26 = vadd.f32 %v1530_v20, %v1466_v17 }
 0x135   :  { %v2164_v27 = vadd.f32 %v1533_v25, %v1469_v23 }
 0x136   :  { %v1590_v30 = vpop.f32.mrb[32].mxu0 }
 0x137   :  { %v2167_v31 = vadd.f32 %v1590_v30, %v2140_v0  ;;  %v810_v32 = vpop.f32.mrb[33].mxu0 }
 0x138   :  { %v2170_v33 = vadd.f32 %v810_v32, %v2136_v50  ;;  %v1591_v34 = vpop.f32.mrb[34].mxu0 }
 0x139   :  { %v2173_v35 = vadd.f32 %v1591_v34, %v2142_v1  ;;  %v813_v36 = vpop.f32.mrb[35].mxu0  ;;  %v896_v50 = vmul.f32 %v2167_v31, %v2167_v31 }
 0x13a   :  { %v2176_v37 = vadd.f32 %v813_v36, %v2138_v51  ;;  %v894_v38 = vmul.f32 %v2170_v33, %v2170_v33 }
 0x13b   :  { %v897_v45 = vmul.f32 %v2173_v35, %v2173_v35 }
 0x13c   :  { %v873_v39 = vadd.f32 %v2176_v37, %v2170_v33  ;;  %v895_v0 = vmul.f32 %v2176_v37, %v2176_v37 }
 0x13e   :  { %v874_v40 = vadd.f32 %v873_v39, %v2167_v31  ;;  %v910_v1 = vadd.f32 %v895_v0, %v894_v38  ;;  %v1594_v41 = vpop.f32.mrb[36].mxu0 }
 0x13f   :  { %v2188_v44 = vadd.f32 %v1594_v41, %v2148_v28  ;;  %v826_v51 = vpop.f32.mrb[37].mxu0 }
 0x140   :  { %v911_v46 = vadd.f32 %v910_v1, %v896_v50  ;;  %v2193_v47 = vadd.f32 %v826_v51, %v2144_v14  ;;  %v875_v48 = vadd.f32 %v874_v40, %v2173_v35  ;;  %v1595_v49 = vpop.f32.mrb[38].mxu0 }
 0x141   :  { %v2197_v52 = vadd.f32 %v1595_v49, %v2150_v29  ;;  %v829_v53 = vpop.f32.mrb[39].mxu0  ;;  %v900_v29 = vmul.f32 %v2188_v44, %v2188_v44 }
 0x142   :  { %v876_v54 = vadd.f32 %v875_v48, %v2193_v47  ;;  %v898_v28 = vmul.f32 %v2193_v47, %v2193_v47  ;;  %v912_v55 = vadd.f32 %v911_v46, %v897_v45  ;;  %v2203_v56 = vadd.f32 %v829_v53, %v2146_v15 }
 0x143   :  { %v901_v15 = vmul.f32 %v2197_v52, %v2197_v52 }
 0x144   :  { %v913_v57 = vadd.f32 %v912_v55, %v898_v28  ;;  %v877_v14 = vadd.f32 %v876_v54, %v2203_v56  ;;  %v899_v60 = vmul.f32 %v2203_v56, %v2203_v56 }
 0x146   :  { %v878_v61 = vadd.f32 %v877_v14, %v2188_v44  ;;  %v914_v62 = vadd.f32 %v913_v57, %v899_v60  ;;  %v1598_v63 = vpop.f32.mrb[40].mxu0 }
 0x147   :  { %v2212_v2 = vadd.f32 %v1598_v63, %v2156_v58  ;;  %v842_v3 = vpop.f32.mrb[41].mxu0 }
 0x148   :  { %v915_v4 = vadd.f32 %v914_v62, %v900_v29  ;;  %v2217_v5 = vadd.f32 %v842_v3, %v2152_v42  ;;  %v879_v6 = vadd.f32 %v878_v61, %v2197_v52  ;;  %v1599_v7 = vpop.f32.mrb[42].mxu0 }
 0x149   :  { %v2221_v8 = vadd.f32 %v1599_v7, %v2158_v59  ;;  %v845_v9 = vpop.f32.mrb[43].mxu0  ;;  %v904_v59 = vmul.f32 %v2212_v2, %v2212_v2 }
 0x14a   :  { %v880_v12 = vadd.f32 %v879_v6, %v2217_v5  ;;  %v902_v58 = vmul.f32 %v2217_v5, %v2217_v5  ;;  %v916_v13 = vadd.f32 %v915_v4, %v901_v15  ;;  %v2227_v16 = vadd.f32 %v845_v9, %v2154_v43 }
 0x14b   :  { %v905_v43 = vmul.f32 %v2221_v8, %v2221_v8 }
 0x14c   :  { %v917_v17 = vadd.f32 %v916_v13, %v902_v58  ;;  %v881_v42 = vadd.f32 %v880_v12, %v2227_v16  ;;  %v903_v18 = vmul.f32 %v2227_v16, %v2227_v16 }
 0x14e   :  { %v882_v19 = vadd.f32 %v881_v42, %v2212_v2  ;;  %v918_v20 = vadd.f32 %v917_v17, %v903_v18  ;;  %v1602_v21 = vpop.f32.mrb[44].mxu0  ;;  %v1100_v17 = vlaneseq  ;;  %v1092_v18 = vld [vmem:[%s2304_s3] sm:$0x1] }
 0x14f   :  { %v2235_v22 = vadd.f32 %v1602_v21, %v770_v26  ;;  %v858_v23 = vpop.f32.mrb[45].mxu0  ;;  %v1096_v21 = vld [vmem:[%s2305_s4] sm:$0x1] }
 0x150   :  { %v919_v24 = vadd.f32 %v918_v20, %v904_v59  ;;  %v2240_v25 = vadd.f32 %v858_v23, %v2160_v10  ;;  %v883_v30 = vadd.f32 %v882_v19, %v2221_v8  ;;  %v1603_v32 = vpop.f32.mrb[46].mxu0  ;;  %v1101_v42 = vshrl.u32 %v1100_v17, 7 }
 0x151   :  { %v2244_v34 = vadd.f32 %v1603_v32, %v2164_v27  ;;  %v861_v36 = vpop.f32.mrb[47].mxu0  ;;  %v908_v10 = vmul.f32 %v2235_v22, %v2235_v22 }
 0x152   :  { %v884_v38 = vadd.f32 %v883_v30, %v2240_v25  ;;  %v906_v26 = vmul.f32 %v2240_v25, %v2240_v25  ;;  %v920_v39 = vadd.f32 %v919_v24, %v905_v43  ;;  %v862_v0 = vadd.f32 %v861_v36, %v2162_v11 }
 0x153   :  { %v909_v27 = vmul.f32 %v2244_v34, %v2244_v34  ;;  %v1102_v59 = vsub.s32 0, %v1101_v42 }
 0x154   :  { %v921_v50 = vadd.f32 %v920_v39, %v906_v26  ;;  %v885_v40 = vadd.f32 %v884_v38, %v862_v0  ;;  %v907_v1 = vmul.f32 %v862_v0, %v862_v0 }
 0x156   :  { %v886_v41 = vadd.f32 %v885_v40, %v2235_v22  ;;  %v922_v51 = vadd.f32 %v921_v50, %v907_v1 }
 0x158   :  { %v887_v45 = vadd.f32 %v886_v41, %v2244_v34  ;;  %v923_v46 = vadd.f32 %v922_v51, %v908_v10 }
 0x15a   :  { %v888_v48 = vrot.slane %v887_v45, 4  ;;  %v924_v49 = vadd.f32 %v923_v46, %v909_v27 }
 0x15c   :  { %v889_v53 = vadd.f32 %v888_v48, %v887_v45  ;;  %v925_v54 = vrot.slane %v924_v49, 4 }
 0x15e   :  { %v890_v11 = vrot.slane %v889_v53, 2  ;;  %v926_v28 = vadd.f32 %v925_v54, %v924_v49 }
 0x160   :  { %v891_v55 = vadd.f32 %v890_v11, %v889_v53  ;;  %v927_v57 = vrot.slane %v926_v28, 2 }
 0x162   :  { %v892_v14 = vrot.slane %v891_v55, 1  ;;  %v928_v60 = vadd.f32 %v927_v57, %v926_v28 }
 0x164   :  { %v893_v29 = vadd.f32 %v892_v14, %v891_v55  ;;  %v929_v61 = vrot.slane %v928_v60, 1 }
 0x166   :  { %1637 = vmatmul.mubr.f32.vlgmr.msra.gmra.mrb[32].mxu1 %v893_v29  ;;  %v930_v62 = vadd.f32 %v929_v61, %v928_v60 }
 0x168   :  { %1672 = vmatmul.mubr.f32.vlgmr.msra.gmra.mrb[48].mxu0 %v930_v62 }
 0x239   :  { %v1013_v63 = vpop.f32.mrb[32].mxu1 }
 0x23a   :  { %v1017_v3 = vmul.f32 0.001953125, %v1013_v63  ;;  %v1638_v15 = vpop.f32.mrb[33].mxu1 }
 0x23b   :  { %v1084_v4 = vpop.f32.mrb[48].mxu0 }
 0x23c   :  { %v1089_v6 = vmul.f32 %v1017_v3, %v1017_v3  ;;  %v1088_v7 = vmul.f32 0.001953125, %v1084_v4  ;;  %v1673_v9 = vpop.f32.mrb[49].mxu0 }
 0x23e   :  { %v1090_v12 = vsub.f32 %v1088_v7, %v1089_v6 }
 0x240   :  { %v1091_v58 = vmax.f32 %v1090_v12, 0.0 }
 0x242   :  { %v1093_v13 = vadd.f32 1e-05, %v1091_v58 }
 0x244   :  { %1817 = vrsqrt.f32 %v1093_v13 }
 0x24e   :  { %v1818_v19 = vpop.eup %1817 }
 0x24f   :  { %v1095_v20 = vmul.f32 %v1818_v19, %v1092_v18 }
 0x251   :  { %v1097_v23 = vmul.f32 %v1095_v20, %v1017_v3  ;;  %v1103_v43 = vrot.slane %v1095_v20, %v1102_v59 }
 0x253   :  { %v1098_v24 = vsub.f32 %v1096_v21, %v1097_v23  ;;  %v1105_v30 = vmul.f32 %v1103_v43, %v2170_v33  ;;  %v1106_v32 = vmul.f32 %v1103_v43, %v2176_v37  ;;  %v1107_v36 = vmul.f32 %v1103_v43, %v2167_v31 }
 0x254   :  { %v1108_v38 = vmul.f32 %v1103_v43, %v2173_v35  ;;  %v1109_v26 = vmul.f32 %v1103_v43, %v2193_v47  ;;  %v1110_v39 = vmul.f32 %v1103_v43, %v2203_v56  ;;  %v1111_v50 = vmul.f32 %v1103_v43, %v2188_v44 }
 0x255   :  { %v1112_v40 = vmul.f32 %v1103_v43, %v2197_v52  ;;  %v1113_v1 = vmul.f32 %v1103_v43, %v2217_v5  ;;  %v1114_v10 = vmul.f32 %v1103_v43, %v2227_v16  ;;  %v1115_v33 = vmul.f32 %v1103_v43, %v2212_v2 }
 0x256   :  { %v1116_v37 = vmul.f32 %v1103_v43, %v2221_v8  ;;  %v1125_v41 = vrot.slane %v1098_v24, %v1102_v59  ;;  %v1117_v31 = vmul.f32 %v1103_v43, %v2240_v25  ;;  %v1118_v35 = vmul.f32 %v1103_v43, %v862_v0 }
 0x257   :  { %v1119_v47 = vmul.f32 %v1103_v43, %v2235_v22  ;;  %v1120_v56 = vmul.f32 %v1103_v43, %v2244_v34 }
 0x258   :  { %v1127_v51 = vadd.f32 %v1125_v41, %v1105_v30  ;;  %v1128_v44 = vadd.f32 %v1125_v41, %v1106_v32  ;;  %v1129_v27 = vadd.f32 %v1125_v41, %v1107_v36  ;;  %v1130_v52 = vadd.f32 %v1125_v41, %v1108_v38 }
 0x259   :  { %v1131_v45 = vadd.f32 %v1125_v41, %v1109_v26  ;;  %v1132_v5 = vadd.f32 %v1125_v41, %v1110_v39  ;;  %v1133_v46 = vadd.f32 %v1125_v41, %v1111_v50  ;;  %v1134_v16 = vadd.f32 %v1125_v41, %v1112_v40 }
 0x25a   :  { %v1135_v48 = vadd.f32 %v1125_v41, %v1113_v1  ;;  %v1136_v2 = vadd.f32 %v1125_v41, %v1114_v10  ;;  %v1137_v49 = vadd.f32 %v1125_v41, %v1115_v33  ;;  %v1138_v8 = vadd.f32 %v1125_v41, %v1116_v37 }
 0x25b   :  { %v1139_v53 = vadd.f32 %v1125_v41, %v1117_v31  ;;  %v1140_v54 = vadd.f32 %v1125_v41, %v1118_v35  ;;  %v1141_v25 = vadd.f32 %v1125_v41, %v1119_v47  ;;  %v1142_v0 = vadd.f32 %v1125_v41, %v1120_v56 }
 0x25c   :  { %v1143_v11 = vmax.f32 %v1127_v51, 0.0  ;;  %v1144_v22 = vmax.f32 %v1128_v44, 0.0  ;;  %v1145_v28 = vmax.f32 %v1129_v27, 0.0  ;;  %v1146_v34 = vmax.f32 %v1130_v52, 0.0 }
 0x25d   :  { %v1147_v55 = vmax.f32 %v1131_v45, 0.0  ;;  %v1148_v57 = vmax.f32 %v1132_v5, 0.0  ;;  %v1149_v14 = vmax.f32 %v1133_v46, 0.0  ;;  %v1150_v60 = vmax.f32 %v1134_v16, 0.0 }
 0x25e   :  { %v1151_v29 = vmax.f32 %v1135_v48, 0.0  ;;  %v1152_v61 = vmax.f32 %v1136_v2, 0.0  ;;  %v1153_v62 = vmax.f32 %v1137_v49, 0.0  ;;  %v1154_v63 = vmax.f32 %v1138_v8, 0.0 }
 0x25f   :  { %v1155_v3 = vmax.f32 %v1139_v53, 0.0  ;;  %v1156_v15 = vmax.f32 %v1140_v54, 0.0  ;;  %v1157_v4 = vmax.f32 %v1141_v25, 0.0  ;;  %v1158_v6 = vmax.f32 %v1142_v0, 0.0 }
 0x260   :  { %v1362_v7 = vpack.c.bf16 %v1144_v22, %v1143_v11  ;;  %v1367_v9 = vpack.c.bf16 %v1146_v34, %v1145_v28  ;;  %v1372_v12 = vpack.c.bf16 %v1148_v57, %v1147_v55  ;;  %v1377_v58 = vpack.c.bf16 %v1150_v60, %v1149_v14 }
 0x261   :  { %v1382_v13 = vpack.c.bf16 %v1152_v61, %v1151_v29  ;;  %v1387_v17 = vpack.c.bf16 %v1154_v63, %v1153_v62  ;;  %v1392_v42 = vpack.c.bf16 %v1156_v15, %v1155_v3  ;;  %v1397_v18 = vpack.c.bf16 %v1158_v6, %v1157_v4 }
 0x262   :  { %1363 = vst [vmem:[%s2306_s5] sm:$0xff] %v1362_v7   ;;  %1399 = vst [vmem:[%s2306_s5 + $0x8] sm:$0xff] %v1367_v9  }
 0x263   :  { %1400 = vst [vmem:[%s2306_s5 + $0x10] sm:$0xff] %v1372_v12   ;;  %1401 = vst [vmem:[%s2306_s5 + $0x18] sm:$0xff] %v1377_v58  }
 0x264   :  { %1402 = vst [vmem:[%s2306_s5 + $0x20] sm:$0xff] %v1382_v13   ;;  %1403 = vst [vmem:[%s2306_s5 + $0x28] sm:$0xff] %v1387_v17  }
 0x265   :  { %1404 = vst [vmem:[%s2306_s5 + $0x30] sm:$0xff] %v1392_v42   ;;  %1405 = vst [vmem:[%s2306_s5 + $0x38] sm:$0xff] %v1397_v18  }

// kernel: decoder_forward.6
= control target key start
LH: loop header
LB: loop body
LE: loop exit
PB: predicated region body
PF: predicated region fallthrough
CT: control target
= control target key end

     0   :  { %v3116_v0 = vmov 0   ;;  %vm773_vm0 = vcmask 261120   ;;  %vm1448_vm1 = vcmask 523264   ;;  %vm3118_vm2 = vmmov 0   ;;  %s5234_s1 = inlined_call_operand.vmem [shape: bf16[288,64], index: 1, kind: input, shape index: {}]   ;;  %s5235_s0 = inlined_call_operand.vmem [shape: bf16[512,288], index: 0, kind: input, shape index: {}]   ;;  %s5236_s2 = inlined_call_operand.vmem [shape: f32[64,64], index: 2, kind: input, shape index: {}]   ;;  %s5237_s3 = inlined_call_operand.vmem [shape: f32[1,64], index: 3, kind: input, shape index: {}]   ;;  %s5238_s4 = inlined_call_operand.vmem [shape: f32[1,64], index: 4, kind: input, shape index: {}]   ;;  %s5239_s5 = inlined_call_operand.vmem [shape: bf16[512,64], index: 5, kind: output, shape index: {}]  }
   0x1   :  { %870 = vmatprep.subr.bf16.mxu0 %v3116_v0  ;;  %2932 = vmatprep.subr.bf16.mxu1 %v3116_v0  ;;  %v2968_v1 = vld [vmem:[%s5234_s1] sm:$0xff]   ;;  %v2969_v2 = vld [vmem:[%s5234_s1 + $0x8] sm:$0xff]   ;;  %v2970_v3 = vld [vmem:[%s5234_s1 + $0x10] sm:$0xff]   ;;  %vm2405_vm3 = vcmask 519168  }
   0x2   :  { %871 = vmatpush1.bf16.msra.mxu0 %v2968_v1  ;;  %2948 = vmatpush1.bf16.msra.mxu1 %v2968_v1  ;;  %v2971_v4 = vld [vmem:[%s5234_s1 + $0x18] sm:$0xff]   ;;  %v2972_v5 = vld [vmem:[%s5234_s1 + $0x20] sm:$0xff]   ;;  %v2973_v7 = vld [vmem:[%s5234_s1 + $0x28] sm:$0xff]  }
   0x3   :  { %872 = vmatprep.subr.bf16.mxu0 %v3116_v0  ;;  %2933 = vmatprep.subr.bf16.mxu1 %v3116_v0  ;;  %v2986_v6 = vld [vmem:[%s5235_s0 + $0x4] ss:$12 sps:$4 sm:$0xff]   ;;  %v2989_v8 = vld [vmem:[%s5235_s0 + $0x274] ss:$12 sps:$4 sm:$0xff]   ;;  %v2975_v10 = vld [vmem:[%s5234_s1 + $0x38] sm:$0xff]  }
   0x4   :  { %902 = vmatprep.mubr.bf16.mxu0 %v2986_v6  ;;  %1110 = vmatprep.mubr.bf16.mxu1 %v2989_v8  ;;  %v2974_v9 = vld [vmem:[%s5234_s1 + $0x30] sm:$0xff]   ;;  %v2976_v11 = vld [vmem:[%s5234_s1 + $0x40] sm:$0xff]   ;;  %v2977_v12 = vld [vmem:[%s5234_s1 + $0x48] sm:$0xff]  }
   0x5   :  { %v2978_v13 = vld [vmem:[%s5234_s1 + $0x50] sm:$0xff]   ;;  %v2979_v14 = vld [vmem:[%s5234_s1 + $0x58] sm:$0xff]   ;;  %v2980_v15 = vld [vmem:[%s5234_s1 + $0x60] sm:$0xff]  }
   0x6   :  { %873 = vmatpush1.bf16.msra.mxu0 %v2969_v2  ;;  %2949 = vmatpush1.bf16.msra.mxu1 %v2969_v2  ;;  %v2981_v16 = vld [vmem:[%s5234_s1 + $0x68] sm:$0xff]   ;;  %v2982_v17 = vld [vmem:[%s5234_s1 + $0x70] sm:$0xff]   ;;  %v2983_v18 = vld [vmem:[%s5234_s1 + $0x78] sm:$0xff]  }
   0x7   :  { %874 = vmatprep.subr.bf16.mxu0 %v3116_v0  ;;  %2934 = vmatprep.subr.bf16.mxu1 %v3116_v0  ;;  %v3020_v19 = vld [vmem:[%s5234_s1 + $0x80] sm:$0xff]   ;;  %v2987_v21 = vld [vmem:[%s5235_s0 + $0x270] ss:$12 sps:$4 sm:$0xff]   ;;  %v2992_v23 = vld [vmem:[%s5235_s0 + $0x28c] ss:$12 sps:$4 sm:$0xff]  }
   0x8   :  { %v2984_v20 = vld [vmem:[%s5235_s0] ss:$12 sps:$4 sm:$0xff]   ;;  %v2990_v22 = vld [vmem:[%s5235_s0 + $0x1c] ss:$12 sps:$4 sm:$0xff]   ;;  %v2994_v25 = vld [vmem:[%s5235_s0 + $0x18] ss:$12 sps:$4 sm:$0xff]  }
   0x9   :  { %v3021_v24 = vld [vmem:[%s5234_s1 + $0x88] sm:$0xff]   ;;  %v2996_v27 = vld [vmem:[%s5235_s0 + $0x34] ss:$12 sps:$4 sm:$0xff]   ;;  %v2998_v28 = vld [vmem:[%s5235_s0 + $0x2a4] ss:$12 sps:$4 sm:$0xff]  }
   0xa   :  { %875 = vmatpush1.bf16.msra.mxu0 %v2970_v3  ;;  %2950 = vmatpush1.bf16.msra.mxu1 %v2970_v3  ;;  %v2995_v26 = vld [vmem:[%s5235_s0 + $0x288] ss:$12 sps:$4 sm:$0xff]   ;;  %v3000_v29 = vld [vmem:[%s5235_s0 + $0x30] ss:$12 sps:$4 sm:$0xff]   ;;  %v3001_v30 = vld [vmem:[%s5235_s0 + $0x2a0] ss:$12 sps:$4 sm:$0xff]  }
   0xb   :  { %876 = vmatprep.subr.bf16.mxu0 %v3116_v0  ;;  %2935 = vmatprep.subr.bf16.mxu1 %v3116_v0  ;;  %v3002_v31 = vld [vmem:[%s5235_s0 + $0x4c] ss:$12 sps:$4 sm:$0xff]   ;;  %v3004_v32 = vld [vmem:[%s5235_s0 + $0x2bc] ss:$12 sps:$4 sm:$0xff]   ;;  %v3008_v35 = vld [vmem:[%s5235_s0 + $0x64] ss:$12 sps:$4 sm:$0xff]  }
   0xc   :  { %v3006_v33 = vld [vmem:[%s5235_s0 + $0x48] ss:$12 sps:$4 sm:$0xff]   ;;  %v3007_v34 = vld [vmem:[%s5235_s0 + $0x2b8] ss:$12 sps:$4 sm:$0xff]   ;;  %v3012_v37 = vld [vmem:[%s5235_s0 + $0x60] ss:$12 sps:$4 sm:$0xff]  }
   0xd   :  { %v3010_v36 = vld [vmem:[%s5235_s0 + $0x2d4] ss:$12 sps:$4 sm:$0xff]   ;;  %v3013_v38 = vld [vmem:[%s5235_s0 + $0x2d0] ss:$12 sps:$4 sm:$0xff]   ;;  %v3016_v40 = vld [vmem:[%s5235_s0 + $0x2ec] ss:$12 sps:$4 sm:$0xff]  }
   0xe   :  { %877 = vmatpush1.bf16.msra.mxu0 %v2971_v4  ;;  %2951 = vmatpush1.bf16.msra.mxu1 %v2971_v4  ;;  %v3014_v39 = vld [vmem:[%s5235_s0 + $0x7c] ss:$12 sps:$4 sm:$0xff]   ;;  %v3018_v41 = vld [vmem:[%s5235_s0 + $0x78] ss:$12 sps:$4 sm:$0xff]   ;;  %v3022_v43 = vld [vmem:[%s5235_s0 + $0x94] ss:$12 sps:$4 sm:$0xff]  }
   0xf   :  { %878 = vmatprep.subr.bf16.mxu0 %v3116_v0  ;;  %2936 = vmatprep.subr.bf16.mxu1 %v3116_v0  ;;  %v3019_v42 = vld [vmem:[%s5235_s0 + $0x2e8] ss:$12 sps:$4 sm:$0xff]   ;;  %v3025_v45 = vld [vmem:[%s5235_s0 + $0x90] ss:$12 sps:$4 sm:$0xff]   ;;  %v3026_v46 = vld [vmem:[%s5235_s0 + $0x20] ss:$12 sps:$4 sm:$0xff]  }
  0x10   :  { %v3024_v44 = vld [vmem:[%s5235_s0 + $0x8] ss:$12 sps:$4 sm:$0xff]   ;;  %v3027_v47 = vld [vmem:[%s5235_s0 + $0xac] ss:$12 sps:$4 sm:$0xff]   ;;  %v3031_v50 = vld [vmem:[%s5235_s0 + $0x50] ss:$12 sps:$4 sm:$0xff]  }
  0x11   :  { %v3029_v48 = vld [vmem:[%s5235_s0 + $0x38] ss:$12 sps:$4 sm:$0xff]   ;;  %v3030_v49 = vld [vmem:[%s5235_s0 + $0xa8] ss:$12 sps:$4 sm:$0xff]   ;;  %v3035_v53 = vld [vmem:[%s5235_s0 + $0xc0] ss:$12 sps:$4 sm:$0xff]  }
  0x12   :  { %879 = vmatpush1.bf16.msra.mxu0 %v2972_v5  ;;  %2952 = vmatpush1.bf16.msra.mxu1 %v2972_v5  ;;  %v3032_v51 = vld [vmem:[%s5235_s0 + $0xc4] ss:$12 sps:$4 sm:$0xff]   ;;  %v3034_v52 = vld [vmem:[%s5235_s0 + $0x68] ss:$12 sps:$4 sm:$0xff]   ;;  %v3036_v54 = vld [vmem:[%s5235_s0 + $0x80] ss:$12 sps:$4 sm:$0xff]  }
  0x13   :  { %880 = vmatprep.subr.bf16.mxu0 %v3116_v0  ;;  %2937 = vmatprep.subr.bf16.mxu1 %v3116_v0  ;;  %v3037_v55 = vld [vmem:[%s5235_s0 + $0xdc] ss:$12 sps:$4 sm:$0xff]   ;;  %v3039_v56 = vld [vmem:[%s5235_s0 + $0x98] ss:$12 sps:$4 sm:$0xff]   ;;  %v3042_v59 = vld [vmem:[%s5235_s0 + $0xf4] ss:$12 sps:$4 sm:$0xff]  }
  0x14   :  { %v3040_v57 = vld [vmem:[%s5235_s0 + $0xd8] ss:$12 sps:$4 sm:$0xff]   ;;  %v3041_v58 = vld [vmem:[%s5235_s0 + $0xb0] ss:$12 sps:$4 sm:$0xff]   ;;  %v3044_v60 = vld [vmem:[%s5235_s0 + $0xc8] ss:$12 sps:$4 sm:$0xff]  }
  0x15   :  { %v3045_v61 = vld [vmem:[%s5235_s0 + $0xf0] ss:$12 sps:$4 sm:$0xff]   ;;  %v3046_v62 = vld [vmem:[%s5235_s0 + $0xe0] ss:$12 sps:$4 sm:$0xff]   ;;  %v3050_v1 = vld [vmem:[%s5235_s0 + $0x108] ss:$12 sps:$4 sm:$0xff]  }
  0x16   :  { %881 = vmatpush1.bf16.msra.mxu0 %v2973_v7  ;;  %2953 = vmatpush1.bf16.msra.mxu1 %v2973_v7  ;;  %v3047_v63 = vld [vmem:[%s5235_s0 + $0x10c] ss:$12 sps:$4 sm:$0xff]   ;;  %v3051_v2 = vld [vmem:[%s5235_s0 + $0x110] ss:$12 sps:$4 sm:$0xff]   ;;  %v3054_v4 = vld [vmem:[%s5235_s0 + $0x128] ss:$12 sps:$4 sm:$0xff]  }
  0x17   :  { %882 = vmatprep.subr.bf16.mxu0 %v3116_v0  ;;  %2938 = vmatprep.subr.bf16.mxu1 %v3116_v0  ;;  %v3052_v3 = vld [vmem:[%s5235_s0 + $0x124] ss:$12 sps:$4 sm:$0xff]   ;;  %v3055_v5 = vld [vmem:[%s5235_s0 + $0x120] ss:$12 sps:$4 sm:$0xff]   ;;  %v3057_v7 = vld [vmem:[%s5235_s0 + $0x13c] ss:$12 sps:$4 sm:$0xff]  }
  0x18   :  { %v3056_v6 = vld [vmem:[%s5235_s0 + $0x140] ss:$12 sps:$4 sm:$0xff]   ;;  %v3059_v8 = vld [vmem:[%s5235_s0 + $0x158] ss:$12 sps:$4 sm:$0xff]  }
  0x1a   :  { %883 = vmatpush1.bf16.msra.mxu0 %v2974_v9  ;;  %2954 = vmatpush1.bf16.msra.mxu1 %v2974_v9  ;;  %v3060_v9 = vld [vmem:[%s5235_s0 + $0x138] ss:$12 sps:$4 sm:$0xff]  }
  0x1b   :  { %884 = vmatprep.subr.bf16.mxu0 %v3116_v0  ;;  %2939 = vmatprep.subr.bf16.mxu1 %v3116_v0 }
  0x1e   :  { %885 = vmatpush1.bf16.msra.mxu0 %v2975_v10  ;;  %2955 = vmatpush1.bf16.msra.mxu1 %v2975_v10  ;;  %v3061_v10 = vld [vmem:[%s5235_s0 + $0x170] ss:$12 sps:$4 sm:$0xff]  }
  0x1f   :  { %886 = vmatprep.subr.bf16.mxu0 %v3116_v0  ;;  %2940 = vmatprep.subr.bf16.mxu1 %v3116_v0 }
  0x22   :  { %887 = vmatpush1.bf16.msra.mxu0 %v2976_v11  ;;  %2956 = vmatpush1.bf16.msra.mxu1 %v2976_v11  ;;  %v3062_v11 = vld [vmem:[%s5235_s0 + $0x154] ss:$12 sps:$4 sm:$0xff]  }
  0x23   :  { %888 = vmatprep.subr.bf16.mxu0 %v3116_v0  ;;  %2941 = vmatprep.subr.bf16.mxu1 %v3116_v0 }
  0x26   :  { %889 = vmatpush1.bf16.msra.mxu0 %v2977_v12  ;;  %2957 = vmatpush1.bf16.msra.mxu1 %v2977_v12  ;;  %v3064_v12 = vld [vmem:[%s5235_s0 + $0x188] ss:$12 sps:$4 sm:$0xff]  }
  0x27   :  { %890 = vmatprep.subr.bf16.mxu0 %v3116_v0  ;;  %2942 = vmatprep.subr.bf16.mxu1 %v3116_v0 }
  0x2a   :  { %891 = vmatpush1.bf16.msra.mxu0 %v2978_v13  ;;  %2958 = vmatpush1.bf16.msra.mxu1 %v2978_v13  ;;  %v3065_v13 = vld [vmem:[%s5235_s0 + $0x150] ss:$12 sps:$4 sm:$0xff]  }
  0x2b   :  { %892 = vmatprep.subr.bf16.mxu0 %v3116_v0  ;;  %2943 = vmatprep.subr.bf16.mxu1 %v3116_v0 }
  0x2e   :  { %893 = vmatpush1.bf16.msra.mxu0 %v2979_v14  ;;  %2959 = vmatpush1.bf16.msra.mxu1 %v2979_v14  ;;  %v3066_v14 = vld [vmem:[%s5235_s0 + $0x1a0] ss:$12 sps:$4 sm:$0xff]  }
  0x2f   :  { %894 = vmatprep.subr.bf16.mxu0 %v3116_v0  ;;  %2944 = vmatprep.subr.bf16.mxu1 %v3116_v0 }
  0x32   :  { %895 = vmatpush1.bf16.msra.mxu0 %v2980_v15  ;;  %2960 = vmatpush1.bf16.msra.mxu1 %v2980_v15  ;;  %v3067_v15 = vld [vmem:[%s5235_s0 + $0x16c] ss:$12 sps:$4 sm:$0xff]  }
  0x33   :  { %896 = vmatprep.subr.bf16.mxu0 %v3116_v0  ;;  %2945 = vmatprep.subr.bf16.mxu1 %v3116_v0 }
  0x36   :  { %897 = vmatpush1.bf16.msra.mxu0 %v2981_v16  ;;  %2961 = vmatpush1.bf16.msra.mxu1 %v2981_v16  ;;  %v3069_v16 = vld [vmem:[%s5235_s0 + $0x1b8] ss:$12 sps:$4 sm:$0xff]  }
  0x37   :  { %898 = vmatprep.subr.bf16.mxu0 %v3116_v0  ;;  %2946 = vmatprep.subr.bf16.mxu1 %v3116_v0 }
  0x3a   :  { %899 = vmatpush1.bf16.msra.mxu0 %v2982_v17  ;;  %2962 = vmatpush1.bf16.msra.mxu1 %v2982_v17  ;;  %v3070_v17 = vld [vmem:[%s5235_s0 + $0x168] ss:$12 sps:$4 sm:$0xff]  }
  0x3b   :  { %900 = vmatprep.subr.bf16.mxu0 %v3116_v0  ;;  %2947 = vmatprep.subr.bf16.mxu1 %v3116_v0  ;;  %v3049_v0 = vld [vmem:[%s5235_s0 + $0xf8] ss:$12 sps:$4 sm:$0xff]  }
  0x3e   :  { %901 = vmatpush1.bf16.msra.mxu0 %v2983_v18  ;;  %2963 = vmatpush1.bf16.msra.mxu1 %v2983_v18  ;;  %v3071_v18 = vld [vmem:[%s5235_s0 + $0x1d0] ss:$12 sps:$4 sm:$0xff]  }
  0x3f   :  { %2802 = vmatprep.subr.bf16.mxu1 %v3020_v19 }
  0x41   :  { %903 = vmatmul.mubr.bf16.vlgmr.msra.gmra.mrb[0].mxu0 %v2984_v20  ;;  %1111 = vmatmul.mubr.bf16.vlgmr.msra.gmra.mrb[0].mxu1 %v2987_v21  ;;  %v3074_v20 = vld [vmem:[%s5235_s0 + $0x1e8] ss:$12 sps:$4 sm:$0xff]   ;;  %v3075_v21 = vld [vmem:[%s5235_s0 + $0x180] ss:$12 sps:$4 sm:$0xff]  }
  0x42   :  { %910 = vmatprep.mubr.bf16.mxu0 %v2990_v22  ;;  %1118 = vmatprep.mubr.bf16.mxu1 %v2992_v23  ;;  %v3076_v22 = vld [vmem:[%s5235_s0 + $0x200] ss:$12 sps:$4 sm:$0xff]   ;;  %v3077_v23 = vld [vmem:[%s5235_s0 + $0x19c] ss:$12 sps:$4 sm:$0xff]  }
  0x43   :  { %2803 = vmatpush3.bf16.msra.mxu1 %v3020_v19  ;;  %v3072_v19 = vld [vmem:[%s5235_s0 + $0x184] ss:$12 sps:$4 sm:$0xff]  }
  0x44   :  { %2804 = vmatprep.subr.bf16.mxu1 %v3021_v24 }
  0x47   :  { %2805 = vmatpush3.bf16.msra.mxu1 %v3021_v24  ;;  %v3079_v24 = vld [vmem:[%s5235_s0 + $0x218] ss:$12 sps:$4 sm:$0xff]  }
  0x49   :  { %911 = vmatmul.mubr.bf16.gmra.mrb[4].mxu0 %v2994_v25  ;;  %1119 = vmatmul.mubr.bf16.gmra.mrb[4].mxu1 %v2995_v26  ;;  %v3080_v25 = vld [vmem:[%s5235_s0 + $0x198] ss:$12 sps:$4 sm:$0xff]   ;;  %v3081_v26 = vld [vmem:[%s5235_s0 + $0x230] ss:$12 sps:$4 sm:$0xff]  }
  0x4a   :  { %918 = vmatprep.mubr.bf16.mxu0 %v2996_v27  ;;  %1126 = vmatprep.mubr.bf16.mxu1 %v2998_v28  ;;  %v3082_v27 = vld [vmem:[%s5235_s0 + $0x1b4] ss:$12 sps:$4 sm:$0xff]  }
  0x4b   :  { %v3084_v28 = vld [vmem:[%s5235_s0 + $0x248] ss:$12 sps:$4 sm:$0xff]  }
  0x51   :  { %919 = vmatmul.mubr.bf16.gmra.mrb[8].mxu0 %v3000_v29  ;;  %1127 = vmatmul.mubr.bf16.gmra.mrb[8].mxu1 %v3001_v30  ;;  %v3085_v29 = vld [vmem:[%s5235_s0 + $0x1b0] ss:$12 sps:$4 sm:$0xff]   ;;  %v3086_v30 = vld [vmem:[%s5235_s0 + $0x260] ss:$12 sps:$4 sm:$0xff]  }
  0x52   :  { %926 = vmatprep.mubr.bf16.mxu0 %v3002_v31  ;;  %1134 = vmatprep.mubr.bf16.mxu1 %v3004_v32  ;;  %v3087_v31 = vld [vmem:[%s5235_s0 + $0x1cc] ss:$12 sps:$4 sm:$0xff]  }
  0x53   :  { %v3089_v32 = vld [vmem:[%s5235_s0 + $0x278] ss:$12 sps:$4 sm:$0xff]  }
  0x59   :  { %927 = vmatmul.mubr.bf16.gmra.mrb[12].mxu0 %v3006_v33  ;;  %1135 = vmatmul.mubr.bf16.gmra.mrb[12].mxu1 %v3007_v34  ;;  %v3090_v33 = vld [vmem:[%s5235_s0 + $0x1c8] ss:$12 sps:$4 sm:$0xff]   ;;  %v3091_v34 = vld [vmem:[%s5235_s0 + $0x290] ss:$12 sps:$4 sm:$0xff]  }
  0x5a   :  { %934 = vmatprep.mubr.bf16.mxu0 %v3008_v35  ;;  %1142 = vmatprep.mubr.bf16.mxu1 %v3010_v36  ;;  %v3092_v35 = vld [vmem:[%s5235_s0 + $0x1e4] ss:$12 sps:$4 sm:$0xff]   ;;  %v3094_v36 = vld [vmem:[%s5235_s0 + $0x2a8] ss:$12 sps:$4 sm:$0xff]  }
  0x61   :  { %935 = vmatmul.mubr.bf16.gmra.mrb[16].mxu0 %v3012_v37  ;;  %1143 = vmatmul.mubr.bf16.gmra.mrb[16].mxu1 %v3013_v38  ;;  %v3095_v37 = vld [vmem:[%s5235_s0 + $0x1e0] ss:$12 sps:$4 sm:$0xff]  }
  0x62   :  { %942 = vmatprep.mubr.bf16.mxu0 %v3014_v39  ;;  %1150 = vmatprep.mubr.bf16.mxu1 %v3016_v40  ;;  %v3096_v38 = vld [vmem:[%s5235_s0 + $0x2c0] ss:$12 sps:$4 sm:$0xff]   ;;  %v3097_v39 = vld [vmem:[%s5235_s0 + $0x1fc] ss:$12 sps:$4 sm:$0xff]   ;;  %v3099_v40 = vld [vmem:[%s5235_s0 + $0x2d8] ss:$12 sps:$4 sm:$0xff]  }
  0x69   :  { %943 = vmatmul.mubr.bf16.gmra.mrb[20].mxu0 %v3018_v41  ;;  %1151 = vmatmul.mubr.bf16.gmra.mrb[20].mxu1 %v3019_v42  ;;  %v3100_v41 = vld [vmem:[%s5235_s0 + $0x1f8] ss:$12 sps:$4 sm:$0xff]   ;;  %v3101_v42 = vld [vmem:[%s5235_s0 + $0x2f0] ss:$12 sps:$4 sm:$0xff]  }
  0x6a   :  { %950 = vmatprep.mubr.bf16.mxu0 %v3022_v43  ;;  %2806 = vmatprep.mubr.msk.bf16.mxu1 %vm773_vm0, %v3024_v44  ;;  %v3102_v43 = vld [vmem:[%s5235_s0 + $0x214] ss:$12 sps:$4 sm:$0xff]   ;;  %v3104_v44 = vld [vmem:[%s5235_s0 + $0x210] ss:$12 sps:$4 sm:$0xff]  }
  0x71   :  { %951 = vmatmul.mubr.bf16.gmra.mrb[24].mxu0 %v3025_v45  ;;  %2807 = vmatmul.mubr.msk.bf16.vlgmr.msra.gmra.mrb[24].mxu1 %vm773_vm0, %v3026_v46  ;;  %v3105_v45 = vld [vmem:[%s5235_s0 + $0x22c] ss:$12 sps:$4 sm:$0xff]   ;;  %v3107_v46 = vld [vmem:[%s5235_s0 + $0x228] ss:$12 sps:$4 sm:$0xff]  }
  0x72   :  { %958 = vmatprep.mubr.bf16.mxu0 %v3027_v47  ;;  %2810 = vmatprep.mubr.msk.bf16.mxu1 %vm773_vm0, %v3029_v48  ;;  %v3108_v47 = vld [vmem:[%s5235_s0 + $0x244] ss:$12 sps:$4 sm:$0xff]   ;;  %v3110_v48 = vld [vmem:[%s5235_s0 + $0x240] ss:$12 sps:$4 sm:$0xff]  }
  0x79   :  { %959 = vmatmul.mubr.bf16.gmra.mrb[28].mxu0 %v3030_v49  ;;  %2811 = vmatmul.mubr.msk.bf16.gmra.mrb[28].mxu1 %vm773_vm0, %v3031_v50  ;;  %v3111_v49 = vld [vmem:[%s5235_s0 + $0x25c] ss:$12 sps:$4 sm:$0xff]   ;;  %v3113_v50 = vld [vmem:[%s5235_s0 + $0x258] ss:$12 sps:$4 sm:$0xff]  }
  0x7a   :  { %966 = vmatprep.mubr.bf16.mxu0 %v3032_v51  ;;  %2814 = vmatprep.mubr.msk.bf16.mxu1 %vm773_vm0, %v3034_v52  ;;  %v5240_v51 = vmov 0.0|0.0   ;;  %v1779_v52 = vld [vmem:[%s5236_s2] sm:$0xff] }
  0x7b   :  { %2908 = vmatprep.subr.bf16.mxu1 %v5240_v51 }
  0x81   :  { %967 = vmatmul.mubr.bf16.gmra.mrb[32].mxu0 %v3035_v53  ;;  %2815 = vmatmul.mubr.msk.bf16.gmra.mrb[32].mxu1 %vm773_vm0, %v3036_v54  ;;  %v1780_v53 = vld [vmem:[%s5236_s2 + $0x8] sm:$0xff] }
  0x82   :  { %974 = vmatprep.mubr.bf16.mxu0 %v3037_v55  ;;  %2818 = vmatprep.mubr.msk.bf16.mxu1 %vm773_vm0, %v3039_v56  ;;  %v3563_v54 = vpack.c.bf16 %v1780_v53, %v1779_v52 }
  0x84   :  { %2910 = vmatpush3.bf16.msra.mxu1 %v3563_v54 }
  0x85   :  { %2911 = vmatprep.subr.bf16.mxu1 %v5240_v51 }
  0x89   :  { %975 = vmatmul.mubr.bf16.gmra.mrb[36].mxu0 %v3040_v57  ;;  %2819 = vmatmul.mubr.msk.bf16.gmra.mrb[36].mxu1 %vm773_vm0, %v3041_v58 }
  0x8a   :  { %982 = vmatprep.mubr.bf16.mxu0 %v3042_v59  ;;  %2822 = vmatprep.mubr.msk.bf16.mxu1 %vm773_vm0, %v3044_v60 }
  0x91   :  { %983 = vmatmul.mubr.bf16.gmra.mrb[40].mxu0 %v3045_v61  ;;  %2823 = vmatmul.mubr.msk.bf16.gmra.mrb[40].mxu1 %vm773_vm0, %v3046_v62 }
  0x92   :  { %990 = vmatprep.mubr.bf16.mxu0 %v3047_v63  ;;  %2826 = vmatprep.mubr.msk.bf16.mxu1 %vm773_vm0, %v3049_v0 }
  0x99   :  { %991 = vmatmul.mubr.bf16.gmra.mrb[44].mxu0 %v3050_v1  ;;  %2827 = vmatmul.mubr.msk.bf16.gmra.mrb[44].mxu1 %vm773_vm0, %v3051_v2 }
  0x9a   :  { %998 = vmatprep.mubr.bf16.mxu0 %v3052_v3  ;;  %2830 = vmatprep.mubr.msk.bf16.mxu1 %vm773_vm0, %v3054_v4 }
  0xa1   :  { %999 = vmatmul.mubr.bf16.gmra.mrb[48].mxu0 %v3055_v5  ;;  %2831 = vmatmul.mubr.msk.bf16.gmra.mrb[48].mxu1 %vm773_vm0, %v3056_v6 }
  0xa2   :  { %1006 = vmatprep.mubr.bf16.mxu0 %v3057_v7  ;;  %2834 = vmatprep.mubr.msk.bf16.mxu1 %vm773_vm0, %v3059_v8 }
  0xa9   :  { %1007 = vmatmul.mubr.bf16.gmra.mrb[52].mxu0 %v3060_v9  ;;  %2835 = vmatmul.mubr.msk.bf16.gmra.mrb[52].mxu1 %vm773_vm0, %v3061_v10 }
  0xaa   :  { %1014 = vmatprep.mubr.bf16.mxu0 %v3062_v11  ;;  %2838 = vmatprep.mubr.msk.bf16.mxu1 %vm773_vm0, %v3064_v12 }
  0xb1   :  { %1015 = vmatmul.mubr.bf16.gmra.mrb[56].mxu0 %v3065_v13  ;;  %2839 = vmatmul.mubr.msk.bf16.gmra.mrb[56].mxu1 %vm773_vm0, %v3066_v14 }
  0xb2   :  { %1022 = vmatprep.mubr.bf16.mxu0 %v3067_v15  ;;  %2842 = vmatprep.mubr.msk.bf16.mxu1 %vm773_vm0, %v3069_v16 }
  0xb9   :  { %1023 = vmatmul.mubr.bf16.gmra.mrb[60].mxu0 %v3070_v17  ;;  %2843 = vmatmul.mubr.msk.bf16.gmra.mrb[60].mxu1 %vm773_vm0, %v3071_v18  ;;  %v1781_v17 = vld [vmem:[%s5236_s2 + $0x10] sm:$0xff]  ;;  %v1782_v18 = vld [vmem:[%s5236_s2 + $0x18] sm:$0xff] }
  0xba   :  { %1030 = vmatprep.mubr.bf16.mxu0 %v3072_v19  ;;  %2846 = vmatprep.mubr.msk.bf16.mxu1 %vm773_vm0, %v3074_v20 }
  0xc1   :  { %1031 = vmatmul.mubr.bf16.gmra.mrb[64].mxu0 %v3075_v21  ;;  %2847 = vmatmul.mubr.msk.bf16.gmra.mrb[64].mxu1 %vm773_vm0, %v3076_v22  ;;  %v3591_v21 = vpack.c.bf16 %v1782_v18, %v1781_v17 }
  0xc2   :  { %1038 = vmatprep.mubr.bf16.mxu0 %v3077_v23  ;;  %2850 = vmatprep.mubr.msk.bf16.mxu1 %vm773_vm0, %v3079_v24 }
  0xc3   :  { %2913 = vmatpush3.bf16.msra.mxu1 %v3591_v21 }
  0xc4   :  { %2914 = vmatprep.subr.bf16.mxu1 %v5240_v51 }
  0xc9   :  { %1039 = vmatmul.mubr.bf16.gmra.mrb[68].mxu0 %v3080_v25  ;;  %2851 = vmatmul.mubr.msk.bf16.gmra.mrb[68].mxu1 %vm773_vm0, %v3081_v26 }
  0xca   :  { %1046 = vmatprep.mubr.bf16.mxu0 %v3082_v27  ;;  %2854 = vmatprep.mubr.msk.bf16.mxu1 %vm773_vm0, %v3084_v28 }
  0xd1   :  { %1047 = vmatmul.mubr.bf16.gmra.mrb[72].mxu0 %v3085_v29  ;;  %2855 = vmatmul.mubr.msk.bf16.gmra.mrb[72].mxu1 %vm773_vm0, %v3086_v30 }
  0xd2   :  { %1054 = vmatprep.mubr.bf16.mxu0 %v3087_v31  ;;  %2858 = vmatprep.mubr.msk.bf16.mxu1 %vm773_vm0, %v3089_v32 }
  0xd9   :  { %1055 = vmatmul.mubr.bf16.gmra.mrb[76].mxu0 %v3090_v33  ;;  %2859 = vmatmul.mubr.msk.bf16.gmra.mrb[76].mxu1 %vm773_vm0, %v3091_v34 }
  0xda   :  { %1062 = vmatprep.mubr.bf16.mxu0 %v3092_v35  ;;  %2862 = vmatprep.mubr.msk.bf16.mxu1 %vm773_vm0, %v3094_v36 }
  0xe1   :  { %1063 = vmatmul.mubr.bf16.gmra.mrb[80].mxu0 %v3095_v37  ;;  %2863 = vmatmul.mubr.msk.bf16.gmra.mrb[80].mxu1 %vm773_vm0, %v3096_v38 }
  0xe2   :  { %1070 = vmatprep.mubr.bf16.mxu0 %v3097_v39  ;;  %2866 = vmatprep.mubr.msk.bf16.mxu1 %vm773_vm0, %v3099_v40 }
  0xe9   :  { %1071 = vmatmul.mubr.bf16.gmra.mrb[84].mxu0 %v3100_v41  ;;  %2867 = vmatmul.mubr.msk.bf16.gmra.mrb[84].mxu1 %vm773_vm0, %v3101_v42 }
  0xea   :  { %1078 = vmatprep.mubr.bf16.mxu0 %v3102_v43 }
  0xf1   :  { %1079 = vmatmul.mubr.bf16.gmra.mrb[88].mxu0 %v3104_v44 }
  0xf2   :  { %1086 = vmatprep.mubr.bf16.mxu0 %v3105_v45 }
  0xf9   :  { %1087 = vmatmul.mubr.bf16.gmra.mrb[92].mxu0 %v3107_v46 }
  0xfa   :  { %1094 = vmatprep.mubr.bf16.mxu0 %v3108_v47 }
 0x101   :  { %1095 = vmatmul.mubr.bf16.gmra.mrb[96].mxu0 %v3110_v48 }
 0x102   :  { %1102 = vmatprep.mubr.bf16.mxu0 %v3111_v49 }
 0x109   :  { %1103 = vmatmul.mubr.bf16.gmra.mrb[100].mxu0 %v3113_v50 }
 0x114   :  { %v904_v55 = vpop.f32.mrb[0].mxu0  ;;  %v3567_v56 = vpop.f32.mrb[0].mxu1 }
 0x115   :  { %v906_v57 = vpop.f32.mrb[1].mxu0  ;;  %v1114_v58 = vpop.f32.mrb[1].mxu1 }
 0x116   :  { %v907_v59 = vpop.f32.mrb[2].mxu0  ;;  %v3569_v60 = vpop.f32.mrb[2].mxu1 }
 0x117   :  { %v909_v61 = vpop.f32.mrb[3].mxu0  ;;  %v1117_v62 = vpop.f32.mrb[3].mxu1 }
 0x11c   :  { %v912_v63 = vpop.f32.mrb[4].mxu0  ;;  %v3571_v0 = vpop.f32.mrb[4].mxu1 }
 0x11d   :  { %v914_v1 = vpop.f32.mrb[5].mxu0  ;;  %v1122_v2 = vpop.f32.mrb[5].mxu1 }
 0x11e   :  { %v915_v3 = vpop.f32.mrb[6].mxu0  ;;  %v3573_v4 = vpop.f32.mrb[6].mxu1 }
 0x11f   :  { %v917_v5 = vpop.f32.mrb[7].mxu0  ;;  %v1125_v6 = vpop.f32.mrb[7].mxu1 }
 0x124   :  { %v3575_v7 = vpop.f32.mrb[8].mxu0  ;;  %v3577_v8 = vpop.f32.mrb[8].mxu1 }
 0x125   :  { %v922_v9 = vpop.f32.mrb[9].mxu0  ;;  %v1130_v10 = vpop.f32.mrb[9].mxu1 }
 0x126   :  { %v3579_v11 = vpop.f32.mrb[10].mxu0  ;;  %v3581_v12 = vpop.f32.mrb[10].mxu1  ;;  %v1783_v10 = vld [vmem:[%s5236_s2 + $0x20] sm:$0xff] }
 0x127   :  { %v925_v13 = vpop.f32.mrb[11].mxu0  ;;  %v1133_v14 = vpop.f32.mrb[11].mxu1 }
 0x128   :  { %v1784_v13 = vld [vmem:[%s5236_s2 + $0x28] sm:$0xff] }
 0x12c   :  { %v928_v15 = vpop.f32.mrb[12].mxu0  ;;  %v3583_v16 = vpop.f32.mrb[12].mxu1 }
 0x12d   :  { %v930_v19 = vpop.f32.mrb[13].mxu0  ;;  %v1138_v20 = vpop.f32.mrb[13].mxu1 }
 0x12e   :  { %v3593_v22 = vpop.f32.mrb[14].mxu0  ;;  %v3595_v23 = vpop.f32.mrb[14].mxu1 }
 0x12f   :  { %v933_v24 = vpop.f32.mrb[15].mxu0  ;;  %v1141_v25 = vpop.f32.mrb[15].mxu1 }
 0x130   :  { %v3653_v24 = vpack.c.bf16 %v1784_v13, %v1783_v10 }
 0x132   :  { %2916 = vmatpush3.bf16.msra.mxu1 %v3653_v24 }
 0x133   :  { %2917 = vmatprep.subr.bf16.mxu1 %v5240_v51 }
 0x134   :  { %v3599_v26 = vpop.f32.mrb[16].mxu0  ;;  %v3601_v27 = vpop.f32.mrb[16].mxu1 }
 0x135   :  { %v938_v28 = vpop.f32.mrb[17].mxu0  ;;  %v1146_v29 = vpop.f32.mrb[17].mxu1 }
 0x136   :  { %v3603_v30 = vpop.f32.mrb[18].mxu0  ;;  %v3605_v31 = vpop.f32.mrb[18].mxu1 }
 0x137   :  { %v941_v32 = vpop.f32.mrb[19].mxu0  ;;  %v1149_v33 = vpop.f32.mrb[19].mxu1 }
 0x13c   :  { %v3607_v34 = vpop.f32.mrb[20].mxu0  ;;  %v3609_v35 = vpop.f32.mrb[20].mxu1 }
 0x13d   :  { %v946_v36 = vpop.f32.mrb[21].mxu0  ;;  %v1154_v37 = vpop.f32.mrb[21].mxu1 }
 0x13e   :  { %v3611_v38 = vpop.f32.mrb[22].mxu0  ;;  %v3613_v39 = vpop.f32.mrb[22].mxu1 }
 0x13f   :  { %v949_v40 = vpop.f32.mrb[23].mxu0  ;;  %v1157_v41 = vpop.f32.mrb[23].mxu1 }
 0x144   :  { %v3615_v42 = vpop.f32.mrb[24].mxu0  ;;  %v2808_v43 = vpop.f32.mrb[24].mxu1 }
 0x145   :  { %v3617_v44 = vadd.f32 %v2808_v43, %v912_v63  ;;  %v954_v45 = vpop.f32.mrb[25].mxu0  ;;  %v1193_v46 = vpop.f32.mrb[25].mxu1 }
 0x146   :  { %v3619_v47 = vadd.f32 %v1193_v46, %v904_v55  ;;  %v3621_v48 = vpop.f32.mrb[26].mxu0  ;;  %v2809_v49 = vpop.f32.mrb[26].mxu1 }
 0x147   :  { %v3623_v50 = vadd.f32 %v2809_v49, %v915_v3  ;;  %v957_v52 = vpop.f32.mrb[27].mxu0  ;;  %v1196_v53 = vpop.f32.mrb[27].mxu1  ;;  %v1584_v61 = vmul.f32 %v3617_v44, %v3617_v44  ;;  %v1452_v1 = vsel %vm1448_vm1, %v3617_v44, 0.0 }
 0x148   :  { %v1582_v57 = vmul.f32 %v3619_v47, %v3619_v47  ;;  %v3627_v58 = vadd.f32 %v1196_v53, %v907_v59  ;;  %v1449_v55 = vsel %vm1448_vm1, %v3619_v47, 0.0 }
 0x149   :  { %v1585_v2 = vmul.f32 %v3623_v50, %v3623_v50  ;;  %v1649_v25 = vsel %vm1448_vm1, %v1584_v61, 0.0  ;;  %v1454_v28 = vsel %vm1448_vm1, %v3623_v50, 0.0 }
 0x14a   :  { %v1450_v62 = vsel %vm1448_vm1, %v3627_v58, 0.0  ;;  %v1583_v63 = vmul.f32 %v3627_v58, %v3627_v58  ;;  %v1646_v3 = vsel %vm1448_vm1, %v1582_v57, 0.0 }
 0x14b   :  { %v1451_v59 = vadd.f32 %v1450_v62, %v1449_v55  ;;  %v1651_v36 = vsel %vm1448_vm1, %v1585_v2, 0.0 }
 0x14c   :  { %v1647_v5 = vsel %vm1448_vm1, %v1583_v63, 0.0  ;;  %v3643_v6 = vpop.f32.mrb[28].mxu0  ;;  %v2812_v9 = vpop.f32.mrb[28].mxu1 }
 0x14d   :  { %v1453_v14 = vadd.f32 %v1452_v1, %v1451_v59  ;;  %v1648_v17 = vadd.f32 %v1647_v5, %v1646_v3  ;;  %v3651_v18 = vadd.f32 %v2812_v9, %v928_v15  ;;  %v962_v19 = vpop.f32.mrb[29].mxu0  ;;  %v1209_v20 = vpop.f32.mrb[29].mxu1 }
 0x14e   :  { %v3659_v29 = vadd.f32 %v1209_v20, %v3575_v7  ;;  %v3661_v32 = vpop.f32.mrb[30].mxu0  ;;  %v2813_v33 = vpop.f32.mrb[30].mxu1 }
 0x14f   :  { %v1455_v37 = vadd.f32 %v1454_v28, %v1453_v14  ;;  %v1650_v15 = vadd.f32 %v1649_v25, %v1648_v17  ;;  %v965_v40 = vpop.f32.mrb[31].mxu0  ;;  %v1212_v41 = vpop.f32.mrb[31].mxu1  ;;  %v3670_v7 = vadd.f32 %v2813_v33, %v3593_v22  ;;  %v1588_v61 = vmul.f32 %v3651_v18, %v3651_v18 }
 0x150   :  { %v1456_v43 = vsel %vm1448_vm1, %v3659_v29, 0.0  ;;  %v1586_v45 = vmul.f32 %v3659_v29, %v3659_v29  ;;  %v3673_v46 = vadd.f32 %v1212_v41, %v3579_v11  ;;  %v1460_v11 = vsel %vm1448_vm1, %v3651_v18, 0.0 }
 0x151   :  { %v1652_v49 = vadd.f32 %v1651_v36, %v1650_v15  ;;  %v1457_v52 = vadd.f32 %v1456_v43, %v1455_v37  ;;  %v1589_v2 = vmul.f32 %v3670_v7, %v3670_v7  ;;  %v1462_v13 = vsel %vm1448_vm1, %v3670_v7, 0.0 }
 0x152   :  { %v1653_v53 = vsel %vm1448_vm1, %v1586_v45, 0.0  ;;  %v1458_v57 = vsel %vm1448_vm1, %v3673_v46, 0.0  ;;  %v1587_v22 = vmul.f32 %v3673_v46, %v3673_v46  ;;  %v1657_v25 = vsel %vm1448_vm1, %v1588_v61, 0.0 }
 0x153   :  { %v1654_v55 = vadd.f32 %v1653_v53, %v1652_v49  ;;  %v1459_v62 = vadd.f32 %v1458_v57, %v1457_v52  ;;  %v1659_v41 = vsel %vm1448_vm1, %v1589_v2, 0.0 }
 0x154   :  { %v3685_v63 = vpop.f32.mrb[32].mxu0  ;;  %v2816_v1 = vpop.f32.mrb[32].mxu1  ;;  %v1655_v3 = vsel %vm1448_vm1, %v1587_v22, 0.0 }
 0x155   :  { %v1461_v59 = vadd.f32 %v1460_v11, %v1459_v62  ;;  %v3691_v5 = vadd.f32 %v2816_v1, %v3607_v34  ;;  %v970_v9 = vpop.f32.mrb[33].mxu0  ;;  %v1225_v10 = vpop.f32.mrb[33].mxu1  ;;  %v1656_v14 = vadd.f32 %v1655_v3, %v1654_v55 }
 0x156   :  { %v3696_v17 = vadd.f32 %v1225_v10, %v3599_v26  ;;  %v3698_v19 = vpop.f32.mrb[34].mxu0  ;;  %v2817_v20 = vpop.f32.mrb[34].mxu1 }
 0x157   :  { %v1463_v28 = vadd.f32 %v1462_v13, %v1461_v59  ;;  %v3702_v33 = vadd.f32 %v2817_v20, %v3611_v38  ;;  %v973_v34 = vpop.f32.mrb[35].mxu0  ;;  %v1228_v36 = vpop.f32.mrb[35].mxu1  ;;  %v1658_v37 = vadd.f32 %v1657_v25, %v1656_v14  ;;  %v1592_v53 = vmul.f32 %v3691_v5, %v3691_v5 }
 0x158   :  { %v1464_v15 = vsel %vm1448_vm1, %v3696_v17, 0.0  ;;  %v1590_v40 = vmul.f32 %v3696_v17, %v3696_v17  ;;  %v3709_v26 = vadd.f32 %v1228_v36, %v3603_v30  ;;  %v1468_v30 = vsel %vm1448_vm1, %v3691_v5, 0.0 }
 0x159   :  { %5289 = vst [vmem:[#allocation2_spill] sm:$0xff] %v3702_v33  ;;  %v1465_v43 = vadd.f32 %v1464_v15, %v1463_v28  ;;  %v1660_v45 = vadd.f32 %v1659_v41, %v1658_v37  ;;  %v1593_v11 = vmul.f32 %v3702_v33, %v3702_v33  ;;  %v1470_v9 = vsel %vm1448_vm1, %v3702_v33, 0.0 }
 0x15a   :  { %v1661_v49 = vsel %vm1448_vm1, %v1590_v40, 0.0  ;;  %v1466_v38 = vsel %vm1448_vm1, %v3709_v26, 0.0  ;;  %v1591_v52 = vmul.f32 %v3709_v26, %v3709_v26  ;;  %v1665_v25 = vsel %vm1448_vm1, %v1592_v53, 0.0 }
 0x15b   :  { %v1467_v57 = vadd.f32 %v1466_v38, %v1465_v43  ;;  %v1662_v61 = vadd.f32 %v1661_v49, %v1660_v45  ;;  %v1667_v41 = vsel %vm1448_vm1, %v1593_v11, 0.0 }
 0x15c   :  { %v1663_v55 = vsel %vm1448_vm1, %v1591_v52, 0.0  ;;  %v976_v62 = vpop.f32.mrb[36].mxu0  ;;  %v2820_v22 = vpop.f32.mrb[36].mxu1 }
 0x15d   :  { %v1469_v1 = vadd.f32 %v1468_v30, %v1467_v57  ;;  %v3725_v2 = vadd.f32 %v2820_v22, %v3643_v6  ;;  %v978_v59 = vpop.f32.mrb[37].mxu0  ;;  %v1241_v3 = vpop.f32.mrb[37].mxu1  ;;  %v1664_v10 = vadd.f32 %v1663_v55, %v1662_v61 }
 0x15e   :  { %v3730_v13 = vadd.f32 %v1241_v3, %v3615_v42  ;;  %v979_v14 = vpop.f32.mrb[38].mxu0  ;;  %v2821_v20 = vpop.f32.mrb[38].mxu1 }
 0x15f   :  { %5290 = vst [vmem:[#allocation3_spill] sm:$0xff] %v3725_v2  ;;  %v1471_v28 = vadd.f32 %v1470_v9, %v1469_v1  ;;  %v3734_v34 = vadd.f32 %v2821_v20, %v3661_v32  ;;  %v981_v36 = vpop.f32.mrb[39].mxu0  ;;  %v1244_v6 = vpop.f32.mrb[39].mxu1  ;;  %v1666_v37 = vadd.f32 %v1665_v25, %v1664_v10  ;;  %v1596_v3 = vmul.f32 %v3725_v2, %v3725_v2 }
 0x160   :  { %5291 = vst [vmem:[#allocation4_spill] sm:$0xff] %v3730_v13  ;;  %v1472_v15 = vsel %vm1448_vm1, %v3730_v13, 0.0  ;;  %v1594_v40 = vmul.f32 %v3730_v13, %v3730_v13  ;;  %v3741_v42 = vadd.f32 %v1244_v6, %v3621_v48 }
 0x161   :  { %5292 = vst [vmem:[#allocation5_spill] sm:$0xff] %v3734_v34  ;;  %v1668_v43 = vadd.f32 %v1667_v41, %v1666_v37  ;;  %v1473_v45 = vadd.f32 %v1472_v15, %v1471_v28  ;;  %v1597_v6 = vmul.f32 %v3734_v34, %v3734_v34 }
 0x162   :  { %5293 = vst [vmem:[#allocation6_spill] sm:$0xff] %v3741_v42  ;;  %v1669_v49 = vsel %vm1448_vm1, %v1594_v40, 0.0  ;;  %v1595_v32 = vmul.f32 %v3741_v42, %v3741_v42  ;;  %v1474_v38 = vsel %vm1448_vm1, %v3741_v42, 0.0 }
 0x163   :  { %v1670_v52 = vadd.f32 %v1669_v49, %v1668_v43  ;;  %v1475_v22 = vadd.f32 %v1474_v38, %v1473_v45 }
 0x164   :  { %v984_v53 = vpop.f32.mrb[40].mxu0  ;;  %v2824_v57 = vpop.f32.mrb[40].mxu1  ;;  %v1671_v30 = vsel %vm1448_vm1, %v1595_v32, 0.0 }
 0x165   :  { %v3750_v61 = vadd.f32 %v2824_v57, %v976_v62  ;;  %v986_v48 = vpop.f32.mrb[41].mxu0  ;;  %v1257_v55 = vpop.f32.mrb[41].mxu1  ;;  %v1672_v25 = vadd.f32 %v1671_v30, %v1670_v52  ;;  %v1476_v62 = vsel %vm1448_vm1, %v3725_v2, 0.0  ;;  %v1675_v57 = vsel %vm1448_vm1, %v1597_v6, 0.0 }
 0x166   :  { %v3753_v11 = vadd.f32 %v1257_v55, %v3685_v63  ;;  %v987_v1 = vpop.f32.mrb[42].mxu0  ;;  %v2825_v59 = vpop.f32.mrb[42].mxu1  ;;  %v1477_v36 = vadd.f32 %v1476_v62, %v1475_v22  ;;  %v1673_v63 = vsel %vm1448_vm1, %v1596_v3, 0.0 }
 0x167   :  { %5294 = vst [vmem:[#allocation7_spill] sm:$0xff] %v3750_v61  ;;  %v3757_v9 = vadd.f32 %v2825_v59, %v979_v14  ;;  %v989_v10 = vpop.f32.mrb[43].mxu0  ;;  %v1260_v20 = vpop.f32.mrb[43].mxu1  ;;  %v1674_v37 = vadd.f32 %v1673_v63, %v1672_v25  ;;  %v1478_v14 = vsel %vm1448_vm1, %v3734_v34, 0.0 }
 0x168   :  { %5295 = vst [vmem:[#allocation8_spill] sm:$0xff] %v3753_v11  ;;  %v3760_v28 = vadd.f32 %v1260_v20, %v3698_v19  ;;  %v1598_v41 = vmul.f32 %v3753_v11, %v3753_v11  ;;  %v1479_v49 = vadd.f32 %v1478_v14, %v1477_v36  ;;  %v1480_v30 = vsel %vm1448_vm1, %v3753_v11, 0.0 }
 0x169   :  { %5296 = vst [vmem:[#allocation9_spill] sm:$0xff] %v3757_v9  ;;  %v1676_v59 = vadd.f32 %v1675_v57, %v1674_v37 }
 0x16a   :  { %5297 = vst [vmem:[#allocation10_spill] sm:$0xff] %v3760_v28  ;;  %v1677_v10 = vsel %vm1448_vm1, %v1598_v41, 0.0  ;;  %v1481_v20 = vadd.f32 %v1480_v30, %v1479_v49  ;;  %v1482_v25 = vsel %vm1448_vm1, %v3760_v28, 0.0  ;;  %v1785_v41 = vld [vmem:[%s5236_s2 + $0x30] sm:$0xff]  ;;  %v1600_v49 = vmul.f32 %v3750_v61, %v3750_v61 }
 0x16b   :  { %v1678_v62 = vadd.f32 %v1677_v10, %v1676_v59  ;;  %v5242_v30 = vmov 0.0   ;;  %v1484_v59 = vsel %vm1448_vm1, %v3750_v61, 0.0 }
 0x16c   :  { %v992_v15 = vpop.f32.mrb[44].mxu0  ;;  %v2828_v40 = vpop.f32.mrb[44].mxu1  ;;  %v1483_v14 = vadd.f32 %v1482_v25, %v1481_v20  ;;  %2886 = vmatprep.mubr.msk.f32.mxu1 %vm3118_vm2, %v5242_v30  ;;  %v1601_v20 = vmul.f32 %v3757_v9, %v3757_v9 }
 0x16d   :  { %v3771_v19 = vadd.f32 %v2828_v40, %v992_v15  ;;  %v994_v43 = vpop.f32.mrb[45].mxu0  ;;  %v1273_v45 = vpop.f32.mrb[45].mxu1 }
 0x16e   :  { %v3773_v32 = vadd.f32 %v1273_v45, %v984_v53  ;;  %v995_v38 = vpop.f32.mrb[46].mxu0  ;;  %v2829_v52 = vpop.f32.mrb[46].mxu1  ;;  %v1599_v53 = vmul.f32 %v3760_v28, %v3760_v28  ;;  %v1786_v45 = vld [vmem:[%s5236_s2 + $0x38] sm:$0xff]  ;;  %v1485_v10 = vadd.f32 %v1484_v59, %v1483_v14 }
 0x16f   :  { %5298 = vst [vmem:[#allocation11_spill] sm:$0xff] %v3771_v19  ;;  %v3778_v48 = vadd.f32 %v2829_v52, %v995_v38  ;;  %v997_v55 = vpop.f32.mrb[47].mxu0  ;;  %v1276_v22 = vpop.f32.mrb[47].mxu1  ;;  %v3798_v57 = vpack.c.bf16 %v1786_v45, %v1785_v41 }
 0x170   :  { %5299 = vst [vmem:[#allocation12_spill] sm:$0xff] %v3773_v32  ;;  %v3780_v3 = vadd.f32 %v1276_v22, %v987_v1  ;;  %v1679_v6 = vsel %vm1448_vm1, %v1599_v53, 0.0  ;;  %v1681_v53 = vsel %vm1448_vm1, %v1600_v49, 0.0  ;;  %v1683_v49 = vsel %vm1448_vm1, %v1601_v20, 0.0 }
 0x171   :  { %5300 = vst [vmem:[#allocation13_spill] sm:$0xff] %v3778_v48  ;;  %v1680_v55 = vadd.f32 %v1679_v6, %v1678_v62  ;;  %2919 = vmatpush3.bf16.msra.mxu1 %v3798_v57  ;;  %v1486_v62 = vsel %vm1448_vm1, %v3757_v9, 0.0  ;;  %v1602_v6 = vmul.f32 %v3773_v32, %v3773_v32  ;;  %v1492_v9 = vsel %vm1448_vm1, %v3771_v19, 0.0 }
 0x172   :  { %5301 = vst [vmem:[#allocation14_spill] sm:$0xff] %v3780_v3  ;;  %2920 = vmatprep.subr.bf16.mxu1 %v5240_v51  ;;  %v1487_v41 = vadd.f32 %v1486_v62, %v1485_v10  ;;  %v1490_v10 = vsel %vm1448_vm1, %v3780_v3, 0.0 }
 0x173   :  { %v1682_v25 = vadd.f32 %v1681_v53, %v1680_v55  ;;  %v1685_v30 = vsel %vm1448_vm1, %v1602_v6, 0.0 }
 0x174   :  { %v1000_v36 = vpop.f32.mrb[48].mxu0  ;;  %v2832_v63 = vpop.f32.mrb[48].mxu1 }
 0x175   :  { %v1002_v15 = vpop.f32.mrb[49].mxu0  ;;  %v1289_v40 = vpop.f32.mrb[49].mxu1  ;;  %v1684_v51 = vadd.f32 %v1683_v49, %v1682_v25 }
 0x176   :  { %v3788_v37 = vadd.f32 %v1289_v40, %v1000_v36  ;;  %v1003_v1 = vpop.f32.mrb[50].mxu0  ;;  %v2833_v43 = vpop.f32.mrb[50].mxu1 }
 0x177   :  { %v1005_v38 = vpop.f32.mrb[51].mxu0  ;;  %v1292_v52 = vpop.f32.mrb[51].mxu1  ;;  %v1686_v62 = vadd.f32 %v1685_v30, %v1684_v51 }
 0x178   :  { %5302 = vst [vmem:[#allocation15_spill] sm:$0xff] %v3788_v37  ;;  %v3802_v22 = vadd.f32 %v1292_v52, %v1003_v1  ;;  %v1488_v52 = vsel %vm1448_vm1, %v3773_v32, 0.0 }
 0x17a   :  { %5303 = vst [vmem:[#allocation16_spill] sm:$0xff] %v3802_v22 }
 0x17c   :  { %v1008_v36 = vpop.f32.mrb[52].mxu0  ;;  %v2836_v15 = vpop.f32.mrb[52].mxu1 }
 0x17d   :  { %v3815_v40 = vadd.f32 %v2832_v63, %v1008_v36  ;;  %v1010_v1 = vpop.f32.mrb[53].mxu0  ;;  %v1305_v14 = vpop.f32.mrb[53].mxu1  ;;  %v1603_v63 = vmul.f32 %v3780_v3, %v3780_v3  ;;  %v1489_v36 = vadd.f32 %v1488_v52, %v1487_v41  ;;  %v1604_v41 = vmul.f32 %v3771_v19, %v3771_v19 }
 0x17e   :  { %v1011_v45 = vpop.f32.mrb[54].mxu0  ;;  %v2837_v38 = vpop.f32.mrb[54].mxu1 }
 0x17f   :  { %5304 = vst [vmem:[#allocation17_spill] sm:$0xff] %v3815_v40  ;;  %v3820_v55 = vadd.f32 %v2833_v43, %v1011_v45  ;;  %v1013_v59 = vpop.f32.mrb[55].mxu0  ;;  %v1308_v53 = vpop.f32.mrb[55].mxu1  ;;  %v1687_v32 = vsel %vm1448_vm1, %v1603_v63, 0.0  ;;  %v1491_v25 = vadd.f32 %v1490_v10, %v1489_v36  ;;  %v1605_v36 = vmul.f32 %v3778_v48, %v3778_v48 }
 0x180   :  { %v1688_v30 = vadd.f32 %v1687_v32, %v1686_v62 }
 0x181   :  { %5305 = vst [vmem:[#allocation18_spill] sm:$0xff] %v3820_v55  ;;  %v1493_v63 = vadd.f32 %v1492_v9, %v1491_v25 }
 0x184   :  { %v1016_v1 = vpop.f32.mrb[56].mxu0  ;;  %v3827_v20 = vpop.f32.mrb[56].mxu1 }
 0x185   :  { %v3830_v43 = vadd.f32 %v1305_v14, %v1016_v1  ;;  %v1018_v45 = vpop.f32.mrb[57].mxu0  ;;  %v1321_v59 = vpop.f32.mrb[57].mxu1  ;;  %v1689_v14 = vsel %vm1448_vm1, %v1604_v41, 0.0 }
 0x186   :  { %v1019_v49 = vpop.f32.mrb[58].mxu0  ;;  %v3832_v6 = vpop.f32.mrb[58].mxu1  ;;  %v1690_v10 = vadd.f32 %v1689_v14, %v1688_v30  ;;  %v1691_v30 = vsel %vm1448_vm1, %v1605_v36, 0.0  ;;  %v1496_v14 = vsel %vm1448_vm1, %v3788_v37, 0.0  ;;  %v1608_v36 = vmul.f32 %v3815_v40, %v3815_v40 }
 0x187   :  { %5306 = vst [vmem:[#allocation19_spill] sm:$0xff] %v3830_v43  ;;  %v3836_v52 = vadd.f32 %v1308_v53, %v1019_v49  ;;  %v1021_v3 = vpop.f32.mrb[59].mxu0  ;;  %v1324_v51 = vpop.f32.mrb[59].mxu1  ;;  %v1494_v53 = vsel %vm1448_vm1, %v3778_v48, 0.0 }
 0x188   :  { %v1606_v3 = vmul.f32 %v3788_v37, %v3788_v37  ;;  %v1495_v9 = vadd.f32 %v1494_v53, %v1493_v63  ;;  %v1692_v28 = vadd.f32 %v1691_v30, %v1690_v10  ;;  %v1498_v53 = vsel %vm1448_vm1, %v3802_v22, 0.0 }
 0x189   :  { %5307 = vst [vmem:[#allocation20_spill] sm:$0xff] %v3836_v52  ;;  %v1500_v10 = vsel %vm1448_vm1, %v3815_v40, 0.0  ;;  %v1697_v11 = vsel %vm1448_vm1, %v1608_v36, 0.0  ;;  %v1504_v36 = vsel %vm1448_vm1, %v3830_v43, 0.0 }
 0x18a   :  { %v1497_v63 = vadd.f32 %v1496_v14, %v1495_v9 }
 0x18c   :  { %v1024_v1 = vpop.f32.mrb[60].mxu0  ;;  %v3843_v45 = vpop.f32.mrb[60].mxu1  ;;  %v1499_v9 = vadd.f32 %v1498_v53, %v1497_v63  ;;  %v1610_v63 = vmul.f32 %v3830_v43, %v3830_v43 }
 0x18d   :  { %v3849_v32 = vadd.f32 %v2836_v15, %v1024_v1  ;;  %v1026_v62 = vpop.f32.mrb[61].mxu0  ;;  %v3851_v49 = vpop.f32.mrb[61].mxu1  ;;  %v1693_v15 = vsel %vm1448_vm1, %v1606_v3, 0.0  ;;  %v1607_v1 = vmul.f32 %v3802_v22, %v3802_v22 }
 0x18e   :  { %v1027_v25 = vpop.f32.mrb[62].mxu0  ;;  %v3853_v41 = vpop.f32.mrb[62].mxu1  ;;  %v1694_v62 = vadd.f32 %v1693_v15, %v1692_v28  ;;  %v1609_v28 = vmul.f32 %v3820_v55, %v3820_v55 }
 0x18f   :  { %5308 = vst [vmem:[#allocation21_spill] sm:$0xff] %v3849_v32  ;;  %v3858_v19 = vadd.f32 %v2837_v38, %v1027_v25  ;;  %v1029_v48 = vpop.f32.mrb[63].mxu0  ;;  %v3860_v61 = vpop.f32.mrb[63].mxu1 }
 0x190   :  { %v1695_v48 = vsel %vm1448_vm1, %v1607_v1, 0.0 }
 0x191   :  { %5309 = vst [vmem:[#allocation22_spill] sm:$0xff] %v3858_v19  ;;  %v1696_v40 = vadd.f32 %v1695_v48, %v1694_v62  ;;  %v1611_v62 = vmul.f32 %v3836_v52, %v3836_v52 }
 0x193   :  { %v1698_v53 = vadd.f32 %v1697_v11, %v1696_v40 }
 0x194   :  { %v1032_v37 = vpop.f32.mrb[64].mxu0  ;;  %v3869_v38 = vpop.f32.mrb[64].mxu1 }
 0x195   :  { %v3874_v3 = vadd.f32 %v1321_v59, %v1032_v37  ;;  %v1034_v25 = vpop.f32.mrb[65].mxu0  ;;  %v3876_v30 = vpop.f32.mrb[65].mxu1  ;;  %v1501_v37 = vadd.f32 %v1500_v10, %v1499_v9  ;;  %v1502_v59 = vsel %vm1448_vm1, %v3820_v55, 0.0 }
 0x196   :  { %v1035_v14 = vpop.f32.mrb[66].mxu0  ;;  %v3878_v22 = vpop.f32.mrb[66].mxu1  ;;  %v1699_v25 = vsel %vm1448_vm1, %v1609_v28, 0.0 }
 0x197   :  { %5310 = vst [vmem:[#allocation23_spill] sm:$0xff] %v3874_v3  ;;  %v3883_v15 = vadd.f32 %v1324_v51, %v1035_v14  ;;  %v1037_v1 = vpop.f32.mrb[67].mxu0  ;;  %v3885_v34 = vpop.f32.mrb[67].mxu1  ;;  %v1503_v2 = vadd.f32 %v1502_v59, %v1501_v37  ;;  %v1700_v11 = vadd.f32 %v1699_v25, %v1698_v53  ;;  %v1506_v37 = vsel %vm1448_vm1, %v3836_v52, 0.0 }
 0x198   :  { %v1701_v1 = vsel %vm1448_vm1, %v1610_v63, 0.0  ;;  %v1612_v59 = vmul.f32 %v3849_v32, %v3849_v32 }
 0x199   :  { %5311 = vst [vmem:[#allocation24_spill] sm:$0xff] %v3883_v15  ;;  %v1505_v40 = vadd.f32 %v1504_v36, %v1503_v2  ;;  %v1508_v2 = vsel %vm1448_vm1, %v3849_v32, 0.0  ;;  %v1613_v36 = vmul.f32 %v3858_v19, %v3858_v19 }
 0x19a   :  { %v1705_v25 = vsel %vm1448_vm1, %v1612_v59, 0.0 }
 0x19b   :  { %v1507_v53 = vadd.f32 %v1506_v37, %v1505_v40 }
 0x19c   :  { %v1040_v51 = vpop.f32.mrb[68].mxu0  ;;  %v3894_v14 = vpop.f32.mrb[68].mxu1 }
 0x19d   :  { %v3900_v48 = vadd.f32 %v3827_v20, %v1040_v51  ;;  %v1042_v10 = vpop.f32.mrb[69].mxu0  ;;  %v3902_v9 = vpop.f32.mrb[69].mxu1  ;;  %v1702_v51 = vadd.f32 %v1701_v1, %v1700_v11  ;;  %v1509_v42 = vadd.f32 %v1508_v2, %v1507_v53  ;;  %v1614_v1 = vmul.f32 %v3874_v3, %v3874_v3 }
 0x19e   :  { %v1043_v28 = vpop.f32.mrb[70].mxu0  ;;  %v3904_v55 = vpop.f32.mrb[70].mxu1  ;;  %v1703_v10 = vsel %vm1448_vm1, %v1611_v62, 0.0 }
 0x19f   :  { %5312 = vst [vmem:[#allocation25_spill] sm:$0xff] %v3900_v48  ;;  %v3911_v63 = vadd.f32 %v3832_v6, %v1043_v28  ;;  %v1045_v43 = vpop.f32.mrb[71].mxu0  ;;  %v3913_v20 = vpop.f32.mrb[71].mxu1  ;;  %v1704_v52 = vadd.f32 %v1703_v10, %v1702_v51  ;;  %v1707_v51 = vsel %vm1448_vm1, %v1613_v36, 0.0  ;;  %v1512_v10 = vsel %vm1448_vm1, %v3874_v3, 0.0 }
 0x1a0   :  { %v1510_v43 = vsel %vm1448_vm1, %v3858_v19, 0.0  ;;  %v1514_v36 = vsel %vm1448_vm1, %v3883_v15, 0.0  ;;  %v1616_v3 = vmul.f32 %v3900_v48, %v3900_v48 }
 0x1a1   :  { %v1706_v28 = vadd.f32 %v1705_v25, %v1704_v52  ;;  %v1615_v52 = vmul.f32 %v3883_v15, %v3883_v15 }
 0x1a2   :  { %v1713_v15 = vsel %vm1448_vm1, %v1616_v3, 0.0 }
 0x1a3   :  { %v1708_v25 = vadd.f32 %v1707_v51, %v1706_v28 }
 0x1a4   :  { %v1048_v13 = vpop.f32.mrb[72].mxu0  ;;  %v3921_v6 = vpop.f32.mrb[72].mxu1 }
 0x1a5   :  { %v3928_v62 = vadd.f32 %v3851_v49, %v1048_v13  ;;  %v1050_v11 = vpop.f32.mrb[73].mxu0  ;;  %v3930_v40 = vpop.f32.mrb[73].mxu1  ;;  %v1511_v13 = vadd.f32 %v1510_v43, %v1509_v42  ;;  %v1709_v49 = vsel %vm1448_vm1, %v1614_v1, 0.0  ;;  %v1516_v42 = vsel %vm1448_vm1, %v3900_v48, 0.0 }
 0x1a6   :  { %v1051_v37 = vpop.f32.mrb[74].mxu0  ;;  %v3932_v59 = vpop.f32.mrb[74].mxu1  ;;  %v1710_v32 = vadd.f32 %v1709_v49, %v1708_v25 }
 0x1a7   :  { %v3938_v2 = vadd.f32 %v3860_v61, %v1051_v37  ;;  %v1053_v53 = vpop.f32.mrb[75].mxu0  ;;  %v3940_v19 = vpop.f32.mrb[75].mxu1  ;;  %v1513_v11 = vadd.f32 %v1512_v10, %v1511_v13 }
 0x1a8   :  { %v1711_v53 = vsel %vm1448_vm1, %v1615_v52, 0.0  ;;  %v1617_v52 = vmul.f32 %v3911_v63, %v3911_v63 }
 0x1a9   :  { %v1515_v10 = vadd.f32 %v1514_v36, %v1513_v11  ;;  %v1518_v11 = vsel %vm1448_vm1, %v3911_v63, 0.0 }
 0x1ac   :  { %v1056_v61 = vpop.f32.mrb[76].mxu0  ;;  %v2860_v37 = vpop.f32.mrb[76].mxu1 }
 0x1ad   :  { %v3953_v43 = vadd.f32 %v3843_v45, %v1056_v61  ;;  %v3956_v1 = vadd.f32 %v2860_v37, %v3571_v0  ;;  %v1058_v28 = vpop.f32.mrb[77].mxu0  ;;  %v1401_v51 = vpop.f32.mrb[77].mxu1  ;;  %v1712_v45 = vadd.f32 %v1711_v53, %v1710_v32  ;;  %v1517_v61 = vadd.f32 %v1516_v42, %v1515_v10 }
 0x1ae   :  { %v3959_v13 = vadd.f32 %v1401_v51, %v3567_v56  ;;  %v1059_v49 = vpop.f32.mrb[78].mxu0  ;;  %v2861_v25 = vpop.f32.mrb[78].mxu1  ;;  %v1618_v56 = vmul.f32 %v3928_v62, %v3928_v62  ;;  %v1520_v32 = vsel %vm1448_vm1, %v3928_v62, 0.0  ;;  %v1619_v51 = vmul.f32 %v3938_v2, %v3938_v2 }
 0x1af   :  { %v1061_v48 = vpop.f32.mrb[79].mxu0  ;;  %v1404_v33 = vpop.f32.mrb[79].mxu1  ;;  %v3965_v0 = vadd.f32 %v3853_v41, %v1059_v49  ;;  %v3972_v36 = vadd.f32 %v2861_v25, %v3573_v4  ;;  %v1714_v37 = vadd.f32 %v1713_v15, %v1712_v45  ;;  %v1519_v41 = vadd.f32 %v1518_v11, %v1517_v61 }
 0x1b0   :  { %v3975_v3 = vadd.f32 %v1404_v33, %v3569_v60  ;;  %v1715_v48 = vsel %vm1448_vm1, %v1617_v52, 0.0  ;;  %v1717_v28 = vsel %vm1448_vm1, %v1618_v56, 0.0  ;;  %v1522_v61 = vsel %vm1448_vm1, %v3938_v2, 0.0 }
 0x1b1   :  { %v1716_v10 = vadd.f32 %v1715_v48, %v1714_v37  ;;  %v1521_v49 = vadd.f32 %v1520_v32, %v1519_v41  ;;  %v1620_v11 = vmul.f32 %v3953_v43, %v3953_v43  ;;  %v1719_v37 = vsel %vm1448_vm1, %v1619_v51, 0.0 }
 0x1b2   :  { %v1526_v51 = vsel %vm1448_vm1, %v3965_v0, 0.0 }
 0x1b3   :  { %v1523_v41 = vadd.f32 %v1522_v61, %v1521_v49 }
 0x1b4   :  { %v1064_v53 = vpop.f32.mrb[80].mxu0  ;;  %v2864_v42 = vpop.f32.mrb[80].mxu1 }
 0x1b5   :  { %v3984_v4 = vadd.f32 %v3876_v30, %v1064_v53  ;;  %v3987_v60 = vadd.f32 %v2864_v42, %v3583_v16  ;;  %v1066_v33 = vpop.f32.mrb[81].mxu0  ;;  %v1417_v15 = vpop.f32.mrb[81].mxu1  ;;  %v1718_v53 = vadd.f32 %v1717_v28, %v1716_v10  ;;  %v1721_v42 = vsel %vm1448_vm1, %v1620_v11, 0.0 }
 0x1b6   :  { %v3990_v25 = vadd.f32 %v1417_v15, %v3577_v8  ;;  %v1067_v52 = vpop.f32.mrb[82].mxu0  ;;  %v2865_v45 = vpop.f32.mrb[82].mxu1  ;;  %v1524_v8 = vsel %vm1448_vm1, %v3953_v43, 0.0  ;;  %v1621_v28 = vmul.f32 %v3965_v0, %v3965_v0 }
 0x1b7   :  { %v1069_v30 = vpop.f32.mrb[83].mxu0  ;;  %v1420_v56 = vpop.f32.mrb[83].mxu1  ;;  %v3997_v16 = vadd.f32 %v3885_v34, %v1067_v52  ;;  %v4003_v48 = vadd.f32 %v2865_v45, %v3595_v23  ;;  %v1720_v33 = vadd.f32 %v1719_v37, %v1718_v53  ;;  %v1525_v34 = vadd.f32 %v1524_v8, %v1523_v41 }
 0x1b8   :  { %v4006_v32 = vadd.f32 %v1420_v56, %v3581_v12  ;;  %v1622_v23 = vmul.f32 %v3984_v4, %v3984_v4  ;;  %v1723_v53 = vsel %vm1448_vm1, %v1621_v28, 0.0  ;;  %v1528_v37 = vsel %vm1448_vm1, %v3984_v4, 0.0 }
 0x1b9   :  { %v1722_v61 = vadd.f32 %v1721_v42, %v1720_v33  ;;  %v1623_v42 = vmul.f32 %v3997_v16, %v3997_v16 }
 0x1bb   :  { %v1724_v28 = vadd.f32 %v1723_v53, %v1722_v61 }
 0x1bc   :  { %v1072_v15 = vpop.f32.mrb[84].mxu0  ;;  %v2868_v10 = vpop.f32.mrb[84].mxu1 }
 0x1bd   :  { %v4016_v52 = vadd.f32 %v3869_v38, %v1072_v15  ;;  %v4019_v12 = vadd.f32 %v2868_v10, %v3609_v35  ;;  %v1074_v49 = vpop.f32.mrb[85].mxu0  ;;  %v1433_v45 = vpop.f32.mrb[85].mxu1  ;;  %v1527_v38 = vadd.f32 %v1526_v51, %v1525_v34  ;;  %v1725_v35 = vsel %vm1448_vm1, %v1622_v23, 0.0 }
 0x1be   :  { %v4022_v11 = vadd.f32 %v1433_v45, %v3601_v27  ;;  %v1075_v30 = vpop.f32.mrb[86].mxu0  ;;  %v2869_v56 = vpop.f32.mrb[86].mxu1  ;;  %v1530_v49 = vsel %vm1448_vm1, %v3997_v16, 0.0  ;;  %v1726_v34 = vadd.f32 %v1725_v35, %v1724_v28  ;;  %v1727_v23 = vsel %vm1448_vm1, %v1623_v42, 0.0 }
 0x1bf   :  { %v1077_v8 = vpop.f32.mrb[87].mxu0  ;;  %v1436_v41 = vpop.f32.mrb[87].mxu1  ;;  %v4028_v15 = vadd.f32 %v3878_v22, %v1075_v30  ;;  %v4034_v27 = vadd.f32 %v2869_v56, %v3613_v39  ;;  %v1529_v10 = vadd.f32 %v1528_v37, %v1527_v38  ;;  %v1624_v22 = vmul.f32 %v4016_v52, %v4016_v52 }
 0x1c0   :  { %v4037_v33 = vadd.f32 %v1436_v41, %v3605_v31  ;;  %v1532_v45 = vsel %vm1448_vm1, %v4016_v52, 0.0  ;;  %v1728_v41 = vadd.f32 %v1727_v23, %v1726_v34 }
 0x1c1   :  { %v1531_v30 = vadd.f32 %v1530_v49, %v1529_v10  ;;  %v1729_v56 = vsel %vm1448_vm1, %v1624_v22, 0.0  ;;  %v1625_v53 = vmul.f32 %v4028_v15, %v4028_v15  ;;  %v1534_v35 = vsel %vm1448_vm1, %v4028_v15, 0.0 }
 0x1c2   :  { %v1730_v42 = vadd.f32 %v1729_v56, %v1728_v41 }
 0x1c3   :  { %v1533_v38 = vadd.f32 %v1532_v45, %v1531_v30  ;;  %v1731_v28 = vsel %vm1448_vm1, %v1625_v53, 0.0 }
 0x1c4   :  { %v1080_v51 = vpop.f32.mrb[88].mxu0  ;;  %v1732_v45 = vadd.f32 %v1731_v28, %v1730_v42 }
 0x1c5   :  { %v4047_v39 = vadd.f32 %v3902_v9, %v1080_v51  ;;  %v1082_v31 = vpop.f32.mrb[89].mxu0  ;;  %v1535_v49 = vadd.f32 %v1534_v35, %v1533_v38 }
 0x1c6   :  { %v1083_v61 = vpop.f32.mrb[90].mxu0 }
 0x1c7   :  { %v4053_v37 = vadd.f32 %v3913_v20, %v1083_v61  ;;  %v1085_v8 = vpop.f32.mrb[91].mxu0  ;;  %v1626_v9 = vmul.f32 %v4047_v39, %v4047_v39  ;;  %v1536_v10 = vsel %vm1448_vm1, %v4047_v39, 0.0 }
 0x1c8   :  { %v1537_v31 = vadd.f32 %v1536_v10, %v1535_v49 }
 0x1c9   :  { %v1733_v20 = vsel %vm1448_vm1, %v1626_v9, 0.0  ;;  %v1627_v34 = vmul.f32 %v4053_v37, %v4053_v37  ;;  %v1538_v61 = vsel %vm1448_vm1, %v4053_v37, 0.0 }
 0x1ca   :  { %v1734_v41 = vadd.f32 %v1733_v20, %v1732_v45  ;;  %v1539_v35 = vadd.f32 %v1538_v61, %v1537_v31 }
 0x1cb   :  { %v1735_v38 = vsel %vm1448_vm1, %v1627_v34, 0.0 }
 0x1cc   :  { %v1088_v22 = vpop.f32.mrb[92].mxu0  ;;  %v1736_v28 = vadd.f32 %v1735_v38, %v1734_v41 }
 0x1cd   :  { %v4066_v51 = vadd.f32 %v3894_v14, %v1088_v22  ;;  %v1090_v23 = vpop.f32.mrb[93].mxu0 }
 0x1ce   :  { %v1091_v30 = vpop.f32.mrb[94].mxu0 }
 0x1cf   :  { %v1628_v56 = vmul.f32 %v4066_v51, %v4066_v51  ;;  %v4073_v53 = vadd.f32 %v3904_v55, %v1091_v30  ;;  %v1093_v8 = vpop.f32.mrb[95].mxu0  ;;  %v1540_v14 = vsel %vm1448_vm1, %v4066_v51, 0.0 }
 0x1d0   :  { %v1541_v10 = vadd.f32 %v1540_v14, %v1539_v35 }
 0x1d1   :  { %v1737_v9 = vsel %vm1448_vm1, %v1628_v56, 0.0  ;;  %v1629_v42 = vmul.f32 %v4073_v53, %v4073_v53  ;;  %v1542_v55 = vsel %vm1448_vm1, %v4073_v53, 0.0 }
 0x1d2   :  { %v1738_v34 = vadd.f32 %v1737_v9, %v1736_v28  ;;  %v1543_v8 = vadd.f32 %v1542_v55, %v1541_v10 }
 0x1d3   :  { %v1739_v45 = vsel %vm1448_vm1, %v1629_v42, 0.0 }
 0x1d4   :  { %v1096_v49 = vpop.f32.mrb[96].mxu0  ;;  %v1740_v38 = vadd.f32 %v1739_v45, %v1738_v34 }
 0x1d5   :  { %v4084_v22 = vadd.f32 %v3930_v40, %v1096_v49  ;;  %v1098_v20 = vpop.f32.mrb[97].mxu0 }
 0x1d6   :  { %v1099_v23 = vpop.f32.mrb[98].mxu0 }
 0x1d7   :  { %v1544_v31 = vsel %vm1448_vm1, %v4084_v22, 0.0  ;;  %v1630_v30 = vmul.f32 %v4084_v22, %v4084_v22  ;;  %v4092_v61 = vadd.f32 %v3940_v19, %v1099_v23  ;;  %v1101_v56 = vpop.f32.mrb[99].mxu0 }
 0x1d8   :  { %v1545_v14 = vadd.f32 %v1544_v31, %v1543_v8  ;;  %v1634_v56 = vmul.f32 %v3959_v13, %v3959_v13 }
 0x1d9   :  { %v1741_v41 = vsel %vm1448_vm1, %v1630_v30, 0.0  ;;  %v1631_v40 = vmul.f32 %v4092_v61, %v4092_v61  ;;  %v1546_v35 = vsel %vm1448_vm1, %v4092_v61, 0.0 }
 0x1da   :  { %v1742_v9 = vadd.f32 %v1741_v41, %v1740_v38  ;;  %v1547_v20 = vadd.f32 %v1546_v35, %v1545_v14  ;;  %v1635_v14 = vmul.f32 %v3975_v3, %v3975_v3 }
 0x1db   :  { %v1743_v28 = vsel %vm1448_vm1, %v1631_v40, 0.0 }
 0x1dc   :  { %v1104_v42 = vpop.f32.mrb[100].mxu0  ;;  %v1744_v31 = vadd.f32 %v1743_v28, %v1742_v9  ;;  %v1636_v28 = vmul.f32 %v3956_v1, %v3956_v1 }
 0x1dd   :  { %v4101_v49 = vadd.f32 %v3921_v6, %v1104_v42  ;;  %v1106_v19 = vpop.f32.mrb[101].mxu0 }
 0x1de   :  { %v1107_v10 = vpop.f32.mrb[102].mxu0  ;;  %v1749_v19 = vsel %vm1448_vm1, %v1634_v56, 0.0  ;;  %v1558_v56 = vsel %vm1448_vm1, %v3972_v36, 0.0 }
 0x1df   :  { %v1548_v55 = vsel %vm1448_vm1, %v4101_v49, 0.0  ;;  %v1632_v34 = vmul.f32 %v4101_v49, %v4101_v49  ;;  %v4108_v23 = vadd.f32 %v3932_v59, %v1107_v10  ;;  %v1109_v45 = vpop.f32.mrb[103].mxu0  ;;  %v1552_v59 = vsel %vm1448_vm1, %v3959_v13, 0.0 }
 0x1e0   :  { %v1549_v30 = vadd.f32 %v1548_v55, %v1547_v20  ;;  %v1554_v20 = vsel %vm1448_vm1, %v3975_v3, 0.0  ;;  %v1637_v45 = vmul.f32 %v3972_v36, %v3972_v36 }
 0x1e1   :  { %v1745_v6 = vsel %vm1448_vm1, %v1632_v34, 0.0  ;;  %v1550_v8 = vsel %vm1448_vm1, %v4108_v23, 0.0  ;;  %v1633_v41 = vmul.f32 %v4108_v23, %v4108_v23  ;;  %v1556_v34 = vsel %vm1448_vm1, %v3956_v1, 0.0 }
 0x1e2   :  { %v1746_v40 = vadd.f32 %v1745_v6, %v1744_v31  ;;  %v1551_v38 = vadd.f32 %v1550_v8, %v1549_v30  ;;  %v1751_v31 = vsel %vm1448_vm1, %v1635_v14, 0.0  ;;  %v1753_v8 = vsel %vm1448_vm1, %v1636_v28, 0.0 }
 0x1e3   :  { %v1747_v35 = vsel %vm1448_vm1, %v1633_v41, 0.0  ;;  %v1638_v41 = vmul.f32 %v3990_v25, %v3990_v25  ;;  %v1639_v14 = vmul.f32 %v4006_v32, %v4006_v32  ;;  %v1640_v28 = vmul.f32 %v3987_v60, %v3987_v60 }
 0x1e4   :  { %v1553_v9 = vadd.f32 %v1552_v59, %v1551_v38  ;;  %v1748_v42 = vadd.f32 %v1747_v35, %v1746_v40  ;;  %v1755_v59 = vsel %vm1448_vm1, %v1637_v45, 0.0  ;;  %v1560_v35 = vsel %vm1448_vm1, %v3990_v25, 0.0 }
 0x1e5   :  { %v1641_v45 = vmul.f32 %v4003_v48, %v4003_v48 }
 0x1e6   :  { %v1555_v10 = vadd.f32 %v1554_v20, %v1553_v9  ;;  %v1750_v55 = vadd.f32 %v1749_v19, %v1748_v42  ;;  %v1757_v19 = vsel %vm1448_vm1, %v1638_v41, 0.0  ;;  %v1562_v20 = vsel %vm1448_vm1, %v4006_v32, 0.0 }
 0x1e7   :  { %v1642_v41 = vmul.f32 %v4022_v11, %v4022_v11 }
 0x1e8   :  { %v1557_v30 = vadd.f32 %v1556_v34, %v1555_v10  ;;  %v1752_v6 = vadd.f32 %v1751_v31, %v1750_v55  ;;  %v1564_v34 = vsel %vm1448_vm1, %v3987_v60, 0.0  ;;  %v1759_v31 = vsel %vm1448_vm1, %v1639_v14, 0.0 }
 0x1e9   :  { %v1643_v14 = vmul.f32 %v4037_v33, %v4037_v33 }
 0x1ea   :  { %v1559_v40 = vadd.f32 %v1558_v56, %v1557_v30  ;;  %v1754_v38 = vadd.f32 %v1753_v8, %v1752_v6  ;;  %v1761_v8 = vsel %vm1448_vm1, %v1640_v28, 0.0  ;;  %v1566_v56 = vsel %vm1448_vm1, %v4003_v48, 0.0 }
 0x1eb   :  { %v1644_v28 = vmul.f32 %v4019_v12, %v4019_v12 }
 0x1ec   :  { %v1561_v9 = vadd.f32 %v1560_v35, %v1559_v40  ;;  %v1756_v42 = vadd.f32 %v1755_v59, %v1754_v38  ;;  %v1763_v59 = vsel %vm1448_vm1, %v1641_v45, 0.0  ;;  %v1568_v35 = vsel %vm1448_vm1, %v4022_v11, 0.0 }
 0x1ed   :  { %v1767_v45 = vsel %vm1448_vm1, %v1643_v14, 0.0 }
 0x1ee   :  { %v1563_v10 = vadd.f32 %v1562_v20, %v1561_v9  ;;  %v1758_v55 = vadd.f32 %v1757_v19, %v1756_v42  ;;  %v1765_v19 = vsel %vm1448_vm1, %v1642_v41, 0.0  ;;  %v1570_v20 = vsel %vm1448_vm1, %v4037_v33, 0.0 }
 0x1f0   :  { %v1565_v30 = vadd.f32 %v1564_v34, %v1563_v10  ;;  %v1760_v6 = vadd.f32 %v1759_v31, %v1758_v55  ;;  %v1572_v34 = vsel %vm1448_vm1, %v4019_v12, 0.0 }
 0x1f2   :  { %v1567_v40 = vadd.f32 %v1566_v56, %v1565_v30  ;;  %v1762_v38 = vadd.f32 %v1761_v8, %v1760_v6  ;;  %v1769_v6 = vsel %vm1448_vm1, %v1644_v28, 0.0  ;;  %v1574_v8 = vsel %vm1448_vm1, %v4034_v27, 0.0 }
 0x1f3   :  { %v1645_v56 = vmul.f32 %v4034_v27, %v4034_v27  ;;  %v5313_v28 = vmov 0.0  }
 0x1f4   :  { %v1569_v9 = vadd.f32 %v1568_v35, %v1567_v40  ;;  %v1764_v42 = vadd.f32 %v1763_v59, %v1762_v38 }
 0x1f5   :  { %v1771_v59 = vsel %vm1448_vm1, %v1645_v56, 0.0 }
 0x1f6   :  { %v1571_v10 = vadd.f32 %v1570_v20, %v1569_v9  ;;  %v1766_v55 = vadd.f32 %v1765_v19, %v1764_v42 }
 0x1f8   :  { %v1573_v31 = vadd.f32 %v1572_v34, %v1571_v10  ;;  %v1768_v30 = vadd.f32 %v1767_v45, %v1766_v55  ;;  %v5314_v34 = vmov 0.0|0.0  }
 0x1fa   :  { %v1575_v41 = vadd.f32 %v1574_v8, %v1573_v31  ;;  %v1770_v40 = vadd.f32 %v1769_v6, %v1768_v30 }
 0x1fc   :  { %v1576_v38 = vrot.slane %v1575_v41, 4  ;;  %v1772_v9 = vadd.f32 %v1771_v59, %v1770_v40 }
 0x1fe   :  { %v1577_v35 = vadd.f32 %v1576_v38, %v1575_v41  ;;  %v1773_v14 = vrot.slane %v1772_v9, 4 }
 0x200   :  { %v1578_v42 = vrot.slane %v1577_v35, 2  ;;  %v1774_v55 = vadd.f32 %v1773_v14, %v1772_v9 }
 0x202   :  { %v1579_v19 = vadd.f32 %v1578_v42, %v1577_v35  ;;  %v1775_v45 = vrot.slane %v1774_v55, 2 }
 0x204   :  { %v1580_v20 = vrot.slane %v1579_v19, 1  ;;  %v1776_v31 = vadd.f32 %v1775_v45, %v1774_v55 }
 0x206   :  { %v1581_v10 = vadd.f32 %v1580_v20, %v1579_v19  ;;  %v1777_v30 = vrot.slane %v1776_v31, 1 }
 0x208   :  { %2887 = vmatmul.mubr.msk.f32.vlgmr.msra.gmra.mrb[88].mxu1 %vm1448_vm1, %v1581_v10  ;;  %v1778_v6 = vadd.f32 %v1777_v30, %v1776_v31  ;;  %v4196_v10 = vld [vmem:[%s5238_s4] sm:$0x1] }
 0x209   :  { %2922 = vmatpush3.bf16.msra.mxu1 %v3563_v54  ;;  %2905 = vmatprep.mubr.msk.f32.mxu1 %vm3118_vm2, %v5313_v28 }
 0x20a   :  { %2923 = vmatprep.subr.bf16.mxu1 %v5314_v34 }
 0x20d   :  { %2925 = vmatpush3.bf16.msra.mxu1 %v3591_v21 }
 0x20e   :  { %2926 = vmatprep.subr.bf16.mxu1 %v5314_v34 }
 0x211   :  { %2928 = vmatpush3.bf16.msra.mxu1 %v3653_v24  ;;  %v1946_v24 = vlaneseq }
 0x212   :  { %2929 = vmatprep.subr.bf16.mxu1 %v5314_v34 }
 0x213   :  { %v4187_v42 = vshrl.u32 %v1946_v24, 7  ;;  %v5322_v24 = vld [vmem:[#allocation7_spill] sm:$0xff] }
 0x215   :  { %2931 = vmatpush3.bf16.msra.mxu1 %v3798_v57  ;;  %v1938_v57 = vld [vmem:[%s5237_s3] sm:$0x1]  ;;  %v5267_v19 = vsub.s32 0, %v4187_v42 }
 0x218   :  { %2906 = vmatmul.mubr.msk.f32.vlgmr.msra.gmra.mrb[90].mxu1 %vm1448_vm1, %v1778_v6 }
 0x2db   :  { %v1856_v54 = vpop.f32.mrb[88].mxu1 }
 0x2dc   :  { %v2888_v8 = vpop.f32.mrb[89].mxu1  ;;  %v1860_v56 = vmul.f32 0.00048828125, %v1856_v54 }
 0x2dd   :  { %v5315_v8 = vld [vmem:[#allocation2_spill] sm:$0xff] }
 0x2de   :  { %v1935_v40 = vmul.f32 %v1860_v56, %v1860_v56 }
 0x2eb   :  { %v1930_v41 = vpop.f32.mrb[90].mxu1 }
 0x2ec   :  { %v1934_v38 = vmul.f32 0.00048828125, %v1930_v41  ;;  %v2907_v21 = vpop.f32.mrb[91].mxu1  ;;  %v5317_v41 = vld [vmem:[#allocation6_spill] sm:$0xff] }
 0x2ed   :  { %v5320_v21 = vld [vmem:[#allocation8_spill] sm:$0xff] }
 0x2ee   :  { %v1936_v59 = vsub.f32 %v1934_v38, %v1935_v40  ;;  %v5318_v40 = vld [vmem:[#allocation3_spill] sm:$0xff]  ;;  %v5319_v38 = vld [vmem:[#allocation5_spill] sm:$0xff] }
 0x2f0   :  { %v1937_v35 = vmax.f32 %v1936_v59, 0.0 }
 0x2f2   :  { %v1939_v9 = vadd.f32 1e-05, %v1937_v35  ;;  %v5321_v35 = vld [vmem:[#allocation10_spill] sm:$0xff] }
 0x2f4   :  { %3114 = vrsqrt.f32 %v1939_v9 }
 0x2fe   :  { %v3115_v14 = vpop.eup %3114 }
 0x2ff   :  { %v1941_v20 = vmul.f32 %v3115_v14, %v1938_v57  ;;  %v5323_v14 = vld [vmem:[#allocation9_spill] sm:$0xff] }
 0x301   :  { %v4198_v55 = vmul.f32 %v1941_v20, %v1860_v56  ;;  %v4202_v28 = vrot.slane %v1941_v20, %v5267_v19  ;;  %v5316_v56 = vld [vmem:[#allocation4_spill] sm:$0xff]  ;;  %v5335_v19 = vld [vmem:[#allocation17_spill] sm:$0xff] }
 0x303   :  { %v1944_v34 = vsub.f32 %v4196_v10, %v4198_v55  ;;  %v4208_v45 = vmul.f32 %v4202_v28, %v3619_v47  ;;  %v4212_v31 = vmul.f32 %v4202_v28, %v3627_v58  ;;  %v4216_v30 = vmul.f32 %v4202_v28, %v3617_v44  ;;  %v5324_v10 = vld [vmem:[#allocation12_spill] sm:$0xff] }
 0x304   :  { %v4220_v6 = vmul.f32 %v4202_v28, %v3623_v50  ;;  %v4224_v54 = vmul.f32 %v4202_v28, %v3659_v29  ;;  %v4228_v47 = vmul.f32 %v4202_v28, %v3673_v46  ;;  %v4232_v58 = vmul.f32 %v4202_v28, %v3651_v18 }
 0x305   :  { %v4236_v44 = vmul.f32 %v4202_v28, %v3670_v7  ;;  %v4240_v50 = vmul.f32 %v4202_v28, %v3696_v17  ;;  %v4244_v29 = vmul.f32 %v4202_v28, %v3709_v26  ;;  %v4248_v46 = vmul.f32 %v4202_v28, %v3691_v5 }
 0x306   :  { %v4252_v18 = vmul.f32 %v4202_v28, %v5315_v8  ;;  %v4256_v7 = vmul.f32 %v4202_v28, %v5316_v56  ;;  %v4260_v17 = vmul.f32 %v4202_v28, %v5317_v41  ;;  %v4264_v26 = vmul.f32 %v4202_v28, %v5318_v40  ;;  %v5325_v8 = vld [vmem:[#allocation14_spill] sm:$0xff]  ;;  %v5327_v41 = vld [vmem:[#allocation11_spill] sm:$0xff] }
 0x307   :  { %v4268_v5 = vmul.f32 %v4202_v28, %v5319_v38  ;;  %v4272_v59 = vmul.f32 %v4202_v28, %v5320_v21  ;;  %v4276_v9 = vmul.f32 %v4202_v28, %v5321_v35  ;;  %v4280_v57 = vmul.f32 %v4202_v28, %v5322_v24  ;;  %v5329_v38 = vld [vmem:[#allocation13_spill] sm:$0xff]  ;;  %v5331_v35 = vld [vmem:[#allocation15_spill] sm:$0xff] }
 0x308   :  { %v4284_v20 = vmul.f32 %v4202_v28, %v5323_v14  ;;  %v4288_v55 = vmul.f32 %v4202_v28, %v5324_v10  ;;  %v4292_v56 = vmul.f32 %v4202_v28, %v5325_v8  ;;  %v4296_v40 = vmul.f32 %v4202_v28, %v5327_v41  ;;  %v5333_v14 = vld [vmem:[#allocation16_spill] sm:$0xff] }
 0x309   :  { %v4300_v21 = vmul.f32 %v4202_v28, %v5329_v38  ;;  %v4304_v24 = vmul.f32 %v4202_v28, %v5331_v35  ;;  %v4308_v10 = vmul.f32 %v4202_v28, %v5333_v14  ;;  %v4312_v8 = vmul.f32 %v4202_v28, %v5335_v19 }
 0x30a   :  { %5326 = vst [vmem:[#allocation2_spill] sm:$0xff] %v4292_v56  ;;  %5328 = vst [vmem:[#allocation4_spill] sm:$0xff] %v4296_v40  ;;  %v5337_v56 = vld [vmem:[#allocation18_spill] sm:$0xff]  ;;  %v5339_v40 = vld [vmem:[#allocation19_spill] sm:$0xff] }
 0x30b   :  { %5330 = vst [vmem:[#allocation6_spill] sm:$0xff] %v4300_v21  ;;  %5332 = vst [vmem:[#allocation3_spill] sm:$0xff] %v4304_v24  ;;  %v4316_v41 = vmul.f32 %v4202_v28, %v5337_v56  ;;  %v4320_v38 = vmul.f32 %v4202_v28, %v5339_v40  ;;  %v5341_v21 = vld [vmem:[#allocation20_spill] sm:$0xff]  ;;  %v5342_v24 = vld [vmem:[#allocation21_spill] sm:$0xff] }
 0x30c   :  { %5334 = vst [vmem:[#allocation5_spill] sm:$0xff] %v4308_v10  ;;  %5336 = vst [vmem:[#allocation8_spill] sm:$0xff] %v4312_v8  ;;  %v4324_v35 = vmul.f32 %v4202_v28, %v5341_v21  ;;  %v4328_v14 = vmul.f32 %v4202_v28, %v5342_v24  ;;  %v5343_v10 = vld [vmem:[#allocation22_spill] sm:$0xff]  ;;  %v5344_v8 = vld [vmem:[#allocation23_spill] sm:$0xff]  ;;  %v4348_v24 = vmul.f32 %v4202_v28, %v3911_v63 }
 0x30d   :  { %5338 = vst [vmem:[#allocation10_spill] sm:$0xff] %v4316_v41  ;;  %5340 = vst [vmem:[#allocation7_spill] sm:$0xff] %v4320_v38  ;;  %v4332_v19 = vmul.f32 %v4202_v28, %v5343_v10  ;;  %v4336_v56 = vmul.f32 %v4202_v28, %v5344_v8  ;;  %v5345_v41 = vld [vmem:[#allocation24_spill] sm:$0xff]  ;;  %v5346_v38 = vld [vmem:[#allocation25_spill] sm:$0xff]  ;;  %v4352_v10 = vmul.f32 %v4202_v28, %v3928_v62 }
 0x30e   :  { %v4340_v40 = vmul.f32 %v4202_v28, %v5345_v41  ;;  %v4344_v21 = vmul.f32 %v4202_v28, %v5346_v38  ;;  %v4356_v8 = vmul.f32 %v4202_v28, %v3938_v2  ;;  %v4360_v41 = vmul.f32 %v4202_v28, %v3953_v43 }
 0x30f   :  { %v4364_v38 = vmul.f32 %v4202_v28, %v3965_v0  ;;  %v4368_v63 = vmul.f32 %v4202_v28, %v3984_v4  ;;  %v4372_v62 = vmul.f32 %v4202_v28, %v3997_v16  ;;  %v4376_v2 = vmul.f32 %v4202_v28, %v4016_v52 }
 0x310   :  { %v4380_v43 = vmul.f32 %v4202_v28, %v4028_v15  ;;  %v4384_v0 = vmul.f32 %v4202_v28, %v4047_v39  ;;  %v4388_v4 = vmul.f32 %v4202_v28, %v4053_v37  ;;  %v4392_v16 = vmul.f32 %v4202_v28, %v4066_v51 }
 0x311   :  { %v4396_v52 = vmul.f32 %v4202_v28, %v4073_v53  ;;  %v4400_v15 = vmul.f32 %v4202_v28, %v4084_v22  ;;  %v4404_v39 = vmul.f32 %v4202_v28, %v4092_v61  ;;  %v4408_v37 = vmul.f32 %v4202_v28, %v4101_v49 }
 0x312   :  { %v4412_v51 = vmul.f32 %v4202_v28, %v4108_v23  ;;  %v4416_v53 = vmul.f32 %v4202_v28, %v3959_v13  ;;  %v4420_v22 = vmul.f32 %v4202_v28, %v3975_v3  ;;  %v4424_v61 = vmul.f32 %v4202_v28, %v3956_v1 }
 0x313   :  { %v4428_v49 = vmul.f32 %v4202_v28, %v3972_v36  ;;  %v4432_v23 = vmul.f32 %v4202_v28, %v3990_v25  ;;  %v4436_v13 = vmul.f32 %v4202_v28, %v4006_v32  ;;  %v4440_v3 = vmul.f32 %v4202_v28, %v3987_v60 }
 0x314   :  { %5347 = vst [vmem:[#allocation9_spill] sm:$0xff] %v4424_v61  ;;  %v4444_v1 = vmul.f32 %v4202_v28, %v4003_v48  ;;  %v5348_v61 = vsub.s32 0, %v4187_v42  ;;  %v4452_v25 = vmul.f32 %v4202_v28, %v4022_v11  ;;  %v4456_v32 = vmul.f32 %v4202_v28, %v4037_v33 }
 0x315   :  { %v4460_v60 = vmul.f32 %v4202_v28, %v4019_v12  ;;  %v4464_v48 = vmul.f32 %v4202_v28, %v4034_v27 }
 0x316   :  { %v4448_v36 = vrot.slane %v1944_v34, %v5348_v61  ;;  %v5360_v61 = vld [vmem:[#allocation6_spill] sm:$0xff] }
 0x318   :  { %v4468_v42 = vadd.f32 %v4448_v36, %v4208_v45  ;;  %v4472_v11 = vadd.f32 %v4448_v36, %v4212_v31  ;;  %v4476_v33 = vadd.f32 %v4448_v36, %v4216_v30  ;;  %v4480_v12 = vadd.f32 %v4448_v36, %v4220_v6 }
 0x319   :  { %v4484_v27 = vadd.f32 %v4448_v36, %v4224_v54  ;;  %v4488_v28 = vadd.f32 %v4448_v36, %v4228_v47  ;;  %v4492_v34 = vadd.f32 %v4448_v36, %v4232_v58  ;;  %v4496_v45 = vadd.f32 %v4448_v36, %v4236_v44 }
 0x31a   :  { %v4500_v31 = vadd.f32 %v4448_v36, %v4240_v50  ;;  %v4504_v30 = vadd.f32 %v4448_v36, %v4244_v29  ;;  %v4508_v6 = vadd.f32 %v4448_v36, %v4248_v46  ;;  %v4512_v54 = vadd.f32 %v4448_v36, %v4252_v18 }
 0x31b   :  { %v4516_v47 = vadd.f32 %v4448_v36, %v4256_v7  ;;  %v4520_v58 = vadd.f32 %v4448_v36, %v4260_v17  ;;  %v4524_v44 = vadd.f32 %v4448_v36, %v4264_v26  ;;  %v4528_v50 = vadd.f32 %v4448_v36, %v4268_v5  ;;  %v5356_v26 = vld [vmem:[#allocation2_spill] sm:$0xff] }
 0x31c   :  { %5349 = vst [vmem:[#allocation12_spill] sm:$0xff] %v4500_v31  ;;  %5350 = vst [vmem:[#allocation14_spill] sm:$0xff] %v4504_v30  ;;  %v4532_v29 = vadd.f32 %v4448_v36, %v4272_v59  ;;  %v4536_v46 = vadd.f32 %v4448_v36, %v4276_v9  ;;  %v4540_v18 = vadd.f32 %v4448_v36, %v4280_v57  ;;  %v5358_v59 = vld [vmem:[#allocation4_spill] sm:$0xff] }
 0x31d   :  { %5351 = vst [vmem:[#allocation11_spill] sm:$0xff] %v4508_v6  ;;  %5352 = vst [vmem:[#allocation13_spill] sm:$0xff] %v4512_v54  ;;  %v4544_v7 = vadd.f32 %v4448_v36, %v4284_v20  ;;  %v4548_v17 = vadd.f32 %v4448_v36, %v4288_v55  ;;  %v4552_v5 = vadd.f32 %v4448_v36, %v5356_v26 }
 0x31e   :  { %5353 = vst [vmem:[#allocation15_spill] sm:$0xff] %v4540_v18  ;;  %v4556_v9 = vadd.f32 %v4448_v36, %v5358_v59  ;;  %v4560_v57 = vadd.f32 %v4448_v36, %v5360_v61  ;;  %v5361_v18 = vld [vmem:[#allocation3_spill] sm:$0xff] }
 0x31f   :  { %5354 = vst [vmem:[#allocation16_spill] sm:$0xff] %v4544_v7  ;;  %5355 = vst [vmem:[#allocation17_spill] sm:$0xff] %v4548_v17  ;;  %v4564_v20 = vadd.f32 %v4448_v36, %v5361_v18  ;;  %v5362_v7 = vld [vmem:[#allocation5_spill] sm:$0xff]  ;;  %v5363_v17 = vld [vmem:[#allocation8_spill] sm:$0xff]  ;;  %v4584_v18 = vadd.f32 %v4448_v36, %v4324_v35  ;;  %v4604_v35 = vadd.f32 %v4448_v36, %v4344_v21 }
 0x320   :  { %5357 = vst [vmem:[#allocation18_spill] sm:$0xff] %v4552_v5  ;;  %5359 = vst [vmem:[#allocation19_spill] sm:$0xff] %v4556_v9  ;;  %v4568_v55 = vadd.f32 %v4448_v36, %v5362_v7  ;;  %v4572_v26 = vadd.f32 %v4448_v36, %v5363_v17  ;;  %v5364_v5 = vld [vmem:[#allocation10_spill] sm:$0xff]  ;;  %v5365_v9 = vld [vmem:[#allocation7_spill] sm:$0xff]  ;;  %v4588_v7 = vadd.f32 %v4448_v36, %v4328_v14 }
 0x321   :  { %v4576_v59 = vadd.f32 %v4448_v36, %v5364_v5  ;;  %v4580_v61 = vadd.f32 %v4448_v36, %v5365_v9  ;;  %v4592_v17 = vadd.f32 %v4448_v36, %v4332_v19  ;;  %v4596_v5 = vadd.f32 %v4448_v36, %v4336_v56 }
 0x322   :  { %v4600_v9 = vadd.f32 %v4448_v36, %v4340_v40  ;;  %v4608_v14 = vadd.f32 %v4448_v36, %v4348_v24  ;;  %v4612_v19 = vadd.f32 %v4448_v36, %v4352_v10  ;;  %v4616_v56 = vadd.f32 %v4448_v36, %v4356_v8 }
 0x323   :  { %v4620_v40 = vadd.f32 %v4448_v36, %v4360_v41  ;;  %v4624_v21 = vadd.f32 %v4448_v36, %v4364_v38  ;;  %v4628_v24 = vadd.f32 %v4448_v36, %v4368_v63  ;;  %v4632_v10 = vadd.f32 %v4448_v36, %v4372_v62 }
 0x324   :  { %5366 = vst [vmem:[#allocation20_spill] sm:$0xff] %v4616_v56  ;;  %v4636_v8 = vadd.f32 %v4448_v36, %v4376_v2  ;;  %v4640_v41 = vadd.f32 %v4448_v36, %v4380_v43  ;;  %v4644_v38 = vadd.f32 %v4448_v36, %v4384_v0  ;;  %v4648_v63 = vadd.f32 %v4448_v36, %v4388_v4 }
 0x325   :  { %v4652_v62 = vadd.f32 %v4448_v36, %v4392_v16  ;;  %v4656_v2 = vadd.f32 %v4448_v36, %v4396_v52  ;;  %v4660_v43 = vadd.f32 %v4448_v36, %v4400_v15  ;;  %v4664_v0 = vadd.f32 %v4448_v36, %v4404_v39 }
 0x326   :  { %v4668_v4 = vadd.f32 %v4448_v36, %v4408_v37  ;;  %v4672_v16 = vadd.f32 %v4448_v36, %v4412_v51  ;;  %v4676_v52 = vadd.f32 %v4448_v36, %v4416_v53  ;;  %v4680_v15 = vadd.f32 %v4448_v36, %v4420_v22  ;;  %v5380_v31 = vld [vmem:[#allocation16_spill] sm:$0xff]  ;;  %v5381_v30 = vld [vmem:[#allocation17_spill] sm:$0xff] }
 0x327   :  { %5367 = vst [vmem:[#allocation21_spill] sm:$0xff] %v4656_v2  ;;  %5368 = vst [vmem:[#allocation22_spill] sm:$0xff] %v4660_v43  ;;  %v5372_v43 = vld [vmem:[#allocation9_spill] sm:$0xff]  ;;  %v4688_v37 = vadd.f32 %v4448_v36, %v4428_v49  ;;  %v4692_v51 = vadd.f32 %v4448_v36, %v4432_v23  ;;  %v4696_v53 = vadd.f32 %v4448_v36, %v4436_v13  ;;  %v5382_v6 = vld [vmem:[#allocation18_spill] sm:$0xff] }
 0x328   :  { %5369 = vst [vmem:[#allocation23_spill] sm:$0xff] %v4664_v0  ;;  %5370 = vst [vmem:[#allocation24_spill] sm:$0xff] %v4668_v4  ;;  %v4684_v39 = vadd.f32 %v4448_v36, %v5372_v43  ;;  %v4700_v22 = vadd.f32 %v4448_v36, %v4440_v3  ;;  %v4704_v43 = vadd.f32 %v4448_v36, %v4444_v1  ;;  %v5383_v54 = vld [vmem:[#allocation19_spill] sm:$0xff]  ;;  %v5404_v0 = vld [vmem:[#allocation13_spill] sm:$0xff] }
 0x329   :  { %5371 = vst [vmem:[#allocation25_spill] sm:$0xff] %v4672_v16  ;;  %v4708_v49 = vadd.f32 %v4448_v36, %v4452_v25  ;;  %v4712_v23 = vadd.f32 %v4448_v36, %v4456_v32  ;;  %v4716_v13 = vadd.f32 %v4448_v36, %v4460_v60  ;;  %v4720_v3 = vadd.f32 %v4448_v36, %v4464_v48  ;;  %v5400_v16 = vld [vmem:[#allocation14_spill] sm:$0xff]  ;;  %v5402_v4 = vld [vmem:[#allocation11_spill] sm:$0xff] }
 0x32a   :  { %5373 = vst [vmem:[#allocation2_spill] sm:$0xff] %v4700_v22  ;;  %5374 = vst [vmem:[#allocation4_spill] sm:$0xff] %v4704_v43  ;;  %v5379_v22 = vld [vmem:[#allocation15_spill] sm:$0xff]  ;;  %v5386_v56 = vmov %v4704_v43  ;;  %v5393_v48 = vmax.f32 %v4480_v12, 0.0  ;;  %v5394_v43 = vmax.f32 %v4484_v27, 0.0  ;;  %v5401_v27 = vmax.f32 %v5400_v16, 0.0 }
 0x32b   :  { %5375 = vst [vmem:[#allocation6_spill] sm:$0xff] %v4708_v49  ;;  %5376 = vst [vmem:[#allocation3_spill] sm:$0xff] %v4712_v23  ;;  %v5390_v49 = vmax.f32 %v4468_v42, 0.0  ;;  %v5391_v23 = vmax.f32 %v4472_v11, 0.0  ;;  %v5395_v42 = vmax.f32 %v4488_v28, 0.0  ;;  %v5396_v11 = vmax.f32 %v4492_v34, 0.0 }
 0x32c   :  { %5377 = vst [vmem:[#allocation5_spill] sm:$0xff] %v4716_v13  ;;  %5378 = vst [vmem:[#allocation8_spill] sm:$0xff] %v4720_v3  ;;  %v5392_v13 = vmax.f32 %v4476_v33, 0.0  ;;  %v2689_v1 = vpack.c.bf16 %v5393_v48, %v5393_v48  ;;  %v2690_v25 = vpack.c.bf16 %v5394_v43, %v5394_v43  ;;  %v5397_v33 = vmax.f32 %v4496_v45, 0.0  ;;  %v5398_v3 = vld [vmem:[#allocation12_spill] sm:$0xff] }
 0x32d   :  { %v2686_v32 = vpack.c.bf16 %v5390_v49, %v5390_v49  ;;  %v2687_v60 = vpack.c.bf16 %v5391_v23, %v5391_v23  ;;  %v2691_v49 = vpack.c.bf16 %v5395_v42, %v5395_v42  ;;  %v2692_v23 = vpack.c.bf16 %v5396_v11, %v5396_v11 }
 0x32e   :  { %v2688_v36 = vpack.c.bf16 %v5392_v13, %v5392_v13  ;;  %v2693_v13 = vpack.c.bf16 %v5397_v33, %v5397_v33  ;;  %v5399_v12 = vmax.f32 %v5398_v3, 0.0  ;;  %v2695_v43 = vpack.c.bf16 %v5401_v27, %v5401_v27  ;;  %2409 = vst.msk [vmem:[%s5239_s5 + $0xc] sm:$0xf] %vm2405_vm3, %v2689_v1  ;;  %2410 = vst.msk [vmem:[%s5239_s5 + $0x10] sm:$0xf] %vm2405_vm3, %v2690_v25 }
 0x32f   :  { %v5403_v28 = vmax.f32 %v5402_v4, 0.0  ;;  %v5405_v34 = vmax.f32 %v5404_v0, 0.0  ;;  %2406 = vst.msk [vmem:[%s5239_s5] sm:$0xf] %vm2405_vm3, %v2686_v32  ;;  %2407 = vst.msk [vmem:[%s5239_s5 + $0x4] sm:$0xf] %vm2405_vm3, %v2687_v60 }
 0x330   :  { %v2694_v48 = vpack.c.bf16 %v5399_v12, %v5399_v12  ;;  %2408 = vst.msk [vmem:[%s5239_s5 + $0x8] sm:$0xf] %vm2405_vm3, %v2688_v36  ;;  %v5406_v45 = vmax.f32 %v4516_v47, 0.0  ;;  %v5407_v4 = vmax.f32 %v4520_v58, 0.0  ;;  %v5408_v3 = vmax.f32 %v4524_v44, 0.0 }
 0x331   :  { %v5385_v2 = vld [vmem:[#allocation2_spill] sm:$0xff]  ;;  %v2696_v42 = vpack.c.bf16 %v5403_v28, %v5403_v28  ;;  %v2697_v11 = vpack.c.bf16 %v5405_v34, %v5405_v34  ;;  %v5409_v60 = vmax.f32 %v4528_v50, 0.0  ;;  %2411 = vst.msk [vmem:[%s5239_s5 + $0x14] sm:$0xf] %vm2405_vm3, %v2691_v49  ;;  %2412 = vst.msk [vmem:[%s5239_s5 + $0x18] sm:$0xf] %vm2405_vm3, %v2692_v23 }
 0x332   :  { %v2698_v0 = vpack.c.bf16 %v5406_v45, %v5406_v45  ;;  %v2699_v16 = vpack.c.bf16 %v5407_v4, %v5407_v4  ;;  %v2700_v32 = vpack.c.bf16 %v5408_v3, %v5408_v3  ;;  %2413 = vst.msk [vmem:[%s5239_s5 + $0x1c] sm:$0xf] %vm2405_vm3, %v2693_v13  ;;  %v5410_v47 = vmax.f32 %v4532_v29, 0.0  ;;  %2414 = vst.msk [vmem:[%s5239_s5 + $0x20] sm:$0xf] %vm2405_vm3, %v2694_v48 }
 0x333   :  { %v2701_v36 = vpack.c.bf16 %v5409_v60, %v5409_v60  ;;  %v5411_v44 = vmax.f32 %v4536_v46, 0.0  ;;  %v5412_v1 = vmax.f32 %v5379_v22, 0.0  ;;  %v5413_v49 = vmax.f32 %v5380_v31, 0.0  ;;  %2415 = vst.msk [vmem:[%s5239_s5 + $0x24] sm:$0xf] %vm2405_vm3, %v2695_v43 }
 0x334   :  { %v2702_v58 = vpack.c.bf16 %v5410_v47, %v5410_v47  ;;  %2416 = vst.msk [vmem:[%s5239_s5 + $0x28] sm:$0xf] %vm2405_vm3, %v2696_v42  ;;  %2417 = vst.msk [vmem:[%s5239_s5 + $0x2c] sm:$0xf] %vm2405_vm3, %v2697_v11  ;;  %v5414_v31 = vmax.f32 %v5381_v30, 0.0  ;;  %v5415_v46 = vmax.f32 %v5382_v6, 0.0 }
 0x335   :  { %v2703_v50 = vpack.c.bf16 %v5411_v44, %v5411_v44  ;;  %v2704_v25 = vpack.c.bf16 %v5412_v1, %v5412_v1  ;;  %v2705_v23 = vpack.c.bf16 %v5413_v49, %v5413_v49  ;;  %v5416_v33 = vmax.f32 %v5383_v54, 0.0  ;;  %2418 = vst.msk [vmem:[%s5239_s5 + $0x30] sm:$0xf] %vm2405_vm3, %v2698_v0  ;;  %2419 = vst.msk [vmem:[%s5239_s5 + $0x34] sm:$0xf] %vm2405_vm3, %v2699_v16 }
 0x336   :  { %v2706_v29 = vpack.c.bf16 %v5414_v31, %v5414_v31  ;;  %v2707_v22 = vpack.c.bf16 %v5415_v46, %v5415_v46  ;;  %v5417_v12 = vmax.f32 %v4560_v57, 0.0  ;;  %2420 = vst.msk [vmem:[%s5239_s5 + $0x38] sm:$0xf] %vm2405_vm3, %v2700_v32  ;;  %2421 = vst.msk [vmem:[%s5239_s5 + $0x3c] sm:$0xf] %vm2405_vm3, %v2701_v36  ;;  %v5418_v30 = vmax.f32 %v4564_v20, 0.0 }
 0x337   :  { %v2708_v13 = vpack.c.bf16 %v5416_v33, %v5416_v33  ;;  %v5419_v54 = vmax.f32 %v4568_v55, 0.0  ;;  %v5420_v27 = vmax.f32 %v4572_v26, 0.0  ;;  %v5421_v28 = vmax.f32 %v4576_v59, 0.0  ;;  %2422 = vst.msk [vmem:[%s5239_s5 + $0x40] sm:$0xf] %vm2405_vm3, %v2702_v58  ;;  %v5442_v46 = vld [vmem:[#allocation21_spill] sm:$0xff] }
 0x338   :  { %v2709_v48 = vpack.c.bf16 %v5417_v12, %v5417_v12  ;;  %v2710_v6 = vpack.c.bf16 %v5418_v30, %v5418_v30  ;;  %2423 = vst.msk [vmem:[%s5239_s5 + $0x44] sm:$0xf] %vm2405_vm3, %v2703_v50  ;;  %2424 = vst.msk [vmem:[%s5239_s5 + $0x48] sm:$0xf] %vm2405_vm3, %v2704_v25  ;;  %v5422_v20 = vmax.f32 %v4580_v61, 0.0  ;;  %v5423_v26 = vmax.f32 %v4584_v18, 0.0 }
 0x339   :  { %v2711_v57 = vpack.c.bf16 %v5419_v54, %v5419_v54  ;;  %v2712_v43 = vpack.c.bf16 %v5420_v27, %v5420_v27  ;;  %v2713_v42 = vpack.c.bf16 %v5421_v28, %v5421_v28  ;;  %2425 = vst.msk [vmem:[%s5239_s5 + $0x4c] sm:$0xf] %vm2405_vm3, %v2705_v23  ;;  %v5424_v34 = vmax.f32 %v4588_v7, 0.0  ;;  %2426 = vst.msk [vmem:[%s5239_s5 + $0x50] sm:$0xf] %vm2405_vm3, %v2706_v29  ;;  %v5448_v30 = vld [vmem:[#allocation24_spill] sm:$0xff] }
 0x33a   :  { %v2714_v55 = vpack.c.bf16 %v5422_v20, %v5422_v20  ;;  %v2715_v59 = vpack.c.bf16 %v5423_v26, %v5423_v26  ;;  %v5425_v45 = vmax.f32 %v4592_v17, 0.0  ;;  %2427 = vst.msk [vmem:[%s5239_s5 + $0x54] sm:$0xf] %vm2405_vm3, %v2707_v22  ;;  %2428 = vst.msk [vmem:[%s5239_s5 + $0x58] sm:$0xf] %vm2405_vm3, %v2708_v13  ;;  %v5426_v61 = vmax.f32 %v4596_v5, 0.0 }
 0x33b   :  { %v2716_v11 = vpack.c.bf16 %v5424_v34, %v5424_v34  ;;  %2429 = vst.msk [vmem:[%s5239_s5 + $0x5c] sm:$0xf] %vm2405_vm3, %v2709_v48  ;;  %v5427_v7 = vmax.f32 %v4600_v9, 0.0  ;;  %v5428_v4 = vmax.f32 %v4604_v35, 0.0  ;;  %v5429_v3 = vmax.f32 %v4608_v14, 0.0  ;;  %v5431_v35 = vld [vmem:[#allocation20_spill] sm:$0xff] }
 0x33c   :  { %v2717_v0 = vpack.c.bf16 %v5425_v45, %v5425_v45  ;;  %v2718_v18 = vpack.c.bf16 %v5426_v61, %v5426_v61  ;;  %2430 = vst.msk [vmem:[%s5239_s5 + $0x60] sm:$0xf] %vm2405_vm3, %v2710_v6  ;;  %2431 = vst.msk [vmem:[%s5239_s5 + $0x64] sm:$0xf] %vm2405_vm3, %v2711_v57  ;;  %v5430_v5 = vmax.f32 %v4612_v19, 0.0  ;;  %v5432_v14 = vmax.f32 %v5431_v35, 0.0 }
 0x33d   :  { %v2719_v17 = vpack.c.bf16 %v5427_v7, %v5427_v7  ;;  %v2720_v16 = vpack.c.bf16 %v5428_v4, %v5428_v4  ;;  %v2721_v32 = vpack.c.bf16 %v5429_v3, %v5429_v3  ;;  %2432 = vst.msk [vmem:[%s5239_s5 + $0x68] sm:$0xf] %vm2405_vm3, %v2712_v43  ;;  %2433 = vst.msk [vmem:[%s5239_s5 + $0x6c] sm:$0xf] %vm2405_vm3, %v2713_v42  ;;  %v5433_v36 = vmax.f32 %v4620_v40, 0.0  ;;  %v5446_v13 = vld [vmem:[#allocation23_spill] sm:$0xff] }
 0x33e   :  { %v2722_v9 = vpack.c.bf16 %v5430_v5, %v5430_v5  ;;  %v2723_v60 = vpack.c.bf16 %v5432_v14, %v5432_v14  ;;  %v5434_v58 = vmax.f32 %v4624_v21, 0.0  ;;  %2434 = vst.msk [vmem:[%s5239_s5 + $0x70] sm:$0xf] %vm2405_vm3, %v2714_v55  ;;  %2435 = vst.msk [vmem:[%s5239_s5 + $0x74] sm:$0xf] %vm2405_vm3, %v2715_v59  ;;  %v5435_v19 = vmax.f32 %v4628_v24, 0.0 }
 0x33f   :  { %v2724_v47 = vpack.c.bf16 %v5433_v36, %v5433_v36  ;;  %2436 = vst.msk [vmem:[%s5239_s5 + $0x78] sm:$0xf] %vm2405_vm3, %v2716_v11  ;;  %2437 = vst.msk [vmem:[%s5239_s5 + $0x7c] sm:$0xf] %vm2405_vm3, %v2717_v0  ;;  %v5436_v21 = vmax.f32 %v4632_v10, 0.0  ;;  %v5437_v1 = vmax.f32 %v4636_v8, 0.0 }
 0x340   :  { %v2725_v44 = vpack.c.bf16 %v5434_v58, %v5434_v58  ;;  %v2726_v40 = vpack.c.bf16 %v5435_v19, %v5435_v19  ;;  %v5438_v49 = vmax.f32 %v4640_v41, 0.0  ;;  %2438 = vst.msk [vmem:[%s5239_s5 + $0x80] sm:$0xf] %vm2405_vm3, %v2718_v18  ;;  %2439 = vst.msk [vmem:[%s5239_s5 + $0x84] sm:$0xf] %vm2405_vm3, %v2719_v17  ;;  %v5439_v24 = vmax.f32 %v4644_v38, 0.0 }
 0x341   :  { %v2727_v50 = vpack.c.bf16 %v5436_v21, %v5436_v21  ;;  %v2728_v25 = vpack.c.bf16 %v5437_v1, %v5437_v1  ;;  %2440 = vst.msk [vmem:[%s5239_s5 + $0x88] sm:$0xf] %vm2405_vm3, %v2720_v16  ;;  %2441 = vst.msk [vmem:[%s5239_s5 + $0x8c] sm:$0xf] %vm2405_vm3, %v2721_v32  ;;  %v5440_v8 = vmax.f32 %v4648_v63, 0.0  ;;  %v5441_v31 = vmax.f32 %v4652_v62, 0.0 }
 0x342   :  { %v2729_v23 = vpack.c.bf16 %v5438_v49, %v5438_v49  ;;  %v2730_v10 = vpack.c.bf16 %v5439_v24, %v5439_v24  ;;  %v5443_v22 = vmax.f32 %v5442_v46, 0.0  ;;  %2442 = vst.msk [vmem:[%s5239_s5 + $0x90] sm:$0xf] %vm2405_vm3, %v2722_v9  ;;  %2443 = vst.msk [vmem:[%s5239_s5 + $0x94] sm:$0xf] %vm2405_vm3, %v2723_v60  ;;  %v5444_v38 = vld [vmem:[#allocation22_spill] sm:$0xff] }
 0x343   :  { %v2731_v41 = vpack.c.bf16 %v5440_v8, %v5440_v8  ;;  %v2732_v29 = vpack.c.bf16 %v5441_v31, %v5441_v31  ;;  %2444 = vst.msk [vmem:[%s5239_s5 + $0x98] sm:$0xf] %vm2405_vm3, %v2724_v47  ;;  %2445 = vst.msk [vmem:[%s5239_s5 + $0x9c] sm:$0xf] %vm2405_vm3, %v2725_v44  ;;  %v5445_v63 = vmax.f32 %v5444_v38, 0.0  ;;  %v5447_v12 = vmax.f32 %v5446_v13, 0.0 }
 0x344   :  { %v2733_v33 = vpack.c.bf16 %v5443_v22, %v5443_v22  ;;  %v5449_v6 = vmax.f32 %v5448_v30, 0.0  ;;  %v5450_v57 = vld [vmem:[#allocation25_spill] sm:$0xff]  ;;  %2446 = vst.msk [vmem:[%s5239_s5 + $0xa0] sm:$0xf] %vm2405_vm3, %v2726_v40  ;;  %2447 = vst.msk [vmem:[%s5239_s5 + $0xa4] sm:$0xf] %vm2405_vm3, %v2727_v50 }
 0x345   :  { %v2734_v62 = vpack.c.bf16 %v5445_v63, %v5445_v63  ;;  %v2735_v48 = vpack.c.bf16 %v5447_v12, %v5447_v12  ;;  %v5451_v27 = vmax.f32 %v5450_v57, 0.0  ;;  %2448 = vst.msk [vmem:[%s5239_s5 + $0xa8] sm:$0xf] %vm2405_vm3, %v2728_v25  ;;  %2449 = vst.msk [vmem:[%s5239_s5 + $0xac] sm:$0xf] %vm2405_vm3, %v2729_v23  ;;  %v5452_v28 = vmax.f32 %v4676_v52, 0.0 }
 0x346   :  { %v2736_v54 = vpack.c.bf16 %v5449_v6, %v5449_v6  ;;  %v5453_v20 = vmax.f32 %v4680_v15, 0.0  ;;  %v5454_v26 = vmax.f32 %v4684_v39, 0.0  ;;  %v5455_v34 = vmax.f32 %v4688_v37, 0.0  ;;  %2450 = vst.msk [vmem:[%s5239_s5 + $0xb0] sm:$0xf] %vm2405_vm3, %v2730_v10  ;;  %v5464_v4 = vld [vmem:[#allocation5_spill] sm:$0xff] }
 0x347   :  { %v2737_v43 = vpack.c.bf16 %v5451_v27, %v5451_v27  ;;  %v2738_v42 = vpack.c.bf16 %v5452_v28, %v5452_v28  ;;  %2451 = vst.msk [vmem:[%s5239_s5 + $0xb4] sm:$0xf] %vm2405_vm3, %v2731_v41  ;;  %2452 = vst.msk [vmem:[%s5239_s5 + $0xb8] sm:$0xf] %vm2405_vm3, %v2732_v29  ;;  %v5456_v52 = vmax.f32 %v4692_v51, 0.0  ;;  %v5457_v39 = vmax.f32 %v4696_v53, 0.0 }
 0x348   :  { %v2739_v55 = vpack.c.bf16 %v5453_v20, %v5453_v20  ;;  %v2740_v59 = vpack.c.bf16 %v5454_v26, %v5454_v26  ;;  %v2741_v11 = vpack.c.bf16 %v5455_v34, %v5455_v34  ;;  %2453 = vst.msk [vmem:[%s5239_s5 + $0xbc] sm:$0xf] %vm2405_vm3, %v2733_v33  ;;  %v5458_v45 = vmax.f32 %v5385_v2, 0.0  ;;  %2454 = vst.msk [vmem:[%s5239_s5 + $0xc0] sm:$0xf] %vm2405_vm3, %v2734_v62  ;;  %v5462_v53 = vld [vmem:[#allocation3_spill] sm:$0xff] }
 0x349   :  { %v2742_v15 = vpack.c.bf16 %v5456_v52, %v5456_v52  ;;  %v2743_v37 = vpack.c.bf16 %v5457_v39, %v5457_v39  ;;  %v5459_v61 = vmax.f32 %v5386_v56, 0.0  ;;  %2455 = vst.msk [vmem:[%s5239_s5 + $0xc4] sm:$0xf] %vm2405_vm3, %v2735_v48  ;;  %2456 = vst.msk [vmem:[%s5239_s5 + $0xc8] sm:$0xf] %vm2405_vm3, %v2736_v54  ;;  %v5460_v56 = vld [vmem:[#allocation6_spill] sm:$0xff] }
 0x34a   :  { %v2744_v0 = vpack.c.bf16 %v5458_v45, %v5458_v45  ;;  %2457 = vst.msk [vmem:[%s5239_s5 + $0xcc] sm:$0xf] %vm2405_vm3, %v2737_v43  ;;  %v5461_v2 = vmax.f32 %v5460_v56, 0.0  ;;  %v5463_v7 = vmax.f32 %v5462_v53, 0.0  ;;  %v5465_v16 = vmax.f32 %v5464_v4, 0.0  ;;  %v5466_v32 = vld [vmem:[#allocation8_spill] sm:$0xff] }
 0x34b   :  { %v2745_v18 = vpack.c.bf16 %v5459_v61, %v5459_v61  ;;  %v5467_v5 = vmax.f32 %v5466_v32, 0.0  ;;  %2458 = vst.msk [vmem:[%s5239_s5 + $0xd0] sm:$0xf] %vm2405_vm3, %v2738_v42  ;;  %2459 = vst.msk [vmem:[%s5239_s5 + $0xd4] sm:$0xf] %vm2405_vm3, %v2739_v55 }
 0x34c   :  { %v2746_v51 = vpack.c.bf16 %v5461_v2, %v5461_v2  ;;  %v2747_v17 = vpack.c.bf16 %v5463_v7, %v5463_v7  ;;  %v2748_v3 = vpack.c.bf16 %v5465_v16, %v5465_v16  ;;  %2460 = vst.msk [vmem:[%s5239_s5 + $0xd8] sm:$0xf] %vm2405_vm3, %v2740_v59  ;;  %2461 = vst.msk [vmem:[%s5239_s5 + $0xdc] sm:$0xf] %vm2405_vm3, %v2741_v11 }
 0x34d   :  { %v2749_v9 = vpack.c.bf16 %v5467_v5, %v5467_v5  ;;  %2462 = vst.msk [vmem:[%s5239_s5 + $0xe0] sm:$0xf] %vm2405_vm3, %v2742_v15  ;;  %2463 = vst.msk [vmem:[%s5239_s5 + $0xe4] sm:$0xf] %vm2405_vm3, %v2743_v37 }
 0x34e   :  { %2464 = vst.msk [vmem:[%s5239_s5 + $0xe8] sm:$0xf] %vm2405_vm3, %v2744_v0  ;;  %2465 = vst.msk [vmem:[%s5239_s5 + $0xec] sm:$0xf] %vm2405_vm3, %v2745_v18 }
 0x34f   :  { %2466 = vst.msk [vmem:[%s5239_s5 + $0xf0] sm:$0xf] %vm2405_vm3, %v2746_v51  ;;  %2467 = vst.msk [vmem:[%s5239_s5 + $0xf4] sm:$0xf] %vm2405_vm3, %v2747_v17 }
 0x350   :  { %2468 = vst.msk [vmem:[%s5239_s5 + $0xf8] sm:$0xf] %vm2405_vm3, %v2748_v3  ;;  %2469 = vst.msk [vmem:[%s5239_s5 + $0xfc] sm:$0xf] %vm2405_vm3, %v2749_v9 }

// kernel: decoder_forward.7
= control target key start
LH: loop header
LB: loop body
LE: loop exit
PB: predicated region body
PF: predicated region fallthrough
CT: control target
= control target key end

     0   :  { %s2692_s12 = smov 0   ;;  %s3197_s0 = inlined_call_operand.vmem [shape: bf16[2048,400], index: 0, kind: input, shape index: {}]   ;;  %s3198_s1 = inlined_call_operand.vmem [shape: bf16[400,3], index: 1, kind: input, shape index: {}]   ;;  %s3199_s2 = inlined_call_operand.vmem [shape: f32[1,3], index: 2, kind: input, shape index: {}]   ;;  %s3200_s3 = inlined_call_operand.vmem [shape: f32[2048,3], index: 3, kind: output, shape index: {}]  }
   0x1 LB: > { %s1981_s13 = sadd.s32 4294967295, %s2669_s12   ;;  %p1985_p0 = scmp.ge.s32.totalorder %s2669_s12, 1  ;;  %s2669_s12 = sphi %s2692_s12, %s13_s12  }
   0x2   : > { %p139_p1 = scmp.lt.s32.totalorder %s2669_s12, 5 }
   0x4   : > { %p140_p2 = pnand %p1985_p0, %p139_p1 }
   0x5   : > { %v2317_v0 = vld [vmem:[%s3198_s1] sm:$0xff] (!%p140_p2)   ;;  %v2671_v1 = vmov (!%p140_p2), 0   ;;  %v2318_v2 = vld [vmem:[%s3198_s1 + $0x8] sm:$0xff] (!%p140_p2)   ;;  %v2319_v3 = vld [vmem:[%s3198_s1 + $0x10] sm:$0xff] (!%p140_p2)   ;;  %s1986_s24 = sshll.u32 (!%p140_p2), %s1981_s13, 6  ;;  %vm1121_vm0 = vcmask (!%p140_p2), 130048  }
   0x6   : > { %143 = sbr.rel (%p140_p2) target bundleno = 548 (0x224), region = 32  ;;  %1218 = vmatprep.subr.bf16.mxu1 (!%p140_p2), %v2671_v1  ;;  %1507 = vmatprep.subr.bf16.mxu0 (!%p140_p2), %v2671_v1  ;;  %v2324_v4 = vld [vmem:[%s3198_s1 + $0x80] sm:$0xff] (!%p140_p2)   ;;  %v2326_v5 = vld [vmem:[%s3198_s1 + $0x88] sm:$0xff] (!%p140_p2)   ;;  %v2320_v6 = vld [vmem:[%s3198_s1 + $0x18] sm:$0xff] (!%p140_p2)   ;;  %p165_p3 = scmp.lt.s32.totalorder (!%p140_p2), %s1986_s24, 255  ;;  %vm1860_vm1 = vcmask (!%p140_p2), 23552  }
   0x7   : > { %1219 = vmatpush1.bf16.msra.mxu1 (!%p140_p2), %v2317_v0  ;;  %1508 = vmatpush1.bf16.msra.mxu0 (!%p140_p2), %v2324_v4  ;;  %v2328_v7 = vld [vmem:[%s3198_s1 + $0x90] sm:$0xff] (!%p140_p2)   ;;  %v2321_v8 = vld [vmem:[%s3198_s1 + $0x20] sm:$0xff] (!%p140_p2)   ;;  %v2330_v9 = vld [vmem:[%s3198_s1 + $0x98] sm:$0xff] (!%p140_p2)  }
   0x8   : > { %1220 = vmatprep.subr.bf16.mxu1 (!%p140_p2), %v2671_v1  ;;  %1509 = vmatprep.subr.bf16.mxu0 (!%p140_p2), %v2671_v1  ;;  %v2322_v10 = vld [vmem:[%s3198_s1 + $0x28] sm:$0xff] (!%p140_p2)   ;;  %v2332_v11 = vld [vmem:[%s3198_s1 + $0xa0] sm:$0xff] (!%p140_p2)   ;;  %v2323_v12 = vld [vmem:[%s3198_s1 + $0x30] sm:$0xff] (!%p140_p2)  }
   0x9   : > { %v2325_v13 = vld [vmem:[%s3198_s1 + $0x38] sm:$0xff] (!%p140_p2)   ;;  %v2334_v14 = vld [vmem:[%s3198_s1 + $0xa8] sm:$0xff] (!%p140_p2)   ;;  %v2336_v17 = vld [vmem:[%s3198_s1 + $0xb0] sm:$0xff] (!%p140_p2)  }
   0xa   : > { %v2327_v18 = vld [vmem:[%s3198_s1 + $0x40] sm:$0xff] (!%p140_p2)   ;;  %v2338_v19 = vld [vmem:[%s3198_s1 + $0xb8] sm:$0xff] (!%p140_p2)   ;;  %v2329_v20 = vld [vmem:[%s3198_s1 + $0x48] sm:$0xff] (!%p140_p2)  }
   0xb   : > { %1221 = vmatpush1.bf16.msra.mxu1 (!%p140_p2), %v2318_v2  ;;  %1510 = vmatpush1.bf16.msra.mxu0 (!%p140_p2), %v2326_v5  ;;  %v2340_v21 = vld [vmem:[%s3198_s1 + $0xc0] sm:$0xff] (!%p140_p2)   ;;  %v2331_v22 = vld [vmem:[%s3198_s1 + $0x50] sm:$0xff] (!%p140_p2)   ;;  %v2333_v25 = vld [vmem:[%s3198_s1 + $0x58] sm:$0xff] (!%p140_p2)  }
   0xc   : > { %1222 = vmatprep.subr.bf16.mxu1 (!%p140_p2), %v2671_v1  ;;  %1511 = vmatprep.subr.bf16.mxu0 (!%p140_p2), %v2671_v1  ;;  %v2335_v26 = vld [vmem:[%s3198_s1 + $0x60] sm:$0xff] (!%p140_p2)   ;;  %v2337_v29 = vld [vmem:[%s3198_s1 + $0x68] sm:$0xff] (!%p140_p2)   ;;  %v2339_v30 = vld [vmem:[%s3198_s1 + $0x70] sm:$0xff] (!%p140_p2)  }
   0xd   : > { %s3202_s24 = smov (!%p165_p3, %s1986_s24), 255  ;;  %v2341_v33 = vld [vmem:[%s3198_s1 + $0x78] sm:$0xff]  }
   0xe   : > { %s2179_s8 = sshll.u32 %s3202_s24, 4  ;;  %s1990_s21 = sshll.u32 %s3202_s24, 3 }
   0xf   : > { %1223 = vmatpush1.bf16.msra.mxu1 %v2319_v3  ;;  %1512 = vmatpush1.bf16.msra.mxu0 %v2328_v7  ;;  %s2754_s16 = scalar_lea.vmem %s3197_s0, %s2179_s8  ;;  %s2986_s25 = scalar_lea.vmem %s3200_s3, %s1990_s21 }
  0x10   : > { %1224 = vmatprep.subr.bf16.mxu1 %v2671_v1  ;;  %1513 = vmatprep.subr.bf16.mxu0 %v2671_v1  ;;  %v2344_v15 = vld [vmem:[%s2754_s16 + $0xc] ss:$16 sps:$4 sm:$0xff]   ;;  %v2347_v16 = vld [vmem:[%s2754_s16 + $0x4] ss:$16 sps:$4 sm:$0xff]   ;;  %v2342_v23 = vld [vmem:[%s2754_s16 + $0x8] ss:$16 sps:$4 sm:$0xff]  }
  0x11   : > { %2145 = vmatprep.mubr.msk.bf16.mxu0 %vm1121_vm0, %v2344_v15  ;;  %1250 = vmatprep.mubr.bf16.mxu1 %v2347_v16  ;;  %v2348_v24 = vld [vmem:[%s2754_s16 + $0x2c] ss:$16 sps:$4 sm:$0xff]   ;;  %v2352_v27 = vld [vmem:[%s2754_s16 + $0x28] ss:$16 sps:$4 sm:$0xff]   ;;  %v2345_v34 = vld [vmem:[%s2754_s16] ss:$16 sps:$4 sm:$0xff]  }
  0x12   : > { %v2354_v28 = vld [vmem:[%s2754_s16 + $0x4c] ss:$16 sps:$4 sm:$0xff]   ;;  %v2358_v31 = vld [vmem:[%s2754_s16 + $0x48] ss:$16 sps:$4 sm:$0xff]   ;;  %v2350_v35 = vld [vmem:[%s2754_s16 + $0x24] ss:$16 sps:$4 sm:$0xff]  }
  0x13   : > { %1225 = vmatpush1.bf16.msra.mxu1 %v2320_v6  ;;  %1514 = vmatpush1.bf16.msra.mxu0 %v2330_v9  ;;  %v2360_v32 = vld [vmem:[%s2754_s16 + $0x6c] ss:$16 sps:$4 sm:$0xff]   ;;  %v2364_v36 = vld [vmem:[%s2754_s16 + $0x68] ss:$16 sps:$4 sm:$0xff]   ;;  %v2353_v38 = vld [vmem:[%s2754_s16 + $0x20] ss:$16 sps:$4 sm:$0xff]  }
  0x14   : > { %1226 = vmatprep.subr.bf16.mxu1 %v2671_v1  ;;  %1515 = vmatprep.subr.bf16.mxu0 %v2671_v1  ;;  %v2366_v37 = vld [vmem:[%s2754_s16 + $0x8c] ss:$16 sps:$4 sm:$0xff]   ;;  %v2356_v39 = vld [vmem:[%s2754_s16 + $0x44] ss:$16 sps:$4 sm:$0xff]   ;;  %v2370_v40 = vld [vmem:[%s2754_s16 + $0x88] ss:$16 sps:$4 sm:$0xff]  }
  0x15   : > { %v2372_v41 = vld [vmem:[%s2754_s16 + $0xac] ss:$16 sps:$4 sm:$0xff]   ;;  %v2359_v42 = vld [vmem:[%s2754_s16 + $0x40] ss:$16 sps:$4 sm:$0xff]   ;;  %v2362_v43 = vld [vmem:[%s2754_s16 + $0x64] ss:$16 sps:$4 sm:$0xff]  }
  0x16   : > { %v2376_v44 = vld [vmem:[%s2754_s16 + $0xa8] ss:$16 sps:$4 sm:$0xff]   ;;  %v2378_v45 = vld [vmem:[%s2754_s16 + $0xcc] ss:$16 sps:$4 sm:$0xff]   ;;  %v2365_v46 = vld [vmem:[%s2754_s16 + $0x60] ss:$16 sps:$4 sm:$0xff]  }
  0x17   : > { %1227 = vmatpush1.bf16.msra.mxu1 %v2321_v8  ;;  %1516 = vmatpush1.bf16.msra.mxu0 %v2332_v11  ;;  %v2368_v47 = vld [vmem:[%s2754_s16 + $0x84] ss:$16 sps:$4 sm:$0xff]   ;;  %v2382_v48 = vld [vmem:[%s2754_s16 + $0xc8] ss:$16 sps:$4 sm:$0xff]   ;;  %v2384_v49 = vld [vmem:[%s2754_s16 + $0xec] ss:$16 sps:$4 sm:$0xff]  }
  0x18   : > { %1228 = vmatprep.subr.bf16.mxu1 %v2671_v1  ;;  %1517 = vmatprep.subr.bf16.mxu0 %v2671_v1  ;;  %v2371_v50 = vld [vmem:[%s2754_s16 + $0x80] ss:$16 sps:$4 sm:$0xff]   ;;  %v2374_v51 = vld [vmem:[%s2754_s16 + $0xa4] ss:$16 sps:$4 sm:$0xff]   ;;  %v2388_v52 = vld [vmem:[%s2754_s16 + $0xe8] ss:$16 sps:$4 sm:$0xff]  }
  0x19   : > { %v2390_v53 = vld [vmem:[%s2754_s16 + $0x10c] ss:$16 sps:$4 sm:$0xff]   ;;  %v2377_v54 = vld [vmem:[%s2754_s16 + $0xa0] ss:$16 sps:$4 sm:$0xff]   ;;  %v2380_v55 = vld [vmem:[%s2754_s16 + $0xc4] ss:$16 sps:$4 sm:$0xff]  }
  0x1a   : > { %v2394_v56 = vld [vmem:[%s2754_s16 + $0x108] ss:$16 sps:$4 sm:$0xff]   ;;  %v2396_v57 = vld [vmem:[%s2754_s16 + $0x12c] ss:$16 sps:$4 sm:$0xff]   ;;  %v2383_v58 = vld [vmem:[%s2754_s16 + $0xc0] ss:$16 sps:$4 sm:$0xff]  }
  0x1b   : > { %1229 = vmatpush1.bf16.msra.mxu1 %v2322_v10  ;;  %1518 = vmatpush1.bf16.msra.mxu0 %v2334_v14  ;;  %v2386_v59 = vld [vmem:[%s2754_s16 + $0xe4] ss:$16 sps:$4 sm:$0xff]   ;;  %v2400_v60 = vld [vmem:[%s2754_s16 + $0x128] ss:$16 sps:$4 sm:$0xff]   ;;  %v2402_v61 = vld [vmem:[%s2754_s16 + $0x14c] ss:$16 sps:$4 sm:$0xff]  }
  0x1c   : > { %1230 = vmatprep.subr.bf16.mxu1 %v2671_v1  ;;  %1519 = vmatprep.subr.bf16.mxu0 %v2671_v1  ;;  %v2389_v62 = vld [vmem:[%s2754_s16 + $0xe0] ss:$16 sps:$4 sm:$0xff]   ;;  %v2392_v63 = vld [vmem:[%s2754_s16 + $0x104] ss:$16 sps:$4 sm:$0xff]   ;;  %v2406_v0 = vld [vmem:[%s2754_s16 + $0x148] ss:$16 sps:$4 sm:$0xff]  }
  0x1d   : > { %v2395_v2 = vld [vmem:[%s2754_s16 + $0x100] ss:$16 sps:$4 sm:$0xff]   ;;  %v2398_v3 = vld [vmem:[%s2754_s16 + $0x124] ss:$16 sps:$4 sm:$0xff]   ;;  %v2412_v4 = vld [vmem:[%s2754_s16 + $0x168] ss:$16 sps:$4 sm:$0xff]  }
  0x1e   : > { %v2414_v5 = vld [vmem:[%s2754_s16 + $0x18c] ss:$16 sps:$4 sm:$0xff]   ;;  %v2401_v6 = vld [vmem:[%s2754_s16 + $0x120] ss:$16 sps:$4 sm:$0xff]   ;;  %v2404_v7 = vld [vmem:[%s2754_s16 + $0x144] ss:$16 sps:$4 sm:$0xff]  }
  0x1f   : > { %1231 = vmatpush1.bf16.msra.mxu1 %v2323_v12  ;;  %1520 = vmatpush1.bf16.msra.mxu0 %v2336_v17  ;;  %v2418_v8 = vld [vmem:[%s2754_s16 + $0x188] ss:$16 sps:$4 sm:$0xff]   ;;  %v2420_v9 = vld [vmem:[%s2754_s16 + $0x1ac] ss:$16 sps:$4 sm:$0xff]   ;;  %v2407_v10 = vld [vmem:[%s2754_s16 + $0x140] ss:$16 sps:$4 sm:$0xff]  }
  0x20   : > { %1232 = vmatprep.subr.bf16.mxu1 %v2671_v1  ;;  %1521 = vmatprep.subr.bf16.mxu0 %v2671_v1  ;;  %v2410_v11 = vld [vmem:[%s2754_s16 + $0x164] ss:$16 sps:$4 sm:$0xff]   ;;  %v2424_v12 = vld [vmem:[%s2754_s16 + $0x1a8] ss:$16 sps:$4 sm:$0xff]   ;;  %v2413_v14 = vld [vmem:[%s2754_s16 + $0x160] ss:$16 sps:$4 sm:$0xff]  }
  0x21   : > { %v2416_v15 = vld [vmem:[%s2754_s16 + $0x184] ss:$16 sps:$4 sm:$0xff]   ;;  %v2430_v16 = vld [vmem:[%s2754_s16 + $0x1c8] ss:$16 sps:$4 sm:$0xff]   ;;  %v2432_v17 = vld [vmem:[%s2754_s16 + $0x1ec] ss:$16 sps:$4 sm:$0xff]  }
  0x23   : > { %1233 = vmatpush1.bf16.msra.mxu1 %v2325_v13  ;;  %1522 = vmatpush1.bf16.msra.mxu0 %v2338_v19  ;;  %v2426_v13 = vld [vmem:[%s2754_s16 + $0x1cc] ss:$16 sps:$4 sm:$0xff]   ;;  %v2422_v19 = vld [vmem:[%s2754_s16 + $0x1a4] ss:$16 sps:$4 sm:$0xff]  }
  0x24   : > { %1234 = vmatprep.subr.bf16.mxu1 %v2671_v1  ;;  %1523 = vmatprep.subr.bf16.mxu0 %v2671_v1 }
  0x27   : > { %1235 = vmatpush1.bf16.msra.mxu1 %v2327_v18  ;;  %1524 = vmatpush1.bf16.msra.mxu0 %v2340_v21  ;;  %v2419_v18 = vld [vmem:[%s2754_s16 + $0x180] ss:$16 sps:$4 sm:$0xff]   ;;  %v2438_v21 = vld [vmem:[%s2754_s16 + $0x20c] ss:$16 sps:$4 sm:$0xff]  }
  0x28   : > { %1236 = vmatprep.subr.bf16.mxu1 %v2671_v1 }
  0x2a   : > { %1540 = vmatmul.mubr.bf16.vlgmr.msra.gmra.mrb[0].mxu0 %v2342_v23  ;;  %v2428_v23 = vld [vmem:[%s2754_s16 + $0x1c4] ss:$16 sps:$4 sm:$0xff]  }
  0x2b   : > { %1237 = vmatpush1.bf16.msra.mxu1 %v2329_v20  ;;  %2146 = vmatprep.mubr.msk.bf16.mxu0 %vm1121_vm0, %v2348_v24  ;;  %v2436_v20 = vld [vmem:[%s2754_s16 + $0x1e8] ss:$16 sps:$4 sm:$0xff]  }
  0x2c   : > { %1238 = vmatprep.subr.bf16.mxu1 %v2671_v1  ;;  %v2442_v24 = vld [vmem:[%s2754_s16 + $0x208] ss:$16 sps:$4 sm:$0xff]  }
  0x2f   : > { %1239 = vmatpush1.bf16.msra.mxu1 %v2331_v22  ;;  %v2425_v22 = vld [vmem:[%s2754_s16 + $0x1a0] ss:$16 sps:$4 sm:$0xff]  }
  0x30   : > { %1240 = vmatprep.subr.bf16.mxu1 %v2671_v1 }
  0x32   : > { %1548 = vmatmul.mubr.bf16.gmra.mrb[4].mxu0 %v2352_v27  ;;  %v2434_v27 = vld [vmem:[%s2754_s16 + $0x1e4] ss:$16 sps:$4 sm:$0xff]  }
  0x33   : > { %1241 = vmatpush1.bf16.msra.mxu1 %v2333_v25  ;;  %2147 = vmatprep.mubr.msk.bf16.mxu0 %vm1121_vm0, %v2354_v28  ;;  %v2444_v25 = vld [vmem:[%s2754_s16 + $0x22c] ss:$16 sps:$4 sm:$0xff]   ;;  %v2448_v28 = vld [vmem:[%s2754_s16 + $0x228] ss:$16 sps:$4 sm:$0xff]  }
  0x34   : > { %1242 = vmatprep.subr.bf16.mxu1 %v2671_v1 }
  0x37   : > { %1243 = vmatpush1.bf16.msra.mxu1 %v2335_v26  ;;  %v2431_v26 = vld [vmem:[%s2754_s16 + $0x1c0] ss:$16 sps:$4 sm:$0xff]  }
  0x38   : > { %1244 = vmatprep.subr.bf16.mxu1 %v2671_v1 }
  0x3a   : > { %1556 = vmatmul.mubr.bf16.gmra.mrb[8].mxu0 %v2358_v31  ;;  %v2440_v31 = vld [vmem:[%s2754_s16 + $0x204] ss:$16 sps:$4 sm:$0xff]  }
  0x3b   : > { %1245 = vmatpush1.bf16.msra.mxu1 %v2337_v29  ;;  %2148 = vmatprep.mubr.msk.bf16.mxu0 %vm1121_vm0, %v2360_v32  ;;  %v2450_v29 = vld [vmem:[%s2754_s16 + $0x24c] ss:$16 sps:$4 sm:$0xff]   ;;  %v2454_v32 = vld [vmem:[%s2754_s16 + $0x248] ss:$16 sps:$4 sm:$0xff]  }
  0x3c   : > { %1246 = vmatprep.subr.bf16.mxu1 %v2671_v1 }
  0x3f   : > { %1247 = vmatpush1.bf16.msra.mxu1 %v2339_v30  ;;  %v2437_v30 = vld [vmem:[%s2754_s16 + $0x1e0] ss:$16 sps:$4 sm:$0xff]  }
  0x40   : > { %1248 = vmatprep.subr.bf16.mxu1 %v2671_v1  ;;  %v2408_v1 = vld [vmem:[%s2754_s16 + $0x16c] ss:$16 sps:$4 sm:$0xff]  }
  0x42   : > { %1564 = vmatmul.mubr.bf16.gmra.mrb[12].mxu0 %v2364_v36  ;;  %v2460_v36 = vld [vmem:[%s2754_s16 + $0x268] ss:$16 sps:$4 sm:$0xff]  }
  0x43   : > { %1249 = vmatpush1.bf16.msra.mxu1 %v2341_v33  ;;  %2149 = vmatprep.mubr.msk.bf16.mxu0 %vm1121_vm0, %v2366_v37  ;;  %v2456_v33 = vld [vmem:[%s2754_s16 + $0x26c] ss:$16 sps:$4 sm:$0xff]  }
  0x44   : > { %v2462_v37 = vld [vmem:[%s2754_s16 + $0x28c] ss:$16 sps:$4 sm:$0xff]  }
  0x46   : > { %1251 = vmatmul.mubr.bf16.vlgmr.msra.gmra.mrb[0].mxu1 %v2345_v34  ;;  %v2443_v34 = vld [vmem:[%s2754_s16 + $0x200] ss:$16 sps:$4 sm:$0xff]  }
  0x47   : > { %1258 = vmatprep.mubr.bf16.mxu1 %v2350_v35  ;;  %v2446_v35 = vld [vmem:[%s2754_s16 + $0x224] ss:$16 sps:$4 sm:$0xff]  }
  0x4a   : > { %1572 = vmatmul.mubr.bf16.gmra.mrb[16].mxu0 %v2370_v40  ;;  %v2466_v40 = vld [vmem:[%s2754_s16 + $0x288] ss:$16 sps:$4 sm:$0xff]  }
  0x4b   : > { %2150 = vmatprep.mubr.msk.bf16.mxu0 %vm1121_vm0, %v2372_v41  ;;  %v2468_v41 = vld [vmem:[%s2754_s16 + $0x2ac] ss:$16 sps:$4 sm:$0xff]  }
  0x4e   : > { %1259 = vmatmul.mubr.bf16.gmra.mrb[4].mxu1 %v2353_v38  ;;  %v2449_v38 = vld [vmem:[%s2754_s16 + $0x220] ss:$16 sps:$4 sm:$0xff]  }
  0x4f   : > { %1266 = vmatprep.mubr.bf16.mxu1 %v2356_v39  ;;  %v2452_v39 = vld [vmem:[%s2754_s16 + $0x244] ss:$16 sps:$4 sm:$0xff]  }
  0x52   : > { %1580 = vmatmul.mubr.bf16.gmra.mrb[20].mxu0 %v2376_v44  ;;  %v2472_v44 = vld [vmem:[%s2754_s16 + $0x2a8] ss:$16 sps:$4 sm:$0xff]  }
  0x53   : > { %2151 = vmatprep.mubr.msk.bf16.mxu0 %vm1121_vm0, %v2378_v45  ;;  %v2474_v45 = vld [vmem:[%s2754_s16 + $0x2cc] ss:$16 sps:$4 sm:$0xff]  }
  0x56   : > { %1267 = vmatmul.mubr.bf16.gmra.mrb[8].mxu1 %v2359_v42  ;;  %v2455_v42 = vld [vmem:[%s2754_s16 + $0x240] ss:$16 sps:$4 sm:$0xff]  }
  0x57   : > { %1274 = vmatprep.mubr.bf16.mxu1 %v2362_v43  ;;  %v2458_v43 = vld [vmem:[%s2754_s16 + $0x264] ss:$16 sps:$4 sm:$0xff]  }
  0x5a   : > { %1588 = vmatmul.mubr.bf16.gmra.mrb[24].mxu0 %v2382_v48  ;;  %v2478_v48 = vld [vmem:[%s2754_s16 + $0x2c8] ss:$16 sps:$4 sm:$0xff]  }
  0x5b   : > { %2152 = vmatprep.mubr.msk.bf16.mxu0 %vm1121_vm0, %v2384_v49  ;;  %v2480_v49 = vld [vmem:[%s2754_s16 + $0x2ec] ss:$16 sps:$4 sm:$0xff]  }
  0x5e   : > { %1275 = vmatmul.mubr.bf16.gmra.mrb[12].mxu1 %v2365_v46  ;;  %v2461_v46 = vld [vmem:[%s2754_s16 + $0x260] ss:$16 sps:$4 sm:$0xff]  }
  0x5f   : > { %1282 = vmatprep.mubr.bf16.mxu1 %v2368_v47  ;;  %v2464_v47 = vld [vmem:[%s2754_s16 + $0x284] ss:$16 sps:$4 sm:$0xff]  }
  0x62   : > { %1596 = vmatmul.mubr.bf16.gmra.mrb[28].mxu0 %v2388_v52  ;;  %v2484_v52 = vld [vmem:[%s2754_s16 + $0x2e8] ss:$16 sps:$4 sm:$0xff]  }
  0x63   : > { %2153 = vmatprep.mubr.msk.bf16.mxu0 %vm1121_vm0, %v2390_v53  ;;  %v2486_v53 = vld [vmem:[%s2754_s16 + $0x30c] ss:$16 sps:$4 sm:$0xff]  }
  0x66   : > { %1283 = vmatmul.mubr.bf16.gmra.mrb[16].mxu1 %v2371_v50  ;;  %v2467_v50 = vld [vmem:[%s2754_s16 + $0x280] ss:$16 sps:$4 sm:$0xff]  }
  0x67   : > { %1290 = vmatprep.mubr.bf16.mxu1 %v2374_v51  ;;  %v2470_v51 = vld [vmem:[%s2754_s16 + $0x2a4] ss:$16 sps:$4 sm:$0xff]  }
  0x6a   : > { %1604 = vmatmul.mubr.bf16.gmra.mrb[32].mxu0 %v2394_v56  ;;  %v2490_v56 = vld [vmem:[%s2754_s16 + $0x308] ss:$16 sps:$4 sm:$0xff]  }
  0x6b   : > { %2154 = vmatprep.mubr.msk.bf16.mxu0 %vm1121_vm0, %v2396_v57  ;;  %v2492_v57 = vld [vmem:[%s2754_s16 + $0x32c] ss:$16 sps:$4 sm:$0xff]  }
  0x6e   : > { %1291 = vmatmul.mubr.bf16.gmra.mrb[20].mxu1 %v2377_v54  ;;  %v2473_v54 = vld [vmem:[%s2754_s16 + $0x2a0] ss:$16 sps:$4 sm:$0xff]  }
  0x6f   : > { %1298 = vmatprep.mubr.bf16.mxu1 %v2380_v55  ;;  %v2476_v55 = vld [vmem:[%s2754_s16 + $0x2c4] ss:$16 sps:$4 sm:$0xff]  }
  0x72   : > { %1612 = vmatmul.mubr.bf16.gmra.mrb[36].mxu0 %v2400_v60  ;;  %v2496_v60 = vld [vmem:[%s2754_s16 + $0x328] ss:$16 sps:$4 sm:$0xff]  }
  0x73   : > { %2155 = vmatprep.mubr.msk.bf16.mxu0 %vm1121_vm0, %v2402_v61  ;;  %v2498_v61 = vld [vmem:[%s2754_s16 + $0x34c] ss:$16 sps:$4 sm:$0xff]  }
  0x76   : > { %1299 = vmatmul.mubr.bf16.gmra.mrb[24].mxu1 %v2383_v58  ;;  %v2479_v58 = vld [vmem:[%s2754_s16 + $0x2c0] ss:$16 sps:$4 sm:$0xff]  }
  0x77   : > { %1306 = vmatprep.mubr.bf16.mxu1 %v2386_v59  ;;  %v2482_v59 = vld [vmem:[%s2754_s16 + $0x2e4] ss:$16 sps:$4 sm:$0xff]  }
  0x7a   : > { %1620 = vmatmul.mubr.bf16.gmra.mrb[40].mxu0 %v2406_v0  ;;  %v2502_v0 = vld [vmem:[%s2754_s16 + $0x348] ss:$16 sps:$4 sm:$0xff]  }
  0x7b   : > { %2156 = vmatprep.mubr.msk.bf16.mxu0 %vm1121_vm0, %v2408_v1  ;;  %v2504_v1 = vld [vmem:[%s2754_s16 + $0x36c] ss:$16 sps:$4 sm:$0xff]  }
  0x7e   : > { %1307 = vmatmul.mubr.bf16.gmra.mrb[28].mxu1 %v2389_v62  ;;  %v2485_v62 = vld [vmem:[%s2754_s16 + $0x2e0] ss:$16 sps:$4 sm:$0xff]  }
  0x7f   : > { %1314 = vmatprep.mubr.bf16.mxu1 %v2392_v63  ;;  %v2488_v63 = vld [vmem:[%s2754_s16 + $0x304] ss:$16 sps:$4 sm:$0xff]  }
  0x82   : > { %1628 = vmatmul.mubr.bf16.gmra.mrb[44].mxu0 %v2412_v4 }
  0x83   : > { %2157 = vmatprep.mubr.msk.bf16.mxu0 %vm1121_vm0, %v2414_v5 }
  0x86   : > { %1315 = vmatmul.mubr.bf16.gmra.mrb[32].mxu1 %v2395_v2  ;;  %v2491_v2 = vld [vmem:[%s2754_s16 + $0x300] ss:$16 sps:$4 sm:$0xff]  }
  0x87   : > { %1322 = vmatprep.mubr.bf16.mxu1 %v2398_v3  ;;  %v2494_v3 = vld [vmem:[%s2754_s16 + $0x324] ss:$16 sps:$4 sm:$0xff]  }
  0x8a   : > { %1636 = vmatmul.mubr.bf16.gmra.mrb[48].mxu0 %v2418_v8  ;;  %v2510_v8 = vld [vmem:[%s2754_s16 + $0x38c] ss:$16 sps:$4 sm:$0xff]  }
  0x8b   : > { %2158 = vmatprep.mubr.msk.bf16.mxu0 %vm1121_vm0, %v2420_v9 }
  0x8e   : > { %1323 = vmatmul.mubr.bf16.gmra.mrb[36].mxu1 %v2401_v6  ;;  %v2508_v6 = vld [vmem:[%s2754_s16 + $0x368] ss:$16 sps:$4 sm:$0xff]  }
  0x8f   : > { %1330 = vmatprep.mubr.bf16.mxu1 %v2404_v7 }
  0x92   : > { %1644 = vmatmul.mubr.bf16.gmra.mrb[52].mxu0 %v2424_v12 }
  0x93   : > { %2159 = vmatprep.mubr.msk.bf16.mxu0 %vm1121_vm0, %v2426_v13 }
  0x96   : > { %1331 = vmatmul.mubr.bf16.gmra.mrb[40].mxu1 %v2407_v10  ;;  %v2497_v10 = vld [vmem:[%s2754_s16 + $0x320] ss:$16 sps:$4 sm:$0xff]  }
  0x97   : > { %1338 = vmatprep.mubr.bf16.mxu1 %v2410_v11  ;;  %v2500_v11 = vld [vmem:[%s2754_s16 + $0x344] ss:$16 sps:$4 sm:$0xff]  }
  0x9a   : > { %1652 = vmatmul.mubr.bf16.gmra.mrb[56].mxu0 %v2430_v16  ;;  %v2516_v16 = vld [vmem:[%s2754_s16 + $0x3ac] ss:$16 sps:$4 sm:$0xff]  }
  0x9b   : > { %2160 = vmatprep.mubr.msk.bf16.mxu0 %vm1121_vm0, %v2432_v17 }
  0x9e   : > { %1339 = vmatmul.mubr.bf16.gmra.mrb[44].mxu1 %v2413_v14  ;;  %v2514_v14 = vld [vmem:[%s2754_s16 + $0x388] ss:$16 sps:$4 sm:$0xff]  }
  0x9f   : > { %1346 = vmatprep.mubr.bf16.mxu1 %v2416_v15 }
  0xa2   : > { %1660 = vmatmul.mubr.bf16.gmra.mrb[60].mxu0 %v2436_v20 }
  0xa3   : > { %2161 = vmatprep.mubr.msk.bf16.mxu0 %vm1121_vm0, %v2438_v21 }
  0xa6   : > { %1347 = vmatmul.mubr.bf16.gmra.mrb[48].mxu1 %v2419_v18  ;;  %v2503_v18 = vld [vmem:[%s2754_s16 + $0x340] ss:$16 sps:$4 sm:$0xff]  }
  0xa7   : > { %1354 = vmatprep.mubr.bf16.mxu1 %v2422_v19  ;;  %v2506_v19 = vld [vmem:[%s2754_s16 + $0x364] ss:$16 sps:$4 sm:$0xff]  }
  0xaa   : > { %1668 = vmatmul.mubr.bf16.gmra.mrb[64].mxu0 %v2442_v24  ;;  %v2522_v24 = vld [vmem:[%s2754_s16 + $0x3cc] ss:$16 sps:$4 sm:$0xff]  }
  0xab   : > { %2162 = vmatprep.mubr.msk.bf16.mxu0 %vm1121_vm0, %v2444_v25  ;;  %v2961_v25 = vld [vmem:[%s3199_s2] ss:$0 sm:$0xff] }
  0xae   : > { %1355 = vmatmul.mubr.bf16.gmra.mrb[52].mxu1 %v2425_v22  ;;  %v2520_v22 = vld [vmem:[%s2754_s16 + $0x3a8] ss:$16 sps:$4 sm:$0xff]  }
  0xaf   : > { %1362 = vmatprep.mubr.bf16.mxu1 %v2428_v23 }
  0xb2   : > { %1676 = vmatmul.mubr.bf16.gmra.mrb[68].mxu0 %v2448_v28 }
  0xb3   : > { %2163 = vmatprep.mubr.msk.bf16.mxu0 %vm1121_vm0, %v2450_v29 }
  0xb6   : > { %1363 = vmatmul.mubr.bf16.gmra.mrb[56].mxu1 %v2431_v26 }
  0xb7   : > { %1370 = vmatprep.mubr.bf16.mxu1 %v2434_v27 }
  0xba   : > { %1684 = vmatmul.mubr.bf16.gmra.mrb[72].mxu0 %v2454_v32  ;;  %v2512_v32 = vld [vmem:[%s2754_s16 + $0x384] ss:$16 sps:$4 sm:$0xff]  }
  0xbb   : > { %2164 = vmatprep.mubr.msk.bf16.mxu0 %vm1121_vm0, %v2456_v33 }
  0xbe   : > { %1371 = vmatmul.mubr.bf16.gmra.mrb[60].mxu1 %v2437_v30  ;;  %v2509_v30 = vld [vmem:[%s2754_s16 + $0x360] ss:$16 sps:$4 sm:$0xff]  }
  0xbf   : > { %1378 = vmatprep.mubr.bf16.mxu1 %v2440_v31 }
  0xc2   : > { %1692 = vmatmul.mubr.bf16.gmra.mrb[76].mxu0 %v2460_v36 }
  0xc3   : > { %2165 = vmatprep.mubr.msk.bf16.mxu0 %vm1121_vm0, %v2462_v37 }
  0xc6   : > { %1379 = vmatmul.mubr.bf16.gmra.mrb[64].mxu1 %v2443_v34 }
  0xc7   : > { %1386 = vmatprep.mubr.bf16.mxu1 %v2446_v35 }
  0xca   : > { %1700 = vmatmul.mubr.bf16.gmra.mrb[80].mxu0 %v2466_v40 }
  0xcb   : > { %2166 = vmatprep.mubr.msk.bf16.mxu0 %vm1121_vm0, %v2468_v41  ;;  %v2528_v41 = vld [vmem:[%s2754_s16 + $0x3ec] ss:$16 sps:$4 sm:$0xff]  }
  0xce   : > { %1387 = vmatmul.mubr.bf16.gmra.mrb[68].mxu1 %v2449_v38  ;;  %v2526_v38 = vld [vmem:[%s2754_s16 + $0x3c8] ss:$16 sps:$4 sm:$0xff]  }
  0xcf   : > { %1394 = vmatprep.mubr.bf16.mxu1 %v2452_v39 }
  0xd2   : > { %1708 = vmatmul.mubr.bf16.gmra.mrb[84].mxu0 %v2472_v44 }
  0xd3   : > { %2167 = vmatprep.mubr.msk.bf16.mxu0 %vm1121_vm0, %v2474_v45 }
  0xd6   : > { %1395 = vmatmul.mubr.bf16.gmra.mrb[72].mxu1 %v2455_v42 }
  0xd7   : > { %1402 = vmatprep.mubr.bf16.mxu1 %v2458_v43 }
  0xda   : > { %1716 = vmatmul.mubr.bf16.gmra.mrb[88].mxu0 %v2478_v48  ;;  %v2518_v48 = vld [vmem:[%s2754_s16 + $0x3a4] ss:$16 sps:$4 sm:$0xff]  }
  0xdb   : > { %2168 = vmatprep.mubr.msk.bf16.mxu0 %vm1121_vm0, %v2480_v49 }
  0xde   : > { %1403 = vmatmul.mubr.bf16.gmra.mrb[76].mxu1 %v2461_v46  ;;  %v2515_v46 = vld [vmem:[%s2754_s16 + $0x380] ss:$16 sps:$4 sm:$0xff]  }
  0xdf   : > { %1410 = vmatprep.mubr.bf16.mxu1 %v2464_v47 }
  0xe2   : > { %1724 = vmatmul.mubr.bf16.gmra.mrb[92].mxu0 %v2484_v52 }
  0xe3   : > { %2169 = vmatprep.mubr.msk.bf16.mxu0 %vm1121_vm0, %v2486_v53 }
  0xe6   : > { %1411 = vmatmul.mubr.bf16.gmra.mrb[80].mxu1 %v2467_v50 }
  0xe7   : > { %1418 = vmatprep.mubr.bf16.mxu1 %v2470_v51 }
  0xea   : > { %1732 = vmatmul.mubr.bf16.gmra.mrb[96].mxu0 %v2490_v56 }
  0xeb   : > { %2170 = vmatprep.mubr.msk.bf16.mxu0 %vm1121_vm0, %v2492_v57 }
  0xee   : > { %1419 = vmatmul.mubr.bf16.gmra.mrb[84].mxu1 %v2473_v54  ;;  %v2532_v54 = vld [vmem:[%s2754_s16 + $0x3e8] ss:$16 sps:$4 sm:$0xff]  }
  0xef   : > { %1426 = vmatprep.mubr.bf16.mxu1 %v2476_v55 }
  0xf2   : > { %1740 = vmatmul.mubr.bf16.gmra.mrb[100].mxu0 %v2496_v60 }
  0xf3   : > { %2171 = vmatprep.mubr.msk.bf16.mxu0 %vm1121_vm0, %v2498_v61 }
  0xf6   : > { %1427 = vmatmul.mubr.bf16.gmra.mrb[88].mxu1 %v2479_v58 }
  0xf7   : > { %1434 = vmatprep.mubr.bf16.mxu1 %v2482_v59 }
  0xfa   : > { %1748 = vmatmul.mubr.bf16.gmra.mrb[104].mxu0 %v2502_v0 }
  0xfb   : > { %2172 = vmatprep.mubr.msk.bf16.mxu0 %vm1121_vm0, %v2504_v1  ;;  %v2524_v1 = vld [vmem:[%s2754_s16 + $0x3c4] ss:$16 sps:$4 sm:$0xff]  }
  0xfd   : > { %v1541_v4 = vpop.f32.mrb[0].mxu0 }
  0xfe   : > { %1435 = vmatmul.mubr.bf16.gmra.mrb[92].mxu1 %v2485_v62  ;;  %v1543_v5 = vpop.f32.mrb[1].mxu0 }
  0xff   : > { %1442 = vmatprep.mubr.bf16.mxu1 %v2488_v63  ;;  %v1544_v7 = vpop.f32.mrb[2].mxu0  ;;  %v2521_v63 = vld [vmem:[%s2754_s16 + $0x3a0] ss:$16 sps:$4 sm:$0xff]  }
 0x100   : > { %v1546_v9 = vpop.f32.mrb[3].mxu0 }
 0x102   : > { %1756 = vmatmul.mubr.bf16.gmra.mrb[108].mxu0 %v2508_v6 }
 0x103   : > { %2173 = vmatprep.mubr.msk.bf16.mxu0 %vm1121_vm0, %v2510_v8 }
 0x105   : > { %v1549_v12 = vpop.f32.mrb[4].mxu0 }
 0x106   : > { %1443 = vmatmul.mubr.bf16.gmra.mrb[96].mxu1 %v2491_v2  ;;  %v1551_v13 = vpop.f32.mrb[5].mxu0 }
 0x107   : > { %1450 = vmatprep.mubr.bf16.mxu1 %v2494_v3  ;;  %v1552_v15 = vpop.f32.mrb[6].mxu0 }
 0x108   : > { %v1554_v17 = vpop.f32.mrb[7].mxu0 }
 0x109   : > { %v2530_v17 = vld [vmem:[%s2754_s16 + $0x3e4] ss:$16 sps:$4 sm:$0xff]  }
 0x10a   : > { %1764 = vmatmul.mubr.bf16.gmra.mrb[112].mxu0 %v2514_v14 }
 0x10b   : > { %2174 = vmatprep.mubr.msk.bf16.mxu0 %vm1121_vm0, %v2516_v16 }
 0x10d   : > { %v2952_v20 = vpop.f32.mrb[8].mxu0 }
 0x10e   : > { %1451 = vmatmul.mubr.bf16.gmra.mrb[100].mxu1 %v2497_v10  ;;  %v1559_v21 = vpop.f32.mrb[9].mxu0 }
 0x10f   : > { %1458 = vmatprep.mubr.bf16.mxu1 %v2500_v11  ;;  %v2955_v23 = vpop.f32.mrb[10].mxu0 }
 0x110   : > { %v1562_v26 = vpop.f32.mrb[11].mxu0 }
 0x112   : > { %1772 = vmatmul.mubr.bf16.gmra.mrb[116].mxu0 %v2520_v22 }
 0x113   : > { %2175 = vmatprep.mubr.msk.bf16.mxu0 %vm1121_vm0, %v2522_v24 }
 0x115   : > { %v2968_v36 = vpop.f32.mrb[12].mxu0 }
 0x116   : > { %1459 = vmatmul.mubr.bf16.gmra.mrb[104].mxu1 %v2503_v18  ;;  %v1567_v37 = vpop.f32.mrb[13].mxu0 }
 0x117   : > { %1466 = vmatprep.mubr.bf16.mxu1 %v2506_v19  ;;  %v2971_v40 = vpop.f32.mrb[14].mxu0 }
 0x118   : > { %v1570_v42 = vpop.f32.mrb[15].mxu0 }
 0x119   : > { %v1252_v27 = vpop.f32.mrb[0].mxu1 }
 0x11a   : > { %v1253_v28 = vadd.f32 %v2961_v25, %v1252_v27  ;;  %v1254_v29 = vpop.f32.mrb[1].mxu1  ;;  %1780 = vmatmul.mubr.bf16.gmra.mrb[120].mxu0 %v2526_v38 }
 0x11b   : > { %v1255_v31 = vpop.f32.mrb[2].mxu1  ;;  %2176 = vmatprep.mubr.msk.bf16.mxu0 %vm1121_vm0, %v2528_v41 }
 0x11c   : > { %v1542_v33 = vadd.f32 %v1541_v4, %v1253_v28  ;;  %v1256_v34 = vadd.f32 %v2961_v25, %v1255_v31  ;;  %v1257_v35 = vpop.f32.mrb[3].mxu1 }
 0x11d   : > { %v2980_v52 = vpop.f32.mrb[16].mxu0 }
 0x11e   : > { %2534 = vtanh.f32 %v1542_v33  ;;  %v1545_v39 = vadd.f32 %v1544_v7, %v1256_v34  ;;  %1467 = vmatmul.mubr.bf16.gmra.mrb[108].mxu1 %v2509_v30  ;;  %v1575_v53 = vpop.f32.mrb[17].mxu0 }
 0x11f   : > { %1474 = vmatprep.mubr.bf16.mxu1 %v2512_v32  ;;  %v2988_v56 = vpop.f32.mrb[18].mxu0  ;;  %v2533_v32 = vld [vmem:[%s2754_s16 + $0x3e0] ss:$16 sps:$4 sm:$0xff]  }
 0x120   : > { %2536 = vtanh.f32 %v1545_v39  ;;  %v1578_v57 = vpop.f32.mrb[19].mxu0 }
 0x121   : > { %v1260_v43 = vpop.f32.mrb[4].mxu1 }
 0x122   : > { %v1261_v44 = vadd.f32 %v2961_v25, %v1260_v43  ;;  %v1262_v45 = vpop.f32.mrb[5].mxu1  ;;  %1788 = vmatmul.mubr.bf16.gmra.mrb[124].mxu0 %v2532_v54 }
 0x123   : > { %v1263_v47 = vpop.f32.mrb[6].mxu1 }
 0x124   : > { %v1550_v49 = vadd.f32 %v1549_v12, %v1261_v44  ;;  %v1264_v50 = vadd.f32 %v2961_v25, %v1263_v47  ;;  %v1265_v51 = vpop.f32.mrb[7].mxu1 }
 0x125   : > { %v1581_v5 = vpop.f32.mrb[20].mxu0 }
 0x126   : > { %2538 = vtanh.f32 %v1550_v49  ;;  %v1553_v55 = vadd.f32 %v1552_v15, %v1264_v50  ;;  %1475 = vmatmul.mubr.bf16.gmra.mrb[112].mxu1 %v2515_v46  ;;  %v1583_v6 = vpop.f32.mrb[21].mxu0  ;;  %v2527_v15 = vld [vmem:[%s2754_s16 + $0x3c0] ss:$16 sps:$4 sm:$0xff]  }
 0x127   : > { %1482 = vmatprep.mubr.bf16.mxu1 %v2518_v48  ;;  %v1584_v8 = vpop.f32.mrb[22].mxu0 }
 0x128   : > { %v2535_v58 = vpop.eup %2534  ;;  %2540 = vtanh.f32 %v1553_v55  ;;  %v1586_v9 = vpop.f32.mrb[23].mxu0 }
 0x129   : > { %1861 = vst.msk [vmem:[%s2986_s25] sm:$0xff] %vm1860_vm1, %v2535_v58  ;;  %v1268_v59 = vpop.f32.mrb[8].mxu1 }
 0x12a   : > { %v2537_v60 = vpop.eup %2536  ;;  %v1269_v61 = vadd.f32 %v2961_v25, %v1268_v59  ;;  %v1270_v62 = vpop.f32.mrb[9].mxu1 }
 0x12b   : > { %1862 = vst.msk [vmem:[%s2986_s25 + $0x8] sm:$0xff] %vm1860_vm1, %v2537_v60  ;;  %v1271_v0 = vpop.f32.mrb[10].mxu1 }
 0x12c   : > { %v1558_v2 = vadd.f32 %v2952_v20, %v1269_v61  ;;  %v1272_v3 = vadd.f32 %v2961_v25, %v1271_v0  ;;  %v1273_v4 = vpop.f32.mrb[11].mxu1 }
 0x12d   : > { %v1589_v21 = vpop.f32.mrb[24].mxu0 }
 0x12e   : > { %2542 = vtanh.f32 %v1558_v2  ;;  %v1561_v7 = vadd.f32 %v2955_v23, %v1272_v3  ;;  %1483 = vmatmul.mubr.bf16.gmra.mrb[116].mxu1 %v2521_v63  ;;  %v1591_v22 = vpop.f32.mrb[25].mxu0 }
 0x12f   : > { %1490 = vmatprep.mubr.bf16.mxu1 %v2524_v1  ;;  %v1592_v24 = vpop.f32.mrb[26].mxu0 }
 0x130   : > { %v2539_v10 = vpop.eup %2538  ;;  %2544 = vtanh.f32 %v1561_v7  ;;  %v1594_v26 = vpop.f32.mrb[27].mxu0 }
 0x131   : > { %1863 = vst.msk [vmem:[%s2986_s25 + $0x10] sm:$0xff] %vm1860_vm1, %v2539_v10  ;;  %v1276_v11 = vpop.f32.mrb[12].mxu1 }
 0x132   : > { %v2541_v12 = vpop.eup %2540  ;;  %v1277_v13 = vadd.f32 %v2961_v25, %v1276_v11  ;;  %v1278_v14 = vpop.f32.mrb[13].mxu1 }
 0x133   : > { %1864 = vst.msk [vmem:[%s2986_s25 + $0x18] sm:$0xff] %vm1860_vm1, %v2541_v12  ;;  %v1279_v16 = vpop.f32.mrb[14].mxu1 }
 0x134   : > { %v1566_v18 = vadd.f32 %v2968_v36, %v1277_v13  ;;  %v1280_v19 = vadd.f32 %v2961_v25, %v1279_v16  ;;  %v1281_v20 = vpop.f32.mrb[15].mxu1 }
 0x135   : > { %v1597_v37 = vpop.f32.mrb[28].mxu0 }
 0x136   : > { %2546 = vtanh.f32 %v1566_v18  ;;  %v1569_v23 = vadd.f32 %v2971_v40, %v1280_v19  ;;  %1491 = vmatmul.mubr.bf16.gmra.mrb[120].mxu1 %v2527_v15  ;;  %v1599_v38 = vpop.f32.mrb[29].mxu0 }
 0x137   : > { %1498 = vmatprep.mubr.bf16.mxu1 %v2530_v17  ;;  %v1600_v40 = vpop.f32.mrb[30].mxu0 }
 0x138   : > { %v2543_v27 = vpop.eup %2542  ;;  %2548 = vtanh.f32 %v1569_v23  ;;  %v1602_v41 = vpop.f32.mrb[31].mxu0 }
 0x139   : > { %1865 = vst.msk [vmem:[%s2986_s25 + $0x20] sm:$0xff] %vm1860_vm1, %v2543_v27  ;;  %v1284_v28 = vpop.f32.mrb[16].mxu1 }
 0x13a   : > { %v2545_v29 = vpop.eup %2544  ;;  %v1285_v30 = vadd.f32 %v2961_v25, %v1284_v28  ;;  %v1286_v31 = vpop.f32.mrb[17].mxu1 }
 0x13b   : > { %1866 = vst.msk [vmem:[%s2986_s25 + $0x28] sm:$0xff] %vm1860_vm1, %v2545_v29  ;;  %v1287_v33 = vpop.f32.mrb[18].mxu1 }
 0x13c   : > { %v1574_v34 = vadd.f32 %v2980_v52, %v1285_v30  ;;  %v1288_v35 = vadd.f32 %v2961_v25, %v1287_v33  ;;  %v1289_v36 = vpop.f32.mrb[19].mxu1 }
 0x13d   : > { %v1605_v51 = vpop.f32.mrb[32].mxu0 }
 0x13e   : > { %2550 = vtanh.f32 %v1574_v34  ;;  %v1577_v39 = vadd.f32 %v2988_v56, %v1288_v35  ;;  %1499 = vmatmul.mubr.bf16.gmra.mrb[124].mxu1 %v2533_v32  ;;  %v1607_v52 = vpop.f32.mrb[33].mxu0 }
 0x13f   : > { %v1608_v54 = vpop.f32.mrb[34].mxu0 }
 0x140   : > { %v2547_v42 = vpop.eup %2546  ;;  %2552 = vtanh.f32 %v1577_v39  ;;  %v1610_v55 = vpop.f32.mrb[35].mxu0 }
 0x141   : > { %1867 = vst.msk [vmem:[%s2986_s25 + $0x30] sm:$0xff] %vm1860_vm1, %v2547_v42  ;;  %v1292_v43 = vpop.f32.mrb[20].mxu1 }
 0x142   : > { %v2549_v44 = vpop.eup %2548  ;;  %v1293_v45 = vadd.f32 %v2961_v25, %v1292_v43  ;;  %v1294_v46 = vpop.f32.mrb[21].mxu1 }
 0x143   : > { %1868 = vst.msk [vmem:[%s2986_s25 + $0x38] sm:$0xff] %vm1860_vm1, %v2549_v44  ;;  %v1295_v47 = vpop.f32.mrb[22].mxu1 }
 0x144   : > { %v1582_v48 = vadd.f32 %v1581_v5, %v1293_v45  ;;  %v1296_v49 = vadd.f32 %v2961_v25, %v1295_v47  ;;  %v1297_v50 = vpop.f32.mrb[23].mxu1 }
 0x145   : > { %v1613_v1 = vpop.f32.mrb[36].mxu0 }
 0x146   : > { %2554 = vtanh.f32 %v1582_v48  ;;  %v1585_v53 = vadd.f32 %v1584_v8, %v1296_v49  ;;  %v1615_v2 = vpop.f32.mrb[37].mxu0 }
 0x147   : > { %v1616_v4 = vpop.f32.mrb[38].mxu0 }
 0x148   : > { %v2551_v56 = vpop.eup %2550  ;;  %2556 = vtanh.f32 %v1585_v53  ;;  %v1618_v5 = vpop.f32.mrb[39].mxu0 }
 0x149   : > { %1869 = vst.msk [vmem:[%s2986_s25 + $0x40] sm:$0xff] %vm1860_vm1, %v2551_v56  ;;  %v1300_v57 = vpop.f32.mrb[24].mxu1 }
 0x14a   : > { %v2553_v58 = vpop.eup %2552  ;;  %v1301_v59 = vadd.f32 %v2961_v25, %v1300_v57  ;;  %v1302_v60 = vpop.f32.mrb[25].mxu1 }
 0x14b   : > { %1870 = vst.msk [vmem:[%s2986_s25 + $0x48] sm:$0xff] %vm1860_vm1, %v2553_v58  ;;  %v1303_v61 = vpop.f32.mrb[26].mxu1 }
 0x14c   : > { %v1590_v62 = vadd.f32 %v1589_v21, %v1301_v59  ;;  %v1304_v63 = vadd.f32 %v2961_v25, %v1303_v61  ;;  %v1305_v0 = vpop.f32.mrb[27].mxu1 }
 0x14d   : > { %v1621_v15 = vpop.f32.mrb[40].mxu0 }
 0x14e   : > { %2558 = vtanh.f32 %v1590_v62  ;;  %v1593_v3 = vadd.f32 %v1592_v24, %v1304_v63  ;;  %v1623_v16 = vpop.f32.mrb[41].mxu0 }
 0x14f   : > { %v1624_v18 = vpop.f32.mrb[42].mxu0 }
 0x150   : > { %v2555_v6 = vpop.eup %2554  ;;  %2560 = vtanh.f32 %v1593_v3  ;;  %v1626_v19 = vpop.f32.mrb[43].mxu0 }
 0x151   : > { %1871 = vst.msk [vmem:[%s2986_s25 + $0x50] sm:$0xff] %vm1860_vm1, %v2555_v6  ;;  %v1308_v7 = vpop.f32.mrb[28].mxu1 }
 0x152   : > { %v2557_v8 = vpop.eup %2556  ;;  %v1309_v9 = vadd.f32 %v2961_v25, %v1308_v7  ;;  %v1310_v10 = vpop.f32.mrb[29].mxu1 }
 0x153   : > { %1872 = vst.msk [vmem:[%s2986_s25 + $0x58] sm:$0xff] %vm1860_vm1, %v2557_v8  ;;  %v1311_v11 = vpop.f32.mrb[30].mxu1 }
 0x154   : > { %v1598_v12 = vadd.f32 %v1597_v37, %v1309_v9  ;;  %v1312_v13 = vadd.f32 %v2961_v25, %v1311_v11  ;;  %v1313_v14 = vpop.f32.mrb[31].mxu1 }
 0x155   : > { %v1629_v30 = vpop.f32.mrb[44].mxu0 }
 0x156   : > { %2562 = vtanh.f32 %v1598_v12  ;;  %v1601_v17 = vadd.f32 %v1600_v40, %v1312_v13  ;;  %v1631_v31 = vpop.f32.mrb[45].mxu0 }
 0x157   : > { %v1632_v33 = vpop.f32.mrb[46].mxu0 }
 0x158   : > { %v2559_v20 = vpop.eup %2558  ;;  %2564 = vtanh.f32 %v1601_v17  ;;  %v1634_v34 = vpop.f32.mrb[47].mxu0 }
 0x159   : > { %1873 = vst.msk [vmem:[%s2986_s25 + $0x60] sm:$0xff] %vm1860_vm1, %v2559_v20  ;;  %v1316_v21 = vpop.f32.mrb[32].mxu1 }
 0x15a   : > { %v2561_v22 = vpop.eup %2560  ;;  %v1317_v23 = vadd.f32 %v2961_v25, %v1316_v21  ;;  %v1318_v24 = vpop.f32.mrb[33].mxu1 }
 0x15b   : > { %1874 = vst.msk [vmem:[%s2986_s25 + $0x68] sm:$0xff] %vm1860_vm1, %v2561_v22  ;;  %v1319_v26 = vpop.f32.mrb[34].mxu1 }
 0x15c   : > { %v1606_v27 = vadd.f32 %v1605_v51, %v1317_v23  ;;  %v1320_v28 = vadd.f32 %v2961_v25, %v1319_v26  ;;  %v1321_v29 = vpop.f32.mrb[35].mxu1 }
 0x15d   : > { %v1637_v44 = vpop.f32.mrb[48].mxu0 }
 0x15e   : > { %2566 = vtanh.f32 %v1606_v27  ;;  %v1609_v32 = vadd.f32 %v1608_v54, %v1320_v28  ;;  %v1639_v45 = vpop.f32.mrb[49].mxu0 }
 0x15f   : > { %v1640_v47 = vpop.f32.mrb[50].mxu0 }
 0x160   : > { %v2563_v35 = vpop.eup %2562  ;;  %2568 = vtanh.f32 %v1609_v32  ;;  %v1642_v48 = vpop.f32.mrb[51].mxu0 }
 0x161   : > { %1875 = vst.msk [vmem:[%s2986_s25 + $0x70] sm:$0xff] %vm1860_vm1, %v2563_v35  ;;  %v1324_v36 = vpop.f32.mrb[36].mxu1 }
 0x162   : > { %v2565_v37 = vpop.eup %2564  ;;  %v1325_v38 = vadd.f32 %v2961_v25, %v1324_v36  ;;  %v1326_v39 = vpop.f32.mrb[37].mxu1 }
 0x163   : > { %1876 = vst.msk [vmem:[%s2986_s25 + $0x78] sm:$0xff] %vm1860_vm1, %v2565_v37  ;;  %v1327_v40 = vpop.f32.mrb[38].mxu1 }
 0x164   : > { %v1614_v41 = vadd.f32 %v1613_v1, %v1325_v38  ;;  %v1328_v42 = vadd.f32 %v2961_v25, %v1327_v40  ;;  %v1329_v43 = vpop.f32.mrb[39].mxu1 }
 0x165   : > { %v1645_v58 = vpop.f32.mrb[52].mxu0 }
 0x166   : > { %2570 = vtanh.f32 %v1614_v41  ;;  %v1617_v46 = vadd.f32 %v1616_v4, %v1328_v42  ;;  %v1647_v59 = vpop.f32.mrb[53].mxu0 }
 0x167   : > { %v1648_v61 = vpop.f32.mrb[54].mxu0 }
 0x168   : > { %v2567_v49 = vpop.eup %2566  ;;  %2572 = vtanh.f32 %v1617_v46  ;;  %v1650_v62 = vpop.f32.mrb[55].mxu0 }
 0x169   : > { %1877 = vst.msk [vmem:[%s2986_s25 + $0x80] sm:$0xff] %vm1860_vm1, %v2567_v49  ;;  %v1332_v50 = vpop.f32.mrb[40].mxu1 }
 0x16a   : > { %v2569_v51 = vpop.eup %2568  ;;  %v1333_v52 = vadd.f32 %v2961_v25, %v1332_v50  ;;  %v1334_v53 = vpop.f32.mrb[41].mxu1 }
 0x16b   : > { %1878 = vst.msk [vmem:[%s2986_s25 + $0x88] sm:$0xff] %vm1860_vm1, %v2569_v51  ;;  %v1335_v54 = vpop.f32.mrb[42].mxu1 }
 0x16c   : > { %v1622_v55 = vadd.f32 %v1621_v15, %v1333_v52  ;;  %v1336_v56 = vadd.f32 %v2961_v25, %v1335_v54  ;;  %v1337_v57 = vpop.f32.mrb[43].mxu1 }
 0x16d   : > { %v1653_v8 = vpop.f32.mrb[56].mxu0 }
 0x16e   : > { %2574 = vtanh.f32 %v1622_v55  ;;  %v1625_v60 = vadd.f32 %v1624_v18, %v1336_v56  ;;  %v1655_v9 = vpop.f32.mrb[57].mxu0 }
 0x16f   : > { %v1656_v11 = vpop.f32.mrb[58].mxu0 }
 0x170   : > { %v2571_v63 = vpop.eup %2570  ;;  %2576 = vtanh.f32 %v1625_v60  ;;  %v1658_v12 = vpop.f32.mrb[59].mxu0 }
 0x171   : > { %1879 = vst.msk [vmem:[%s2986_s25 + $0x90] sm:$0xff] %vm1860_vm1, %v2571_v63  ;;  %v1340_v0 = vpop.f32.mrb[44].mxu1 }
 0x172   : > { %v2573_v1 = vpop.eup %2572  ;;  %v1341_v2 = vadd.f32 %v2961_v25, %v1340_v0  ;;  %v1342_v3 = vpop.f32.mrb[45].mxu1 }
 0x173   : > { %1880 = vst.msk [vmem:[%s2986_s25 + $0x98] sm:$0xff] %vm1860_vm1, %v2573_v1  ;;  %v1343_v4 = vpop.f32.mrb[46].mxu1 }
 0x174   : > { %v1630_v5 = vadd.f32 %v1629_v30, %v1341_v2  ;;  %v1344_v6 = vadd.f32 %v2961_v25, %v1343_v4  ;;  %v1345_v7 = vpop.f32.mrb[47].mxu1 }
 0x175   : > { %v1661_v22 = vpop.f32.mrb[60].mxu0 }
 0x176   : > { %2578 = vtanh.f32 %v1630_v5  ;;  %v1633_v10 = vadd.f32 %v1632_v33, %v1344_v6  ;;  %v1663_v23 = vpop.f32.mrb[61].mxu0 }
 0x177   : > { %v1664_v26 = vpop.f32.mrb[62].mxu0 }
 0x178   : > { %v2575_v13 = vpop.eup %2574  ;;  %2580 = vtanh.f32 %v1633_v10  ;;  %v1666_v27 = vpop.f32.mrb[63].mxu0 }
 0x179   : > { %1881 = vst.msk [vmem:[%s2986_s25 + $0xa0] sm:$0xff] %vm1860_vm1, %v2575_v13  ;;  %v1348_v14 = vpop.f32.mrb[48].mxu1 }
 0x17a   : > { %v2577_v15 = vpop.eup %2576  ;;  %v1349_v16 = vadd.f32 %v2961_v25, %v1348_v14  ;;  %v1350_v17 = vpop.f32.mrb[49].mxu1 }
 0x17b   : > { %1882 = vst.msk [vmem:[%s2986_s25 + $0xa8] sm:$0xff] %vm1860_vm1, %v2577_v15  ;;  %v1351_v18 = vpop.f32.mrb[50].mxu1 }
 0x17c   : > { %v1638_v19 = vadd.f32 %v1637_v44, %v1349_v16  ;;  %v1352_v20 = vadd.f32 %v2961_v25, %v1351_v18  ;;  %v1353_v21 = vpop.f32.mrb[51].mxu1 }
 0x17d   : > { %v1669_v37 = vpop.f32.mrb[64].mxu0 }
 0x17e   : > { %2582 = vtanh.f32 %v1638_v19  ;;  %v1641_v24 = vadd.f32 %v1640_v47, %v1352_v20  ;;  %v1671_v38 = vpop.f32.mrb[65].mxu0 }
 0x17f   : > { %v1672_v40 = vpop.f32.mrb[66].mxu0 }
 0x180   : > { %v2579_v28 = vpop.eup %2578  ;;  %2584 = vtanh.f32 %v1641_v24  ;;  %v1674_v41 = vpop.f32.mrb[67].mxu0 }
 0x181   : > { %1883 = vst.msk [vmem:[%s2986_s25 + $0xb0] sm:$0xff] %vm1860_vm1, %v2579_v28  ;;  %v1356_v29 = vpop.f32.mrb[52].mxu1 }
 0x182   : > { %v2581_v30 = vpop.eup %2580  ;;  %v1357_v31 = vadd.f32 %v2961_v25, %v1356_v29  ;;  %v1358_v32 = vpop.f32.mrb[53].mxu1 }
 0x183   : > { %1884 = vst.msk [vmem:[%s2986_s25 + $0xb8] sm:$0xff] %vm1860_vm1, %v2581_v30  ;;  %v1359_v33 = vpop.f32.mrb[54].mxu1 }
 0x184   : > { %v1646_v34 = vadd.f32 %v1645_v58, %v1357_v31  ;;  %v1360_v35 = vadd.f32 %v2961_v25, %v1359_v33  ;;  %v1361_v36 = vpop.f32.mrb[55].mxu1 }
 0x185   : > { %v1677_v51 = vpop.f32.mrb[68].mxu0 }
 0x186   : > { %2586 = vtanh.f32 %v1646_v34  ;;  %v1649_v39 = vadd.f32 %v1648_v61, %v1360_v35  ;;  %v1679_v52 = vpop.f32.mrb[69].mxu0 }
 0x187   : > { %v1680_v54 = vpop.f32.mrb[70].mxu0 }
 0x188   : > { %v2583_v42 = vpop.eup %2582  ;;  %2588 = vtanh.f32 %v1649_v39  ;;  %v1682_v55 = vpop.f32.mrb[71].mxu0 }
 0x189   : > { %1885 = vst.msk [vmem:[%s2986_s25 + $0xc0] sm:$0xff] %vm1860_vm1, %v2583_v42  ;;  %v1364_v43 = vpop.f32.mrb[56].mxu1 }
 0x18a   : > { %v2585_v44 = vpop.eup %2584  ;;  %v1365_v45 = vadd.f32 %v2961_v25, %v1364_v43  ;;  %v1366_v46 = vpop.f32.mrb[57].mxu1 }
 0x18b   : > { %1886 = vst.msk [vmem:[%s2986_s25 + $0xc8] sm:$0xff] %vm1860_vm1, %v2585_v44  ;;  %v1367_v47 = vpop.f32.mrb[58].mxu1 }
 0x18c   : > { %v1654_v48 = vadd.f32 %v1653_v8, %v1365_v45  ;;  %v1368_v49 = vadd.f32 %v2961_v25, %v1367_v47  ;;  %v1369_v50 = vpop.f32.mrb[59].mxu1 }
 0x18d   : > { %v1685_v1 = vpop.f32.mrb[72].mxu0 }
 0x18e   : > { %2590 = vtanh.f32 %v1654_v48  ;;  %v1657_v53 = vadd.f32 %v1656_v11, %v1368_v49  ;;  %v1687_v2 = vpop.f32.mrb[73].mxu0 }
 0x18f   : > { %v1688_v4 = vpop.f32.mrb[74].mxu0 }
 0x190   : > { %v2587_v56 = vpop.eup %2586  ;;  %2592 = vtanh.f32 %v1657_v53  ;;  %v1690_v5 = vpop.f32.mrb[75].mxu0 }
 0x191   : > { %1887 = vst.msk [vmem:[%s2986_s25 + $0xd0] sm:$0xff] %vm1860_vm1, %v2587_v56  ;;  %v1372_v57 = vpop.f32.mrb[60].mxu1 }
 0x192   : > { %v2589_v58 = vpop.eup %2588  ;;  %v1373_v59 = vadd.f32 %v2961_v25, %v1372_v57  ;;  %v1374_v60 = vpop.f32.mrb[61].mxu1 }
 0x193   : > { %1888 = vst.msk [vmem:[%s2986_s25 + $0xd8] sm:$0xff] %vm1860_vm1, %v2589_v58  ;;  %v1375_v61 = vpop.f32.mrb[62].mxu1 }
 0x194   : > { %v1662_v62 = vadd.f32 %v1661_v22, %v1373_v59  ;;  %v1376_v63 = vadd.f32 %v2961_v25, %v1375_v61  ;;  %v1377_v0 = vpop.f32.mrb[63].mxu1 }
 0x195   : > { %v1693_v15 = vpop.f32.mrb[76].mxu0 }
 0x196   : > { %2594 = vtanh.f32 %v1662_v62  ;;  %v1665_v3 = vadd.f32 %v1664_v26, %v1376_v63  ;;  %v1695_v16 = vpop.f32.mrb[77].mxu0 }
 0x197   : > { %v1696_v18 = vpop.f32.mrb[78].mxu0 }
 0x198   : > { %v2591_v6 = vpop.eup %2590  ;;  %2596 = vtanh.f32 %v1665_v3  ;;  %v1698_v19 = vpop.f32.mrb[79].mxu0 }
 0x199   : > { %1889 = vst.msk [vmem:[%s2986_s25 + $0xe0] sm:$0xff] %vm1860_vm1, %v2591_v6  ;;  %v1380_v7 = vpop.f32.mrb[64].mxu1 }
 0x19a   : > { %v2593_v8 = vpop.eup %2592  ;;  %v1381_v9 = vadd.f32 %v2961_v25, %v1380_v7  ;;  %v1382_v10 = vpop.f32.mrb[65].mxu1 }
 0x19b   : > { %1890 = vst.msk [vmem:[%s2986_s25 + $0xe8] sm:$0xff] %vm1860_vm1, %v2593_v8  ;;  %v1383_v11 = vpop.f32.mrb[66].mxu1 }
 0x19c   : > { %v1670_v12 = vadd.f32 %v1669_v37, %v1381_v9  ;;  %v1384_v13 = vadd.f32 %v2961_v25, %v1383_v11  ;;  %v1385_v14 = vpop.f32.mrb[67].mxu1 }
 0x19d   : > { %v1701_v30 = vpop.f32.mrb[80].mxu0 }
 0x19e   : > { %2598 = vtanh.f32 %v1670_v12  ;;  %v1673_v17 = vadd.f32 %v1672_v40, %v1384_v13  ;;  %v1703_v31 = vpop.f32.mrb[81].mxu0 }
 0x19f   : > { %v1704_v33 = vpop.f32.mrb[82].mxu0 }
 0x1a0   : > { %v2595_v20 = vpop.eup %2594  ;;  %2600 = vtanh.f32 %v1673_v17  ;;  %v1706_v34 = vpop.f32.mrb[83].mxu0 }
 0x1a1   : > { %1891 = vst.msk [vmem:[%s2986_s25 + $0xf0] sm:$0xff] %vm1860_vm1, %v2595_v20  ;;  %v1388_v21 = vpop.f32.mrb[68].mxu1 }
 0x1a2   : > { %v2597_v22 = vpop.eup %2596  ;;  %v1389_v23 = vadd.f32 %v2961_v25, %v1388_v21  ;;  %v1390_v24 = vpop.f32.mrb[69].mxu1 }
 0x1a3   : > { %1892 = vst.msk [vmem:[%s2986_s25 + $0xf8] sm:$0xff] %vm1860_vm1, %v2597_v22  ;;  %v1391_v26 = vpop.f32.mrb[70].mxu1 }
 0x1a4   : > { %v1678_v27 = vadd.f32 %v1677_v51, %v1389_v23  ;;  %v1392_v28 = vadd.f32 %v2961_v25, %v1391_v26  ;;  %v1393_v29 = vpop.f32.mrb[71].mxu1 }
 0x1a5   : > { %v1709_v44 = vpop.f32.mrb[84].mxu0 }
 0x1a6   : > { %2602 = vtanh.f32 %v1678_v27  ;;  %v1681_v32 = vadd.f32 %v1680_v54, %v1392_v28  ;;  %v1711_v45 = vpop.f32.mrb[85].mxu0 }
 0x1a7   : > { %v1712_v47 = vpop.f32.mrb[86].mxu0 }
 0x1a8   : > { %v2599_v35 = vpop.eup %2598  ;;  %2604 = vtanh.f32 %v1681_v32  ;;  %v1714_v48 = vpop.f32.mrb[87].mxu0 }
 0x1a9   : > { %1893 = vst.msk [vmem:[%s2986_s25 + $0x100] sm:$0xff] %vm1860_vm1, %v2599_v35  ;;  %v1396_v36 = vpop.f32.mrb[72].mxu1 }
 0x1aa   : > { %v2601_v37 = vpop.eup %2600  ;;  %v1397_v38 = vadd.f32 %v2961_v25, %v1396_v36  ;;  %v1398_v39 = vpop.f32.mrb[73].mxu1 }
 0x1ab   : > { %1894 = vst.msk [vmem:[%s2986_s25 + $0x108] sm:$0xff] %vm1860_vm1, %v2601_v37  ;;  %v1399_v40 = vpop.f32.mrb[74].mxu1 }
 0x1ac   : > { %v1686_v41 = vadd.f32 %v1685_v1, %v1397_v38  ;;  %v1400_v42 = vadd.f32 %v2961_v25, %v1399_v40  ;;  %v1401_v43 = vpop.f32.mrb[75].mxu1 }
 0x1ad   : > { %v1717_v58 = vpop.f32.mrb[88].mxu0 }
 0x1ae   : > { %2606 = vtanh.f32 %v1686_v41  ;;  %v1689_v46 = vadd.f32 %v1688_v4, %v1400_v42  ;;  %v1719_v59 = vpop.f32.mrb[89].mxu0 }
 0x1af   : > { %v1720_v61 = vpop.f32.mrb[90].mxu0 }
 0x1b0   : > { %v2603_v49 = vpop.eup %2602  ;;  %2608 = vtanh.f32 %v1689_v46  ;;  %v1722_v62 = vpop.f32.mrb[91].mxu0 }
 0x1b1   : > { %1895 = vst.msk [vmem:[%s2986_s25 + $0x110] sm:$0xff] %vm1860_vm1, %v2603_v49  ;;  %v1404_v50 = vpop.f32.mrb[76].mxu1 }
 0x1b2   : > { %v2605_v51 = vpop.eup %2604  ;;  %v1405_v52 = vadd.f32 %v2961_v25, %v1404_v50  ;;  %v1406_v53 = vpop.f32.mrb[77].mxu1 }
 0x1b3   : > { %1896 = vst.msk [vmem:[%s2986_s25 + $0x118] sm:$0xff] %vm1860_vm1, %v2605_v51  ;;  %v1407_v54 = vpop.f32.mrb[78].mxu1 }
 0x1b4   : > { %v1694_v55 = vadd.f32 %v1693_v15, %v1405_v52  ;;  %v1408_v56 = vadd.f32 %v2961_v25, %v1407_v54  ;;  %v1409_v57 = vpop.f32.mrb[79].mxu1 }
 0x1b5   : > { %v1725_v8 = vpop.f32.mrb[92].mxu0 }
 0x1b6   : > { %2610 = vtanh.f32 %v1694_v55  ;;  %v1697_v60 = vadd.f32 %v1696_v18, %v1408_v56  ;;  %v1727_v9 = vpop.f32.mrb[93].mxu0 }
 0x1b7   : > { %v1728_v11 = vpop.f32.mrb[94].mxu0 }
 0x1b8   : > { %v2607_v63 = vpop.eup %2606  ;;  %2612 = vtanh.f32 %v1697_v60  ;;  %v1730_v12 = vpop.f32.mrb[95].mxu0 }
 0x1b9   : > { %1897 = vst.msk [vmem:[%s2986_s25 + $0x120] sm:$0xff] %vm1860_vm1, %v2607_v63  ;;  %v1412_v0 = vpop.f32.mrb[80].mxu1 }
 0x1ba   : > { %v2609_v1 = vpop.eup %2608  ;;  %v1413_v2 = vadd.f32 %v2961_v25, %v1412_v0  ;;  %v1414_v3 = vpop.f32.mrb[81].mxu1 }
 0x1bb   : > { %1898 = vst.msk [vmem:[%s2986_s25 + $0x128] sm:$0xff] %vm1860_vm1, %v2609_v1  ;;  %v1415_v4 = vpop.f32.mrb[82].mxu1 }
 0x1bc   : > { %v1702_v5 = vadd.f32 %v1701_v30, %v1413_v2  ;;  %v1416_v6 = vadd.f32 %v2961_v25, %v1415_v4  ;;  %v1417_v7 = vpop.f32.mrb[83].mxu1 }
 0x1bd   : > { %v1733_v22 = vpop.f32.mrb[96].mxu0 }
 0x1be   : > { %2614 = vtanh.f32 %v1702_v5  ;;  %v1705_v10 = vadd.f32 %v1704_v33, %v1416_v6  ;;  %v1735_v23 = vpop.f32.mrb[97].mxu0 }
 0x1bf   : > { %v1736_v26 = vpop.f32.mrb[98].mxu0 }
 0x1c0   : > { %v2611_v13 = vpop.eup %2610  ;;  %2616 = vtanh.f32 %v1705_v10  ;;  %v1738_v27 = vpop.f32.mrb[99].mxu0 }
 0x1c1   : > { %1899 = vst.msk [vmem:[%s2986_s25 + $0x130] sm:$0xff] %vm1860_vm1, %v2611_v13  ;;  %v1420_v14 = vpop.f32.mrb[84].mxu1 }
 0x1c2   : > { %v2613_v15 = vpop.eup %2612  ;;  %v1421_v16 = vadd.f32 %v2961_v25, %v1420_v14  ;;  %v1422_v17 = vpop.f32.mrb[85].mxu1 }
 0x1c3   : > { %1900 = vst.msk [vmem:[%s2986_s25 + $0x138] sm:$0xff] %vm1860_vm1, %v2613_v15  ;;  %v1423_v18 = vpop.f32.mrb[86].mxu1 }
 0x1c4   : > { %v1710_v19 = vadd.f32 %v1709_v44, %v1421_v16  ;;  %v1424_v20 = vadd.f32 %v2961_v25, %v1423_v18  ;;  %v1425_v21 = vpop.f32.mrb[87].mxu1 }
 0x1c5   : > { %v1741_v37 = vpop.f32.mrb[100].mxu0 }
 0x1c6   : > { %2618 = vtanh.f32 %v1710_v19  ;;  %v1713_v24 = vadd.f32 %v1712_v47, %v1424_v20  ;;  %v1743_v38 = vpop.f32.mrb[101].mxu0 }
 0x1c7   : > { %v1744_v40 = vpop.f32.mrb[102].mxu0  ;;  %v3156_v38 = vld [vmem:[%s3199_s2] ss:$0 sm:$0xff] }
 0x1c8   : > { %v2615_v28 = vpop.eup %2614  ;;  %2620 = vtanh.f32 %v1713_v24  ;;  %v1746_v41 = vpop.f32.mrb[103].mxu0 }
 0x1c9   : > { %1901 = vst.msk [vmem:[%s2986_s25 + $0x140] sm:$0xff] %vm1860_vm1, %v2615_v28  ;;  %v1428_v29 = vpop.f32.mrb[88].mxu1 }
 0x1ca   : > { %v2617_v30 = vpop.eup %2616  ;;  %v1429_v31 = vadd.f32 %v2961_v25, %v1428_v29  ;;  %v1430_v32 = vpop.f32.mrb[89].mxu1 }
 0x1cb   : > { %1902 = vst.msk [vmem:[%s2986_s25 + $0x148] sm:$0xff] %vm1860_vm1, %v2617_v30  ;;  %v1431_v33 = vpop.f32.mrb[90].mxu1 }
 0x1cc   : > { %v1718_v34 = vadd.f32 %v1717_v58, %v1429_v31  ;;  %v1432_v35 = vadd.f32 %v2961_v25, %v1431_v33  ;;  %v1433_v36 = vpop.f32.mrb[91].mxu1 }
 0x1cd   : > { %v1749_v51 = vpop.f32.mrb[104].mxu0 }
 0x1ce   : > { %2622 = vtanh.f32 %v1718_v34  ;;  %v1721_v39 = vadd.f32 %v1720_v61, %v1432_v35  ;;  %v1751_v52 = vpop.f32.mrb[105].mxu0 }
 0x1cf   : > { %v1752_v54 = vpop.f32.mrb[106].mxu0 }
 0x1d0   : > { %v2619_v42 = vpop.eup %2618  ;;  %2624 = vtanh.f32 %v1721_v39  ;;  %v1754_v55 = vpop.f32.mrb[107].mxu0 }
 0x1d1   : > { %1903 = vst.msk [vmem:[%s2986_s25 + $0x150] sm:$0xff] %vm1860_vm1, %v2619_v42  ;;  %v1436_v43 = vpop.f32.mrb[92].mxu1 }
 0x1d2   : > { %v2621_v44 = vpop.eup %2620  ;;  %v1437_v45 = vadd.f32 %v2961_v25, %v1436_v43  ;;  %v1438_v46 = vpop.f32.mrb[93].mxu1 }
 0x1d3   : > { %1904 = vst.msk [vmem:[%s2986_s25 + $0x158] sm:$0xff] %vm1860_vm1, %v2621_v44  ;;  %v1439_v47 = vpop.f32.mrb[94].mxu1 }
 0x1d4   : > { %v1726_v48 = vadd.f32 %v1725_v8, %v1437_v45  ;;  %v1440_v49 = vadd.f32 %v2961_v25, %v1439_v47  ;;  %v1441_v50 = vpop.f32.mrb[95].mxu1 }
 0x1d5   : > { %v1757_v1 = vpop.f32.mrb[108].mxu0 }
 0x1d6   : > { %2626 = vtanh.f32 %v1726_v48  ;;  %v1729_v53 = vadd.f32 %v1728_v11, %v1440_v49  ;;  %v1759_v2 = vpop.f32.mrb[109].mxu0 }
 0x1d7   : > { %v1760_v4 = vpop.f32.mrb[110].mxu0 }
 0x1d8   : > { %v2623_v56 = vpop.eup %2622  ;;  %2628 = vtanh.f32 %v1729_v53  ;;  %v1762_v5 = vpop.f32.mrb[111].mxu0 }
 0x1d9   : > { %1905 = vst.msk [vmem:[%s2986_s25 + $0x160] sm:$0xff] %vm1860_vm1, %v2623_v56  ;;  %v1444_v57 = vpop.f32.mrb[96].mxu1 }
 0x1da   : > { %v2625_v58 = vpop.eup %2624  ;;  %v1445_v59 = vadd.f32 %v2961_v25, %v1444_v57  ;;  %v1446_v60 = vpop.f32.mrb[97].mxu1 }
 0x1db   : > { %1906 = vst.msk [vmem:[%s2986_s25 + $0x168] sm:$0xff] %vm1860_vm1, %v2625_v58  ;;  %v1447_v61 = vpop.f32.mrb[98].mxu1 }
 0x1dc   : > { %v1734_v62 = vadd.f32 %v1733_v22, %v1445_v59  ;;  %v1448_v63 = vadd.f32 %v2961_v25, %v1447_v61  ;;  %v1449_v0 = vpop.f32.mrb[99].mxu1 }
 0x1dd   : > { %v1765_v15 = vpop.f32.mrb[112].mxu0 }
 0x1de   : > { %2630 = vtanh.f32 %v1734_v62  ;;  %v1737_v3 = vadd.f32 %v1736_v26, %v1448_v63  ;;  %v1767_v16 = vpop.f32.mrb[113].mxu0 }
 0x1df   : > { %v1768_v18 = vpop.f32.mrb[114].mxu0 }
 0x1e0   : > { %v2627_v6 = vpop.eup %2626  ;;  %2632 = vtanh.f32 %v1737_v3  ;;  %v1770_v19 = vpop.f32.mrb[115].mxu0 }
 0x1e1   : > { %1907 = vst.msk [vmem:[%s2986_s25 + $0x170] sm:$0xff] %vm1860_vm1, %v2627_v6  ;;  %v1452_v7 = vpop.f32.mrb[100].mxu1 }
 0x1e2   : > { %v2629_v8 = vpop.eup %2628  ;;  %v1453_v9 = vadd.f32 %v2961_v25, %v1452_v7  ;;  %v1454_v10 = vpop.f32.mrb[101].mxu1 }
 0x1e3   : > { %1908 = vst.msk [vmem:[%s2986_s25 + $0x178] sm:$0xff] %vm1860_vm1, %v2629_v8  ;;  %v1455_v11 = vpop.f32.mrb[102].mxu1 }
 0x1e4   : > { %v1742_v12 = vadd.f32 %v1741_v37, %v1453_v9  ;;  %v1456_v13 = vadd.f32 %v2961_v25, %v1455_v11  ;;  %v1457_v14 = vpop.f32.mrb[103].mxu1 }
 0x1e5   : > { %v1773_v30 = vpop.f32.mrb[116].mxu0 }
 0x1e6   : > { %2634 = vtanh.f32 %v1742_v12  ;;  %v1745_v17 = vadd.f32 %v1744_v40, %v1456_v13  ;;  %v1775_v31 = vpop.f32.mrb[117].mxu0 }
 0x1e7   : > { %v1776_v33 = vpop.f32.mrb[118].mxu0 }
 0x1e8   : > { %v2631_v20 = vpop.eup %2630  ;;  %2636 = vtanh.f32 %v1745_v17  ;;  %v1778_v34 = vpop.f32.mrb[119].mxu0 }
 0x1e9   : > { %1909 = vst.msk [vmem:[%s2986_s25 + $0x180] sm:$0xff] %vm1860_vm1, %v2631_v20  ;;  %v1460_v21 = vpop.f32.mrb[104].mxu1 }
 0x1ea   : > { %v2633_v22 = vpop.eup %2632  ;;  %v1461_v23 = vadd.f32 %v2961_v25, %v1460_v21  ;;  %v1462_v24 = vpop.f32.mrb[105].mxu1 }
 0x1eb   : > { %1910 = vst.msk [vmem:[%s2986_s25 + $0x188] sm:$0xff] %vm1860_vm1, %v2633_v22  ;;  %v1463_v26 = vpop.f32.mrb[106].mxu1 }
 0x1ec   : > { %v1750_v27 = vadd.f32 %v1749_v51, %v1461_v23  ;;  %v1464_v28 = vadd.f32 %v2961_v25, %v1463_v26  ;;  %v1465_v29 = vpop.f32.mrb[107].mxu1 }
 0x1ed   : > { %v1781_v44 = vpop.f32.mrb[120].mxu0 }
 0x1ee   : > { %2638 = vtanh.f32 %v1750_v27  ;;  %v1753_v32 = vadd.f32 %v1752_v54, %v1464_v28  ;;  %v1783_v45 = vpop.f32.mrb[121].mxu0 }
 0x1ef   : > { %v1784_v47 = vpop.f32.mrb[122].mxu0 }
 0x1f0   : > { %v2635_v35 = vpop.eup %2634  ;;  %2640 = vtanh.f32 %v1753_v32  ;;  %v1786_v48 = vpop.f32.mrb[123].mxu0 }
 0x1f1   : > { %1911 = vst.msk [vmem:[%s2986_s25 + $0x190] sm:$0xff] %vm1860_vm1, %v2635_v35  ;;  %v1468_v36 = vpop.f32.mrb[108].mxu1 }
 0x1f2   : > { %v2637_v37 = vpop.eup %2636  ;;  %v1469_v25 = vadd.f32 %v3156_v38, %v1468_v36  ;;  %v1470_v39 = vpop.f32.mrb[109].mxu1 }
 0x1f3   : > { %1912 = vst.msk [vmem:[%s2986_s25 + $0x198] sm:$0xff] %vm1860_vm1, %v2637_v37  ;;  %v1471_v40 = vpop.f32.mrb[110].mxu1 }
 0x1f4   : > { %v1758_v41 = vadd.f32 %v1757_v1, %v1469_v25  ;;  %v1472_v42 = vadd.f32 %v3156_v38, %v1471_v40  ;;  %v1473_v43 = vpop.f32.mrb[111].mxu1 }
 0x1f5   : > { %v1789_v58 = vpop.f32.mrb[124].mxu0 }
 0x1f6   : > { %2642 = vtanh.f32 %v1758_v41  ;;  %v1761_v46 = vadd.f32 %v1760_v4, %v1472_v42  ;;  %v1791_v59 = vpop.f32.mrb[125].mxu0 }
 0x1f7   : > { %v1792_v61 = vpop.f32.mrb[126].mxu0 }
 0x1f8   : > { %v2639_v49 = vpop.eup %2638  ;;  %2644 = vtanh.f32 %v1761_v46  ;;  %v1794_v62 = vpop.f32.mrb[127].mxu0 }
 0x1f9   : > { %1913 = vst.msk [vmem:[%s2986_s25 + $0x1a0] sm:$0xff] %vm1860_vm1, %v2639_v49  ;;  %v1476_v50 = vpop.f32.mrb[112].mxu1 }
 0x1fa   : > { %v2641_v51 = vpop.eup %2640  ;;  %v1477_v52 = vadd.f32 %v3156_v38, %v1476_v50  ;;  %v1478_v53 = vpop.f32.mrb[113].mxu1 }
 0x1fb   : > { %1914 = vst.msk [vmem:[%s2986_s25 + $0x1a8] sm:$0xff] %vm1860_vm1, %v2641_v51  ;;  %v1479_v54 = vpop.f32.mrb[114].mxu1 }
 0x1fc   : > { %v1766_v55 = vadd.f32 %v1765_v15, %v1477_v52  ;;  %v1480_v56 = vadd.f32 %v3156_v38, %v1479_v54  ;;  %v1481_v57 = vpop.f32.mrb[115].mxu1 }
 0x1fe   : > { %2646 = vtanh.f32 %v1766_v55  ;;  %v1769_v60 = vadd.f32 %v1768_v18, %v1480_v56 }
 0x200   : > { %v2643_v63 = vpop.eup %2642  ;;  %2648 = vtanh.f32 %v1769_v60 }
 0x201   : > { %1915 = vst.msk [vmem:[%s2986_s25 + $0x1b0] sm:$0xff] %vm1860_vm1, %v2643_v63  ;;  %v1484_v0 = vpop.f32.mrb[116].mxu1 }
 0x202   : > { %v2645_v1 = vpop.eup %2644  ;;  %v1485_v2 = vadd.f32 %v3156_v38, %v1484_v0  ;;  %v1486_v3 = vpop.f32.mrb[117].mxu1 }
 0x203   : > { %1916 = vst.msk [vmem:[%s2986_s25 + $0x1b8] sm:$0xff] %vm1860_vm1, %v2645_v1  ;;  %v1487_v4 = vpop.f32.mrb[118].mxu1 }
 0x204   : > { %v1774_v5 = vadd.f32 %v1773_v30, %v1485_v2  ;;  %v1488_v6 = vadd.f32 %v3156_v38, %v1487_v4  ;;  %v1489_v7 = vpop.f32.mrb[119].mxu1 }
 0x206   : > { %2650 = vtanh.f32 %v1774_v5  ;;  %v1777_v8 = vadd.f32 %v1776_v33, %v1488_v6 }
 0x208   : > { %v2647_v9 = vpop.eup %2646  ;;  %2652 = vtanh.f32 %v1777_v8 }
 0x209   : > { %1917 = vst.msk [vmem:[%s2986_s25 + $0x1c0] sm:$0xff] %vm1860_vm1, %v2647_v9  ;;  %v1492_v10 = vpop.f32.mrb[120].mxu1 }
 0x20a   : > { %v2649_v11 = vpop.eup %2648  ;;  %v1493_v12 = vadd.f32 %v3156_v38, %v1492_v10  ;;  %v1494_v13 = vpop.f32.mrb[121].mxu1 }
 0x20b   : > { %1918 = vst.msk [vmem:[%s2986_s25 + $0x1c8] sm:$0xff] %vm1860_vm1, %v2649_v11  ;;  %v1495_v14 = vpop.f32.mrb[122].mxu1 }
 0x20c   : > { %v1782_v15 = vadd.f32 %v1781_v44, %v1493_v12  ;;  %v1496_v16 = vadd.f32 %v3156_v38, %v1495_v14  ;;  %v1497_v17 = vpop.f32.mrb[123].mxu1 }
 0x20e   : > { %2654 = vtanh.f32 %v1782_v15  ;;  %v1785_v18 = vadd.f32 %v1784_v47, %v1496_v16 }
 0x210   : > { %v2651_v19 = vpop.eup %2650  ;;  %2656 = vtanh.f32 %v1785_v18 }
 0x211   : > { %1919 = vst.msk [vmem:[%s2986_s25 + $0x1d0] sm:$0xff] %vm1860_vm1, %v2651_v19  ;;  %v1500_v20 = vpop.f32.mrb[124].mxu1 }
 0x212   : > { %v2653_v21 = vpop.eup %2652  ;;  %v1501_v22 = vadd.f32 %v3156_v38, %v1500_v20  ;;  %v1502_v23 = vpop.f32.mrb[125].mxu1 }
 0x213   : > { %1920 = vst.msk [vmem:[%s2986_s25 + $0x1d8] sm:$0xff] %vm1860_vm1, %v2653_v21  ;;  %v1503_v24 = vpop.f32.mrb[126].mxu1 }
 0x214   : > { %v1790_v26 = vadd.f32 %v1789_v58, %v1501_v22  ;;  %v1504_v27 = vadd.f32 %v3156_v38, %v1503_v24  ;;  %v1505_v28 = vpop.f32.mrb[127].mxu1 }
 0x216   : > { %2658 = vtanh.f32 %v1790_v26  ;;  %v1793_v29 = vadd.f32 %v1792_v61, %v1504_v27 }
 0x218   : > { %v2655_v30 = vpop.eup %2654  ;;  %2660 = vtanh.f32 %v1793_v29 }
 0x219   : > { %1921 = vst.msk [vmem:[%s2986_s25 + $0x1e0] sm:$0xff] %vm1860_vm1, %v2655_v30 }
 0x21a   : > { %v2657_v31 = vpop.eup %2656 }
 0x21b   : > { %1922 = vst.msk [vmem:[%s2986_s25 + $0x1e8] sm:$0xff] %vm1860_vm1, %v2657_v31 }
 0x220   : > { %v2659_v32 = vpop.eup %2658 }
 0x221   : > { %1923 = vst.msk [vmem:[%s2986_s25 + $0x1f0] sm:$0xff] %vm1860_vm1, %v2659_v32 }
 0x222   : > { %v2661_v33 = vpop.eup %2660 }
 0x223   : > { %1924 = vst.msk [vmem:[%s2986_s25 + $0x1f8] sm:$0xff] %vm1860_vm1, %v2661_v33 }
 0x224 PF: > { %s13_s12 = sadd.s32 1, %s2669_s12  }
 0x225   : > { %p10_p4 = scmp.ge.s32.totalorder %s13_s12, 6  }
 0x227   :  { %12 = sbr.rel (!%p10_p4) target bundleno = 1 (0x1), region = 62 }

</bundles_post_ra>
